<compile_context>
chip_gen: v5e
topology: v5e:2x2
jax: 0.10.0
libtpu: 0.0.40
codegen_flags: <defaults>
</compile_context>

<pallas_src>
import jax
import jax.numpy as jnp
from jax.experimental import pallas as pl
from jax.experimental.pallas import tpu as pltpu


# ----------------------------- in-kernel helpers ------------------------------
def _assemble_padded(top, mid, bot):
    """[top(1,W,C); mid(Ht,W,C); bot(1,W,C)] -> (Ht+2, W+2, C) with zero columns."""
    x = jnp.concatenate([top, mid, bot], axis=0)
    zcol = jnp.zeros((x.shape[0], 1, x.shape[2]), x.dtype)
    return jnp.concatenate([zcol, x, zcol], axis=1)


def _conv3x3(xp, w_mat):
    """3x3 'valid' conv of padded band xp (Hp,Wp,C) with w_mat (9*C, Cout).

    Operands are cast to w_mat.dtype (bf16 on the fast path), accumulated in
    f32 on the MXU.  Small C: one fat im2col matmul.  Large C (>= MXU depth):
    9 accumulated K=C dots, skipping the 9x patch VMEM blow-up.
    """
    Hp, Wp, C = xp.shape
    Ht, Wt = Hp - 2, Wp - 2
    cd = w_mat.dtype
    cout = w_mat.shape[1]
    if C >= 128:
        acc = jnp.zeros((Ht * Wt, cout), jnp.float32)
        tap = 0
        for dy in range(3):
            for dx in range(3):
                lhs = xp[dy:dy + Ht, dx:dx + Wt, :].reshape(Ht * Wt, C).astype(cd)
                acc = acc + jnp.dot(lhs, w_mat[tap * C:(tap + 1) * C, :],
                                    preferred_element_type=jnp.float32)
                tap += 1
        return acc
    taps = [xp[dy:dy + Ht, dx:dx + Wt, :] for dy in range(3) for dx in range(3)]
    patch = jnp.concatenate(taps, axis=-1).reshape(Ht * Wt, 9 * C).astype(cd)
    return jnp.dot(patch, w_mat, preferred_element_type=jnp.float32)


def _emit_stats(z2d, stats_ref):
    """Per-tile BN partials: row0 = sum(z), row1 = sum((z - tile_mean)^2)."""
    cnt = z2d.shape[0]
    s = jnp.sum(z2d, axis=0, keepdims=True)
    m2 = jnp.sum((z2d - s / cnt) ** 2, axis=0, keepdims=True)
    stats_ref[...] = jnp.concatenate([s, m2], axis=0)


# ----------------------------- Pallas kernels --------------------------------
def _conv1_fused_kernel(x2_ref, x2t_ref, x2b_ref, x1_ref, x1t_ref, x1b_ref,
                        w_ref, b_ref, z_ref, stats_ref):
    """Fused channel-concat(x2, up(x1)) + conv1 (3x3, pad=1) + bias; BN1 partials.

    x2_ref / x1_ref:   (Ht, W, C1) main bands
    x?t_ref / x?b_ref: (1, W, C1)  clamped neighbour rows (zeroed at image border)
    w_ref:             (9*Cin, Cmid) in compute dtype; b_ref: (1, Cmid) f32
    z_ref:             (Ht, W, Cmid) conv output (pre-BN, f32)
    stats_ref:         (2, Cmid)
    """
    h_idx = pl.program_id(1)
    n_h = pl.num_programs(1)
    top = jnp.concatenate([x2t_ref[...], x1t_ref[...]], axis=-1)
    mid = jnp.concatenate([x2_ref[...], x1_ref[...]], axis=-1)
    bot = jnp.concatenate([x2b_ref[...], x1b_ref[...]], axis=-1)
    # image-boundary halo rows are the conv's zero padding
    top = top * jnp.where(h_idx > 0, 1, 0).astype(top.dtype)
    bot = bot * jnp.where(h_idx < n_h - 1, 1, 0).astype(bot.dtype)
    xp = _assemble_padded(top, mid, bot)
    z = _conv3x3(xp, w_ref[...]) + b_ref[...]
    z_ref[...] = z.reshape(mid.shape[0], mid.shape[1], -1)
    _emit_stats(z, stats_ref)


def _bn_relu_conv2_kernel(z1_ref, z1t_ref, z1b_ref, sc_ref, sh_ref, w_ref, b_ref,
                          z2_ref, stats_ref):
    """BN1 (global scale/shift) + ReLU -> conv2 (3x3, pad=1) + bias; BN2 partials."""
    sc = sc_ref[...]
    sh = sh_ref[...]
    h_idx = pl.program_id(1)
    n_h = pl.num_programs(1)
    top = jnp.maximum(z1t_ref[...] * sc + sh, 0.0)
    mid = jnp.maximum(z1_ref[...] * sc + sh, 0.0)
    bot = jnp.maximum(z1b_ref[...] * sc + sh, 0.0)
    top = top * jnp.where(h_idx > 0, 1, 0).astype(top.dtype)
    bot = bot * jnp.where(h_idx < n_h - 1, 1, 0).astype(bot.dtype)
    hp = _assemble_padded(top, mid, bot)
    z2 = _conv3x3(hp, w_ref[...]) + b_ref[...]
    z2_ref[...] = z2.reshape(mid.shape[0], mid.shape[1], -1)
    _emit_stats(z2, stats_ref)


def _bn_relu_kernel(z_ref, sc_ref, sh_ref, o_ref):
    """BN2 (global scale/shift) + ReLU, lane-dense elementwise block."""
    o_ref[...] = jnp.maximum(z_ref[...] * sc_ref[...] + sh_ref[...], 0.0)


# ----------------------------- host-side helpers -----------------------------
def _pick_tile_rows(H, W, c_in, c_out, compute_dtype, budget_bytes, max_rows=None):
    """Largest divisor of H whose per-band working set fits the VMEM budget."""
    cb = jnp.dtype(compute_dtype).itemsize
    per_row = W * (2 * 4 * c_in        # double-buffered input band(s)
                   + 2 * 4 * c_out     # double-buffered f32 output band
                   + 9 * c_in * cb     # im2col patch (compute dtype)
                   + 4 * c_out)        # f32 conv accumulator
    ht_cap = max(1, min(H, budget_bytes // max(per_row, 1)))
    if max_rows is not None:
        ht_cap = min(ht_cap, max_rows)
    best = 1
    for t in range(1, ht_cap + 1):
        if H % t == 0:
            best = t
    return best


def _largest_ok_divisor(total, target):
    """Largest divisor of `total` that is <= target and a multiple of 8 (else total)."""
    target = max(8, min(target, total))
    r = target
    while r >= 8:
        if total % r == 0 and r % 8 == 0:
            return r
        r -= 1
    return total


def _finalize_bn(stats, gamma, beta, tile_count, total_count, eps=1e-5):
    """Chan merge of per-tile (sum, centered-M2) -> BN scale/shift (biased var)."""
    s = stats[:, :, 0, :]
    m2 = stats[:, :, 1, :]
    mean = jnp.sum(s, axis=(0, 1)) / total_count
    tmean = s / tile_count
    var = (jnp.sum(m2, axis=(0, 1))
           + tile_count * jnp.sum((tmean - mean) ** 2, axis=(0, 1))) / total_count
    var = jnp.maximum(var, 0.0)
    scale = gamma * jax.lax.rsqrt(var + eps)
    shift = beta - mean * scale
    return scale.reshape(1, -1), shift.reshape(1, -1)


def up_double_conv_pallas(x2_nhwc, x1u_nhwc, params, compute_dtype=jnp.bfloat16,
                          vmem_budget_bytes=12 << 20):
    """concat([x2, x1u], channel) -> DoubleConv, tiled over (batch, H-band)."""
    N, H, W, c2 = x2_nhwc.shape
    c1 = x1u_nhwc.shape[-1]
    w1, b1, g1, be1, w2, b2, g2, be2 = params
    Cin = c2 + c1
    Cmid = w1.shape[3]
    Cout = w2.shape[3]
    assert w1.shape[2] == Cin and w2.shape[2] == Cmid

    Ht = _pick_tile_rows(H, W, max(Cin, Cmid), max(Cmid, Cout),
                         compute_dtype, vmem_budget_bytes)
    nH = H // Ht
    tile_count = Ht * W
    total_count = N * H * W

    # MXU operands in compute dtype (bf16 default), f32 accumulation / BN math.
    x2c = x2_nhwc.astype(compute_dtype)
    x1c = x1u_nhwc.astype(compute_dtype)
    w1r = w1.reshape(9 * Cin, Cmid).astype(compute_dtype)
    w2r = w2.reshape(9 * Cmid, Cout).astype(compute_dtype)
    b1r = b1.reshape(1, -1).astype(jnp.float32)
    b2r = b2.reshape(1, -1).astype(jnp.float32)

    cparams = pltpu.CompilerParams(dimension_semantics=("parallel", "parallel"))

    def band_specs(C):
        main = pl.BlockSpec((None, Ht, W, C), lambda n, h: (n, h, 0, 0))
        top = pl.BlockSpec((None, 1, W, C),
                           lambda n, h: (n, jnp.maximum(h * Ht - 1, 0), 0, 0))
        bot = pl.BlockSpec((None, 1, W, C),
                           lambda n, h: (n, jnp.minimum(h * Ht + Ht, H - 1), 0, 0))
        return [main, top, bot]

    def const2d(shape):
        return pl.BlockSpec(shape, lambda n, h: (0, 0))

    # ---- pass 1: fused concat + conv1 + bias, per-tile BN1 partial statistics
    z1, st1 = pl.pallas_call(
        _conv1_fused_kernel,
        grid=(N, nH),
        in_specs=band_specs(c2) + band_specs(c1) + [
            const2d((9 * Cin, Cmid)),
            const2d((1, Cmid)),
        ],
        out_specs=(
            pl.BlockSpec((None, Ht, W, Cmid), lambda n, h: (n, h, 0, 0)),
            pl.BlockSpec((None, None, 2, Cmid), lambda n, h: (n, h, 0, 0)),
        ),
        out_shape=(
            jax.ShapeDtypeStruct((N, H, W, Cmid), jnp.float32),
            jax.ShapeDtypeStruct((N, nH, 2, Cmid), jnp.float32),
        ),
        compiler_params=cparams,
    )(x2c, x2c, x2c, x1c, x1c, x1c, w1r, b1r)

    sc1, sh1 = _finalize_bn(st1, g1, be1, tile_count, total_count)

    # ---- pass 2: BN1 + ReLU (global stats) -> conv2 + bias, BN2 partial stats
    z2, st2 = pl.pallas_call(
        _bn_relu_conv2_kernel,
        grid=(N, nH),
        in_specs=band_specs(Cmid) + [
            const2d((1, Cmid)),
            const2d((1, Cmid)),
            const2d((9 * Cmid, Cout)),
            const2d((1, Cout)),
        ],
        out_specs=(
            pl.BlockSpec((None, Ht, W, Cout), lambda n, h: (n, h, 0, 0)),
            pl.BlockSpec((None, None, 2, Cout), lambda n, h: (n, h, 0, 0)),
        ),
        out_shape=(
            jax.ShapeDtypeStruct((N, H, W, Cout), jnp.float32),
            jax.ShapeDtypeStruct((N, nH, 2, Cout), jnp.float32),
        ),
        compiler_params=cparams,
    )(z1, z1, z1, sc1, sh1, w2r, b2r)

    sc2, sh2 = _finalize_bn(st2, g2, be2, tile_count, total_count)

    # ---- pass 3: BN2 + ReLU, lane-dense elementwise view of z2
    total = N * H * W * Cout
    if Cout % 128 == 0:
        rows, lanes = N * H * W, Cout
        sc_t, sh_t = sc2, sh2
    elif total % 128 == 0 and 128 % Cout == 0:
        rep = 128 // Cout
        rows, lanes = total // 128, 128
        sc_t, sh_t = jnp.tile(sc2, (1, rep)), jnp.tile(sh2, (1, rep))
    else:
        # TODO(synk): pad Cout to a lane multiple to avoid masked partial stores.
        rows, lanes = N * H * W, Cout
        sc_t, sh_t = sc2, sh2
    R = _largest_ok_divisor(rows, max(8, min(2048, rows // 2)))
    y = pl.pallas_call(
        _bn_relu_kernel,
        grid=(rows // R,),
        in_specs=[
            pl.BlockSpec((R, lanes), lambda i: (i, 0)),
            pl.BlockSpec((1, lanes), lambda i: (0, 0)),
            pl.BlockSpec((1, lanes), lambda i: (0, 0)),
        ],
        out_specs=pl.BlockSpec((R, lanes), lambda i: (i, 0)),
        out_shape=jax.ShapeDtypeStruct((rows, lanes), jnp.float32),
        compiler_params=pltpu.CompilerParams(dimension_semantics=("parallel",)),
    )(z2.reshape(rows, lanes), sc_t, sh_t)
    return y.reshape(N, H, W, Cout)


# ------------------------------- XLA glue ------------------------------------
def _interp_matrix(n_in, n_out):
    """Bilinear interpolation matrix, align_corners=True."""
    if n_in == 1:
        return jnp.ones((n_out, 1), jnp.float32)
    src = jnp.arange(n_out, dtype=jnp.float32) * (n_in - 1) / (n_out - 1)
    i0 = jnp.clip(jnp.floor(src).astype(jnp.int32), 0, n_in - 2)
    frac = src - i0.astype(jnp.float32)
    m = jnp.zeros((n_out, n_in), jnp.float32)
    m = m.at[jnp.arange(n_out), i0].add(1.0 - frac)
    m = m.at[jnp.arange(n_out), i0 + 1].add(frac)
    return m


def bilinear_upsample_x2_nhwc(x_nchw):
    """nn.Upsample(scale_factor=2, bilinear, align_corners=True), NCHW in -> NHWC out."""
    _, _, H, W = x_nchw.shape
    Mh = _interp_matrix(H, 2 * H)
    Mw = _interp_matrix(W, 2 * W)
    t = jnp.einsum('nchw,pw->nchp', x_nchw, Mw)
    return jnp.einsum('nchp,oh->nopc', t, Mh)


def _upsample_and_pad(x1_nchw, x2_nchw):
    """Upsample x1 (NHWC out) and F.pad it to x2's spatial size; transpose x2."""
    x1u = bilinear_upsample_x2_nhwc(x1_nchw)
    H, W = x2_nchw.shape[2], x2_nchw.shape[3]
    dY, dX = H - x1u.shape[1], W - x1u.shape[2]
    x1u = jnp.pad(x1u, ((0, 0), (dY // 2, dY - dY // 2),
                        (dX // 2, dX - dX // 2), (0, 0)))
    x2_nhwc = jnp.transpose(x2_nchw, (0, 2, 3, 1))
    return x2_nhwc, x1u


def up_forward(x1, x2, params, compute_dtype=jnp.bfloat16):
    """Up.forward(x1, x2) with NCHW inputs/outputs (PyTorch convention)."""
    x2_nhwc, x1u = _upsample_and_pad(x1, x2)
    y_nhwc = up_double_conv_pallas(x2_nhwc, x1u, params, compute_dtype=compute_dtype)
    return jnp.transpose(y_nhwc, (0, 3, 1, 2))


def init_up_params(key, in_channels, out_channels):
    """Up(in_channels, out_channels, bilinear=True) parameters (HWIO conv weights).
    DoubleConv(in_channels, out_channels, mid_channels=in_channels // 2)."""
    mid = in_channels // 2
    ks = jax.random.split(key, 8)
    w1 = 0.1 * jax.random.normal(ks[0], (3, 3, in_channels, mid), jnp.float32)
    b1 = 0.1 * jax.random.normal(ks[1], (mid,), jnp.float32)
    g1 = 1.0 + 0.1 * jax.random.normal(ks[2], (mid,), jnp.float32)
    be1 = 0.1 * jax.random.normal(ks[3], (mid,), jnp.float32)
    w2 = 0.1 * jax.random.normal(ks[4], (3, 3, mid, out_channels), jnp.float32)
    b2 = 0.1 * jax.random.normal(ks[5], (out_channels,), jnp.float32)
    g2 = 1.0 + 0.1 * jax.random.normal(ks[6], (out_channels,), jnp.float32)
    be2 = 0.1 * jax.random.normal(ks[7], (out_channels,), jnp.float32)
    return (w1, b1, g1, be1, w2, b2, g2, be2)


# --------------------------- pure-JAX reference -------------------------------
def _double_conv_ref(x_nhwc, params, eps=1e-5, compute_dtype=jnp.float32):
    """Reference DoubleConv; compute_dtype matches the kernel's MXU operand dtype."""
    w1, b1, g1, be1, w2, b2, g2, be2 = params

    def block(x, w, b, g, be):
        z = jax.lax.conv_general_dilated(
            x.astype(compute_dtype), w.astype(compute_dtype), (1, 1), ((1, 1), (1, 1)),
            dimension_numbers=("NHWC", "HWIO", "NHWC"),
            preferred_element_type=jnp.float32,
            precision=jax.lax.Precision.HIGHEST) + b
        mean = jnp.mean(z, axis=(0, 1, 2))
        var = jnp.mean((z - mean) ** 2, axis=(0, 1, 2))
        h = (z - mean) * jax.lax.rsqrt(var + eps) * g + be
        return jnp.maximum(h, 0.0)

    return block(block(x_nhwc, w1, b1, g1, be1), w2, b2, g2, be2)


def up_forward_ref(x1, x2, params, compute_dtype=jnp.float32):
    x2_nhwc, x1u = _upsample_and_pad(x1, x2)
    x_nhwc = jnp.concatenate([x2_nhwc, x1u], axis=-1)
    y = _double_conv_ref(x_nhwc, params, compute_dtype=compute_dtype)
    return jnp.transpose(y, (0, 3, 1, 2))


if __name__ == "__main__":
    key = jax.random.PRNGKey(0)
    k1, k2, kp = jax.random.split(key, 3)

    in_channels, out_channels = 8, 8
    N, H, W = 2, 16, 16
    # x1: deeper feature (in_channels // 2 channels, half resolution)
    # x2: skip connection (in_channels // 2 channels, full resolution)
    x1 = jax.random.normal(k1, (N, in_channels // 2, H // 2, W // 2), jnp.float32)
    x2 = jax.random.normal(k2, (N, in_channels // 2, H, W), jnp.float32)
    params = init_up_params(kp, in_channels, out_channels)

    up = jax.jit(up_forward, static_argnames=("compute_dtype",))

    # bf16 MXU path (production path on v5e/v6e/v7x), checked vs. a
    # precision-matched reference (bf16 operands, f32 accumulation).
    y_bf16 = up(x1, x2, params, compute_dtype=jnp.bfloat16)
    jax.block_until_ready(y_bf16)
    assert y_bf16.shape == (N, out_channels, H, W)
    ref_bf16 = up_forward_ref(x1, x2, params, compute_dtype=jnp.bfloat16)
    err_bf16 = float(jnp.max(jnp.abs(y_bf16 - ref_bf16)))
    assert err_bf16 < 1e-2, f"bf16 path max abs err vs matched reference: {err_bf16}"

    # f32 MXU path, checked vs. the Precision.HIGHEST reference.
    y_f32 = up(x1, x2, params, compute_dtype=jnp.float32)
    jax.block_until_ready(y_f32)
    ref_f32 = up_forward_ref(x1, x2, params, compute_dtype=jnp.float32)
    err_f32 = float(jnp.max(jnp.abs(y_f32 - ref_f32)))
    assert err_f32 < 1e-2, f"f32 path max abs err vs reference: {err_f32}"

    print("KERNEL_OK")
</pallas_src>

<mosaic_0001>
module attributes {stable_mosaic.version = 11 : i64} {
  func.func @_conv1_fused_kernel(%arg0: i32, %arg1: i32, %arg2: memref<1x16x16x4xbf16, #tpu.memory_space<vmem>>, %arg3: memref<1x1x16x4xbf16, #tpu.memory_space<vmem>>, %arg4: memref<1x1x16x4xbf16, #tpu.memory_space<vmem>>, %arg5: memref<1x16x16x4xbf16, #tpu.memory_space<vmem>>, %arg6: memref<1x1x16x4xbf16, #tpu.memory_space<vmem>>, %arg7: memref<1x1x16x4xbf16, #tpu.memory_space<vmem>>, %arg8: memref<72x4xbf16, #tpu.memory_space<vmem>>, %arg9: memref<1x4xf32, #tpu.memory_space<vmem>>, %arg10: memref<1x16x16x4xf32, #tpu.memory_space<vmem>>, %arg11: memref<1x1x2x4xf32, #tpu.memory_space<vmem>>) attributes {dimension_semantics = [#tpu.dimension_semantics<parallel>, #tpu.dimension_semantics<parallel>], iteration_bounds = array<i64: 2, 1>, scalar_prefetch = 0 : i64, scratch_operands = 0 : i64, tpu.core_type = #tpu.core_type<tc>, window_params = [{transform_indices = @transform_0, window_bounds = array<i64: 1, 16, 16, 4>}, {transform_indices = @transform_1, window_bounds = array<i64: 1, 1, 16, 4>}, {transform_indices = @transform_2, window_bounds = array<i64: 1, 1, 16, 4>}, {transform_indices = @transform_3, window_bounds = array<i64: 1, 16, 16, 4>}, {transform_indices = @transform_4, window_bounds = array<i64: 1, 1, 16, 4>}, {transform_indices = @transform_5, window_bounds = array<i64: 1, 1, 16, 4>}, {pipeline_mode = #tpu.pipeline_mode<synchronous>, transform_indices = @transform_6, window_bounds = array<i64: 72, 4>}, {pipeline_mode = #tpu.pipeline_mode<synchronous>, transform_indices = @transform_7, window_bounds = array<i64: 1, 4>}, {transform_indices = @transform_8, window_bounds = array<i64: 1, 16, 16, 4>}, {transform_indices = @transform_9, window_bounds = array<i64: 1, 1, 2, 4>}]} {
    %c0 = arith.constant 0 : index
    %c0_0 = arith.constant 0 : index
    %c0_1 = arith.constant 0 : index
    %c0_2 = arith.constant 0 : index
    %0 = vector.load %arg3[%c0, %c0_0, %c0_1, %c0_2] : memref<1x1x16x4xbf16, #tpu.memory_space<vmem>>, vector<1x1x16x4xbf16>
    %1 = vector.shape_cast %0 : vector<1x1x16x4xbf16> to vector<1x16x4xbf16>
    %c0_3 = arith.constant 0 : index
    %c0_4 = arith.constant 0 : index
    %c0_5 = arith.constant 0 : index
    %c0_6 = arith.constant 0 : index
    %2 = vector.load %arg6[%c0_3, %c0_4, %c0_5, %c0_6] : memref<1x1x16x4xbf16, #tpu.memory_space<vmem>>, vector<1x1x16x4xbf16>
    %3 = vector.shape_cast %2 : vector<1x1x16x4xbf16> to vector<1x16x4xbf16>
    %4 = tpu.concatenate %1, %3 in 2 : vector<1x16x4xbf16>, vector<1x16x4xbf16> -> vector<1x16x8xbf16>
    %c0_7 = arith.constant 0 : index
    %c0_8 = arith.constant 0 : index
    %c0_9 = arith.constant 0 : index
    %c0_10 = arith.constant 0 : index
    %5 = vector.load %arg2[%c0_7, %c0_8, %c0_9, %c0_10] : memref<1x16x16x4xbf16, #tpu.memory_space<vmem>>, vector<1x16x16x4xbf16>
    %6 = vector.shape_cast %5 : vector<1x16x16x4xbf16> to vector<16x16x4xbf16>
    %c0_11 = arith.constant 0 : index
    %c0_12 = arith.constant 0 : index
    %c0_13 = arith.constant 0 : index
    %c0_14 = arith.constant 0 : index
    %7 = vector.load %arg5[%c0_11, %c0_12, %c0_13, %c0_14] : memref<1x16x16x4xbf16, #tpu.memory_space<vmem>>, vector<1x16x16x4xbf16>
    %8 = vector.shape_cast %7 : vector<1x16x16x4xbf16> to vector<16x16x4xbf16>
    %9 = tpu.concatenate %6, %8 in 2 : vector<16x16x4xbf16>, vector<16x16x4xbf16> -> vector<16x16x8xbf16>
    %c0_15 = arith.constant 0 : index
    %c0_16 = arith.constant 0 : index
    %c0_17 = arith.constant 0 : index
    %c0_18 = arith.constant 0 : index
    %10 = vector.load %arg4[%c0_15, %c0_16, %c0_17, %c0_18] : memref<1x1x16x4xbf16, #tpu.memory_space<vmem>>, vector<1x1x16x4xbf16>
    %11 = vector.shape_cast %10 : vector<1x1x16x4xbf16> to vector<1x16x4xbf16>
    %c0_19 = arith.constant 0 : index
    %c0_20 = arith.constant 0 : index
    %c0_21 = arith.constant 0 : index
    %c0_22 = arith.constant 0 : index
    %12 = vector.load %arg7[%c0_19, %c0_20, %c0_21, %c0_22] : memref<1x1x16x4xbf16, #tpu.memory_space<vmem>>, vector<1x1x16x4xbf16>
    %13 = vector.shape_cast %12 : vector<1x1x16x4xbf16> to vector<1x16x4xbf16>
    %14 = tpu.concatenate %11, %13 in 2 : vector<1x16x4xbf16>, vector<1x16x4xbf16> -> vector<1x16x8xbf16>
    %c0_i32 = arith.constant 0 : i32
    %15 = arith.cmpi sgt, %arg1, %c0_i32 : i32
    %c1_i32 = arith.constant 1 : i32
    %c0_i32_23 = arith.constant 0 : i32
    %16 = arith.select %15, %c1_i32, %c0_i32_23 : i32
    %17 = arith.sitofp %16 : i32 to bf16
    %18 = vector.broadcast %17 : bf16 to vector<1x16x8xbf16>
    %19 = arith.mulf %4, %18 : vector<1x16x8xbf16>
    %c0_i32_24 = arith.constant 0 : i32
    %20 = arith.cmpi slt, %arg1, %c0_i32_24 : i32
    %c1_i32_25 = arith.constant 1 : i32
    %c0_i32_26 = arith.constant 0 : i32
    %21 = arith.select %20, %c1_i32_25, %c0_i32_26 : i32
    %22 = arith.sitofp %21 : i32 to bf16
    %23 = vector.broadcast %22 : bf16 to vector<1x16x8xbf16>
    %24 = arith.mulf %14, %23 : vector<1x16x8xbf16>
    %25 = tpu.concatenate %19, %9, %24 in 0 : vector<1x16x8xbf16>, vector<16x16x8xbf16>, vector<1x16x8xbf16> -> vector<18x16x8xbf16>
    %cst = arith.constant 0.000000e+00 : bf16
    %26 = vector.broadcast %cst : bf16 to vector<18x1x8xbf16>
    %27 = tpu.concatenate %26, %25, %26 in 1 : vector<18x1x8xbf16>, vector<18x16x8xbf16>, vector<18x1x8xbf16> -> vector<18x18x8xbf16>
    %c0_27 = arith.constant 0 : index
    %c0_28 = arith.constant 0 : index
    %28 = vector.load %arg8[%c0_27, %c0_28] : memref<72x4xbf16, #tpu.memory_space<vmem>>, vector<72x4xbf16>
    %29 = vector.extract_strided_slice %27 {offsets = [0, 0, 0], sizes = [16, 16, 8], strides = [1, 1, 1]} : vector<18x18x8xbf16> to vector<16x16x8xbf16>
    %30 = vector.extract_strided_slice %27 {offsets = [0, 1, 0], sizes = [16, 16, 8], strides = [1, 1, 1]} : vector<18x18x8xbf16> to vector<16x16x8xbf16>
    %31 = vector.extract_strided_slice %27 {offsets = [0, 2, 0], sizes = [16, 16, 8], strides = [1, 1, 1]} : vector<18x18x8xbf16> to vector<16x16x8xbf16>
    %32 = vector.extract_strided_slice %27 {offsets = [1, 0, 0], sizes = [16, 16, 8], strides = [1, 1, 1]} : vector<18x18x8xbf16> to vector<16x16x8xbf16>
    %33 = vector.extract_strided_slice %27 {offsets = [1, 1, 0], sizes = [16, 16, 8], strides = [1, 1, 1]} : vector<18x18x8xbf16> to vector<16x16x8xbf16>
    %34 = vector.extract_strided_slice %27 {offsets = [1, 2, 0], sizes = [16, 16, 8], strides = [1, 1, 1]} : vector<18x18x8xbf16> to vector<16x16x8xbf16>
    %35 = vector.extract_strided_slice %27 {offsets = [2, 0, 0], sizes = [16, 16, 8], strides = [1, 1, 1]} : vector<18x18x8xbf16> to vector<16x16x8xbf16>
    %36 = vector.extract_strided_slice %27 {offsets = [2, 1, 0], sizes = [16, 16, 8], strides = [1, 1, 1]} : vector<18x18x8xbf16> to vector<16x16x8xbf16>
    %37 = vector.extract_strided_slice %27 {offsets = [2, 2, 0], sizes = [16, 16, 8], strides = [1, 1, 1]} : vector<18x18x8xbf16> to vector<16x16x8xbf16>
    %38 = tpu.concatenate %29, %30, %31, %32, %33, %34, %35, %36, %37 in 2 : vector<16x16x8xbf16>, vector<16x16x8xbf16>, vector<16x16x8xbf16>, vector<16x16x8xbf16>, vector<16x16x8xbf16>, vector<16x16x8xbf16>, vector<16x16x8xbf16>, vector<16x16x8xbf16>, vector<16x16x8xbf16> -> vector<16x16x72xbf16>
    %39 = vector.shape_cast %38 : vector<16x16x72xbf16> to vector<256x72xbf16>
    %cst_29 = arith.constant dense<0.000000e+00> : vector<256x4xf32>
    %40 = tpu.matmul %39, %28, %cst_29 {dimension_numbers = #tpu.dot_dimension_numbers<[1], [0], [0], [1], [0, 0, 1, 1], [], []>} : vector<256x72xbf16>, vector<72x4xbf16>, vector<256x4xf32> -> vector<256x4xf32>
    %c0_30 = arith.constant 0 : index
    %c0_31 = arith.constant 0 : index
    %41 = vector.load %arg9[%c0_30, %c0_31] : memref<1x4xf32, #tpu.memory_space<vmem>>, vector<1x4xf32>
    %42 = vector.broadcast %41 : vector<1x4xf32> to vector<256x4xf32>
    %43 = arith.addf %40, %42 : vector<256x4xf32>
    %44 = vector.shape_cast %43 : vector<256x4xf32> to vector<16x16x4xf32>
    %c0_32 = arith.constant 0 : index
    %c0_33 = arith.constant 0 : index
    %c0_34 = arith.constant 0 : index
    %c0_35 = arith.constant 0 : index
    %45 = vector.load %arg10[%c0_32, %c0_33, %c0_34, %c0_35] : memref<1x16x16x4xf32, #tpu.memory_space<vmem>>, vector<1x16x16x4xf32>
    %46 = vector.shape_cast %45 : vector<1x16x16x4xf32> to vector<16x16x4xf32>
    %47 = vector.shape_cast %44 : vector<16x16x4xf32> to vector<1x16x16x4xf32>
    tpu.vector_store %arg10[%c0_32, %c0_33, %c0_34, %c0_35], %47 {strides = array<i32>} : memref<1x16x16x4xf32, #tpu.memory_space<vmem>>, vector<1x16x16x4xf32>,
    %cst_36 = arith.constant dense<0.000000e+00> : vector<4xf32>
    %48 = vector.multi_reduction <add>, %43, %cst_36 [0] : vector<256x4xf32> to vector<4xf32>
    %49 = vector.shape_cast %48 : vector<4xf32> to vector<1x4xf32>
    %cst_37 = arith.constant 2.560000e+02 : f32
    %50 = vector.broadcast %cst_37 : f32 to vector<1x4xf32>
    %51 = arith.divf %49, %50 : vector<1x4xf32>
    %52 = vector.broadcast %51 : vector<1x4xf32> to vector<256x4xf32>
    %53 = arith.subf %43, %52 : vector<256x4xf32>
    %54 = arith.mulf %53, %53 : vector<256x4xf32>
    %cst_38 = arith.constant dense<0.000000e+00> : vector<4xf32>
    %55 = vector.multi_reduction <add>, %54, %cst_38 [0] : vector<256x4xf32> to vector<4xf32>
    %56 = vector.shape_cast %55 : vector<4xf32> to vector<1x4xf32>
    %57 = tpu.concatenate %49, %56 in 0 : vector<1x4xf32>, vector<1x4xf32> -> vector<2x4xf32>
    %c0_39 = arith.constant 0 : index
    %c0_40 = arith.constant 0 : index
    %c0_41 = arith.constant 0 : index
    %c0_42 = arith.constant 0 : index
    %58 = vector.load %arg11[%c0_39, %c0_40, %c0_41, %c0_42] : memref<1x1x2x4xf32, #tpu.memory_space<vmem>>, vector<1x1x2x4xf32>
    %59 = vector.shape_cast %58 : vector<1x1x2x4xf32> to vector<2x4xf32>
    %60 = vector.shape_cast %57 : vector<2x4xf32> to vector<1x1x2x4xf32>
    tpu.vector_store %arg11[%c0_39, %c0_40, %c0_41, %c0_42], %60 {strides = array<i32>} : memref<1x1x2x4xf32, #tpu.memory_space<vmem>>, vector<1x1x2x4xf32>,
    return
  }
  func.func @transform_0(%arg0: i32, %arg1: i32) -> (i32, i32, i32, i32) {
    %c0_i32 = arith.constant 0 : i32
    %c0_i32_0 = arith.constant 0 : i32
    %c0_i32_1 = arith.constant 0 : i32
    return %arg0, %arg1, %c0_i32, %c0_i32_0 : i32, i32, i32, i32
  }
  func.func @transform_1(%arg0: i32, %arg1: i32) -> (i32, i32, i32, i32) {
    %c16_i32 = arith.constant 16 : i32
    %0 = arith.muli %arg1, %c16_i32 : i32
    %c1_i32 = arith.constant 1 : i32
    %1 = arith.subi %0, %c1_i32 : i32
    %c0_i32 = arith.constant 0 : i32
    %2 = arith.maxsi %1, %c0_i32 : i32
    %c0_i32_0 = arith.constant 0 : i32
    %c0_i32_1 = arith.constant 0 : i32
    %c0_i32_2 = arith.constant 0 : i32
    return %arg0, %2, %c0_i32_0, %c0_i32_1 : i32, i32, i32, i32
  }
  func.func @transform_2(%arg0: i32, %arg1: i32) -> (i32, i32, i32, i32) {
    %c16_i32 = arith.constant 16 : i32
    %0 = arith.muli %arg1, %c16_i32 : i32
    %c16_i32_0 = arith.constant 16 : i32
    %1 = arith.addi %0, %c16_i32_0 : i32
    %c15_i32 = arith.constant 15 : i32
    %2 = arith.minsi %1, %c15_i32 : i32
    %c0_i32 = arith.constant 0 : i32
    %c0_i32_1 = arith.constant 0 : i32
    %c0_i32_2 = arith.constant 0 : i32
    return %arg0, %2, %c0_i32, %c0_i32_1 : i32, i32, i32, i32
  }
  func.func @transform_3(%arg0: i32, %arg1: i32) -> (i32, i32, i32, i32) {
    %c0_i32 = arith.constant 0 : i32
    %c0_i32_0 = arith.constant 0 : i32
    %c0_i32_1 = arith.constant 0 : i32
    return %arg0, %arg1, %c0_i32, %c0_i32_0 : i32, i32, i32, i32
  }
  func.func @transform_4(%arg0: i32, %arg1: i32) -> (i32, i32, i32, i32) {
    %c16_i32 = arith.constant 16 : i32
    %0 = arith.muli %arg1, %c16_i32 : i32
    %c1_i32 = arith.constant 1 : i32
    %1 = arith.subi %0, %c1_i32 : i32
    %c0_i32 = arith.constant 0 : i32
    %2 = arith.maxsi %1, %c0_i32 : i32
    %c0_i32_0 = arith.constant 0 : i32
    %c0_i32_1 = arith.constant 0 : i32
    %c0_i32_2 = arith.constant 0 : i32
    return %arg0, %2, %c0_i32_0, %c0_i32_1 : i32, i32, i32, i32
  }
  func.func @transform_5(%arg0: i32, %arg1: i32) -> (i32, i32, i32, i32) {
    %c16_i32 = arith.constant 16 : i32
    %0 = arith.muli %arg1, %c16_i32 : i32
    %c16_i32_0 = arith.constant 16 : i32
    %1 = arith.addi %0, %c16_i32_0 : i32
    %c15_i32 = arith.constant 15 : i32
    %2 = arith.minsi %1, %c15_i32 : i32
    %c0_i32 = arith.constant 0 : i32
    %c0_i32_1 = arith.constant 0 : i32
    %c0_i32_2 = arith.constant 0 : i32
    return %arg0, %2, %c0_i32, %c0_i32_1 : i32, i32, i32, i32
  }
  func.func @transform_6(%arg0: i32, %arg1: i32) -> (i32, i32) {
    %c0_i32 = arith.constant 0 : i32
    %c0_i32_0 = arith.constant 0 : i32
    %c0_i32_1 = arith.constant 0 : i32
    return %c0_i32, %c0_i32_0 : i32, i32
  }
  func.func @transform_7(%arg0: i32, %arg1: i32) -> (i32, i32) {
    %c0_i32 = arith.constant 0 : i32
    %c0_i32_0 = arith.constant 0 : i32
    %c0_i32_1 = arith.constant 0 : i32
    return %c0_i32, %c0_i32_0 : i32, i32
  }
  func.func @transform_8(%arg0: i32, %arg1: i32) -> (i32, i32, i32, i32) {
    %c0_i32 = arith.constant 0 : i32
    %c0_i32_0 = arith.constant 0 : i32
    %c0_i32_1 = arith.constant 0 : i32
    return %arg0, %arg1, %c0_i32, %c0_i32_0 : i32, i32, i32, i32
  }
  func.func @transform_9(%arg0: i32, %arg1: i32) -> (i32, i32, i32, i32) {
    %c0_i32 = arith.constant 0 : i32
    %c0_i32_0 = arith.constant 0 : i32
    %c0_i32_1 = arith.constant 0 : i32
    return %arg0, %arg1, %c0_i32, %c0_i32_0 : i32, i32, i32, i32
  }
}

module attributes {stable_mosaic.version = 11 : i64} {
  func.func @_bn_relu_conv2_kernel(%arg0: i32, %arg1: i32, %arg2: memref<1x16x16x4xf32, #tpu.memory_space<vmem>>, %arg3: memref<1x1x16x4xf32, #tpu.memory_space<vmem>>, %arg4: memref<1x1x16x4xf32, #tpu.memory_space<vmem>>, %arg5: memref<1x4xf32, #tpu.memory_space<vmem>>, %arg6: memref<1x4xf32, #tpu.memory_space<vmem>>, %arg7: memref<36x8xbf16, #tpu.memory_space<vmem>>, %arg8: memref<1x8xf32, #tpu.memory_space<vmem>>, %arg9: memref<1x16x16x8xf32, #tpu.memory_space<vmem>>, %arg10: memref<1x1x2x8xf32, #tpu.memory_space<vmem>>) attributes {dimension_semantics = [#tpu.dimension_semantics<parallel>, #tpu.dimension_semantics<parallel>], iteration_bounds = array<i64: 2, 1>, scalar_prefetch = 0 : i64, scratch_operands = 0 : i64, tpu.core_type = #tpu.core_type<tc>, window_params = [{transform_indices = @transform_0, window_bounds = array<i64: 1, 16, 16, 4>}, {transform_indices = @transform_1, window_bounds = array<i64: 1, 1, 16, 4>}, {transform_indices = @transform_2, window_bounds = array<i64: 1, 1, 16, 4>}, {pipeline_mode = #tpu.pipeline_mode<synchronous>, transform_indices = @transform_3, window_bounds = array<i64: 1, 4>}, {pipeline_mode = #tpu.pipeline_mode<synchronous>, transform_indices = @transform_4, window_bounds = array<i64: 1, 4>}, {pipeline_mode = #tpu.pipeline_mode<synchronous>, transform_indices = @transform_5, window_bounds = array<i64: 36, 8>}, {pipeline_mode = #tpu.pipeline_mode<synchronous>, transform_indices = @transform_6, window_bounds = array<i64: 1, 8>}, {transform_indices = @transform_7, window_bounds = array<i64: 1, 16, 16, 8>}, {transform_indices = @transform_8, window_bounds = array<i64: 1, 1, 2, 8>}]} {
    %c0 = arith.constant 0 : index
    %c0_0 = arith.constant 0 : index
    %0 = vector.load %arg5[%c0, %c0_0] : memref<1x4xf32, #tpu.memory_space<vmem>>, vector<1x4xf32>
    %c0_1 = arith.constant 0 : index
    %c0_2 = arith.constant 0 : index
    %1 = vector.load %arg6[%c0_1, %c0_2] : memref<1x4xf32, #tpu.memory_space<vmem>>, vector<1x4xf32>
    %c0_3 = arith.constant 0 : index
    %c0_4 = arith.constant 0 : index
    %c0_5 = arith.constant 0 : index
    %c0_6 = arith.constant 0 : index
    %2 = vector.load %arg3[%c0_3, %c0_4, %c0_5, %c0_6] : memref<1x1x16x4xf32, #tpu.memory_space<vmem>>, vector<1x1x16x4xf32>
    %3 = vector.shape_cast %2 : vector<1x1x16x4xf32> to vector<1x16x4xf32>
    %4 = vector.shape_cast %0 : vector<1x4xf32> to vector<1x1x4xf32>
    %5 = vector.broadcast %4 : vector<1x1x4xf32> to vector<1x16x4xf32>
    %6 = arith.mulf %3, %5 : vector<1x16x4xf32>
    %7 = vector.shape_cast %1 : vector<1x4xf32> to vector<1x1x4xf32>
    %8 = vector.broadcast %7 : vector<1x1x4xf32> to vector<1x16x4xf32>
    %9 = arith.addf %6, %8 : vector<1x16x4xf32>
    %cst = arith.constant 0.000000e+00 : f32
    %10 = vector.broadcast %cst : f32 to vector<1x16x4xf32>
    %11 = arith.maximumf %9, %10 : vector<1x16x4xf32>
    %c0_7 = arith.constant 0 : index
    %c0_8 = arith.constant 0 : index
    %c0_9 = arith.constant 0 : index
    %c0_10 = arith.constant 0 : index
    %12 = vector.load %arg2[%c0_7, %c0_8, %c0_9, %c0_10] : memref<1x16x16x4xf32, #tpu.memory_space<vmem>>, vector<1x16x16x4xf32>
    %13 = vector.shape_cast %12 : vector<1x16x16x4xf32> to vector<16x16x4xf32>
    %14 = vector.shape_cast %0 : vector<1x4xf32> to vector<1x1x4xf32>
    %15 = vector.broadcast %14 : vector<1x1x4xf32> to vector<16x16x4xf32>
    %16 = arith.mulf %13, %15 : vector<16x16x4xf32>
    %17 = vector.shape_cast %1 : vector<1x4xf32> to vector<1x1x4xf32>
    %18 = vector.broadcast %17 : vector<1x1x4xf32> to vector<16x16x4xf32>
    %19 = arith.addf %16, %18 : vector<16x16x4xf32>
    %cst_11 = arith.constant 0.000000e+00 : f32
    %20 = vector.broadcast %cst_11 : f32 to vector<16x16x4xf32>
    %21 = arith.maximumf %19, %20 : vector<16x16x4xf32>
    %c0_12 = arith.constant 0 : index
    %c0_13 = arith.constant 0 : index
    %c0_14 = arith.constant 0 : index
    %c0_15 = arith.constant 0 : index
    %22 = vector.load %arg4[%c0_12, %c0_13, %c0_14, %c0_15] : memref<1x1x16x4xf32, #tpu.memory_space<vmem>>, vector<1x1x16x4xf32>
    %23 = vector.shape_cast %22 : vector<1x1x16x4xf32> to vector<1x16x4xf32>
    %24 = vector.shape_cast %0 : vector<1x4xf32> to vector<1x1x4xf32>
    %25 = vector.broadcast %24 : vector<1x1x4xf32> to vector<1x16x4xf32>
    %26 = arith.mulf %23, %25 : vector<1x16x4xf32>
    %27 = vector.shape_cast %1 : vector<1x4xf32> to vector<1x1x4xf32>
    %28 = vector.broadcast %27 : vector<1x1x4xf32> to vector<1x16x4xf32>
    %29 = arith.addf %26, %28 : vector<1x16x4xf32>
    %cst_16 = arith.constant 0.000000e+00 : f32
    %30 = vector.broadcast %cst_16 : f32 to vector<1x16x4xf32>
    %31 = arith.maximumf %29, %30 : vector<1x16x4xf32>
    %c0_i32 = arith.constant 0 : i32
    %32 = arith.cmpi sgt, %arg1, %c0_i32 : i32
    %c1_i32 = arith.constant 1 : i32
    %c0_i32_17 = arith.constant 0 : i32
    %33 = arith.select %32, %c1_i32, %c0_i32_17 : i32
    %34 = arith.sitofp %33 : i32 to f32
    %35 = vector.broadcast %34 : f32 to vector<1x16x4xf32>
    %36 = arith.mulf %11, %35 : vector<1x16x4xf32>
    %c0_i32_18 = arith.constant 0 : i32
    %37 = arith.cmpi slt, %arg1, %c0_i32_18 : i32
    %c1_i32_19 = arith.constant 1 : i32
    %c0_i32_20 = arith.constant 0 : i32
    %38 = arith.select %37, %c1_i32_19, %c0_i32_20 : i32
    %39 = arith.sitofp %38 : i32 to f32
    %40 = vector.broadcast %39 : f32 to vector<1x16x4xf32>
    %41 = arith.mulf %31, %40 : vector<1x16x4xf32>
    %42 = tpu.concatenate %36, %21, %41 in 0 : vector<1x16x4xf32>, vector<16x16x4xf32>, vector<1x16x4xf32> -> vector<18x16x4xf32>
    %cst_21 = arith.constant 0.000000e+00 : f32
    %43 = vector.broadcast %cst_21 : f32 to vector<18x1x4xf32>
    %44 = tpu.concatenate %43, %42, %43 in 1 : vector<18x1x4xf32>, vector<18x16x4xf32>, vector<18x1x4xf32> -> vector<18x18x4xf32>
    %c0_22 = arith.constant 0 : index
    %c0_23 = arith.constant 0 : index
    %45 = vector.load %arg7[%c0_22, %c0_23] : memref<36x8xbf16, #tpu.memory_space<vmem>>, vector<36x8xbf16>
    %46 = vector.extract_strided_slice %44 {offsets = [0, 0, 0], sizes = [16, 16, 4], strides = [1, 1, 1]} : vector<18x18x4xf32> to vector<16x16x4xf32>
    %47 = vector.extract_strided_slice %44 {offsets = [0, 1, 0], sizes = [16, 16, 4], strides = [1, 1, 1]} : vector<18x18x4xf32> to vector<16x16x4xf32>
    %48 = vector.extract_strided_slice %44 {offsets = [0, 2, 0], sizes = [16, 16, 4], strides = [1, 1, 1]} : vector<18x18x4xf32> to vector<16x16x4xf32>
    %49 = vector.extract_strided_slice %44 {offsets = [1, 0, 0], sizes = [16, 16, 4], strides = [1, 1, 1]} : vector<18x18x4xf32> to vector<16x16x4xf32>
    %50 = vector.extract_strided_slice %44 {offsets = [1, 1, 0], sizes = [16, 16, 4], strides = [1, 1, 1]} : vector<18x18x4xf32> to vector<16x16x4xf32>
    %51 = vector.extract_strided_slice %44 {offsets = [1, 2, 0], sizes = [16, 16, 4], strides = [1, 1, 1]} : vector<18x18x4xf32> to vector<16x16x4xf32>
    %52 = vector.extract_strided_slice %44 {offsets = [2, 0, 0], sizes = [16, 16, 4], strides = [1, 1, 1]} : vector<18x18x4xf32> to vector<16x16x4xf32>
    %53 = vector.extract_strided_slice %44 {offsets = [2, 1, 0], sizes = [16, 16, 4], strides = [1, 1, 1]} : vector<18x18x4xf32> to vector<16x16x4xf32>
    %54 = vector.extract_strided_slice %44 {offsets = [2, 2, 0], sizes = [16, 16, 4], strides = [1, 1, 1]} : vector<18x18x4xf32> to vector<16x16x4xf32>
    %55 = tpu.concatenate %46, %47, %48, %49, %50, %51, %52, %53, %54 in 2 : vector<16x16x4xf32>, vector<16x16x4xf32>, vector<16x16x4xf32>, vector<16x16x4xf32>, vector<16x16x4xf32>, vector<16x16x4xf32>, vector<16x16x4xf32>, vector<16x16x4xf32>, vector<16x16x4xf32> -> vector<16x16x36xf32>
    %56 = vector.shape_cast %55 : vector<16x16x36xf32> to vector<256x36xf32>
    %57 = arith.truncf %56 : vector<256x36xf32> to vector<256x36xbf16>
    %cst_24 = arith.constant dense<0.000000e+00> : vector<256x8xf32>
    %58 = tpu.matmul %57, %45, %cst_24 {dimension_numbers = #tpu.dot_dimension_numbers<[1], [0], [0], [1], [0, 0, 1, 1], [], []>} : vector<256x36xbf16>, vector<36x8xbf16>, vector<256x8xf32> -> vector<256x8xf32>
    %c0_25 = arith.constant 0 : index
    %c0_26 = arith.constant 0 : index
    %59 = vector.load %arg8[%c0_25, %c0_26] : memref<1x8xf32, #tpu.memory_space<vmem>>, vector<1x8xf32>
    %60 = vector.broadcast %59 : vector<1x8xf32> to vector<256x8xf32>
    %61 = arith.addf %58, %60 : vector<256x8xf32>
    %62 = vector.shape_cast %61 : vector<256x8xf32> to vector<16x16x8xf32>
    %c0_27 = arith.constant 0 : index
    %c0_28 = arith.constant 0 : index
    %c0_29 = arith.constant 0 : index
    %c0_30 = arith.constant 0 : index
    %63 = vector.load %arg9[%c0_27, %c0_28, %c0_29, %c0_30] : memref<1x16x16x8xf32, #tpu.memory_space<vmem>>, vector<1x16x16x8xf32>
    %64 = vector.shape_cast %63 : vector<1x16x16x8xf32> to vector<16x16x8xf32>
    %65 = vector.shape_cast %62 : vector<16x16x8xf32> to vector<1x16x16x8xf32>
    tpu.vector_store %arg9[%c0_27, %c0_28, %c0_29, %c0_30], %65 {strides = array<i32>} : memref<1x16x16x8xf32, #tpu.memory_space<vmem>>, vector<1x16x16x8xf32>,
    %cst_31 = arith.constant dense<0.000000e+00> : vector<8xf32>
    %66 = vector.multi_reduction <add>, %61, %cst_31 [0] : vector<256x8xf32> to vector<8xf32>
    %67 = vector.shape_cast %66 : vector<8xf32> to vector<1x8xf32>
    %cst_32 = arith.constant 2.560000e+02 : f32
    %68 = vector.broadcast %cst_32 : f32 to vector<1x8xf32>
    %69 = arith.divf %67, %68 : vector<1x8xf32>
    %70 = vector.broadcast %69 : vector<1x8xf32> to vector<256x8xf32>
    %71 = arith.subf %61, %70 : vector<256x8xf32>
    %72 = arith.mulf %71, %71 : vector<256x8xf32>
    %cst_33 = arith.constant dense<0.000000e+00> : vector<8xf32>
    %73 = vector.multi_reduction <add>, %72, %cst_33 [0] : vector<256x8xf32> to vector<8xf32>
    %74 = vector.shape_cast %73 : vector<8xf32> to vector<1x8xf32>
    %75 = tpu.concatenate %67, %74 in 0 : vector<1x8xf32>, vector<1x8xf32> -> vector<2x8xf32>
    %c0_34 = arith.constant 0 : index
    %c0_35 = arith.constant 0 : index
    %c0_36 = arith.constant 0 : index
    %c0_37 = arith.constant 0 : index
    %76 = vector.load %arg10[%c0_34, %c0_35, %c0_36, %c0_37] : memref<1x1x2x8xf32, #tpu.memory_space<vmem>>, vector<1x1x2x8xf32>
    %77 = vector.shape_cast %76 : vector<1x1x2x8xf32> to vector<2x8xf32>
    %78 = vector.shape_cast %75 : vector<2x8xf32> to vector<1x1x2x8xf32>
    tpu.vector_store %arg10[%c0_34, %c0_35, %c0_36, %c0_37], %78 {strides = array<i32>} : memref<1x1x2x8xf32, #tpu.memory_space<vmem>>, vector<1x1x2x8xf32>,
    return
  }
  func.func @transform_0(%arg0: i32, %arg1: i32) -> (i32, i32, i32, i32) {
    %c0_i32 = arith.constant 0 : i32
    %c0_i32_0 = arith.constant 0 : i32
    %c0_i32_1 = arith.constant 0 : i32
    return %arg0, %arg1, %c0_i32, %c0_i32_0 : i32, i32, i32, i32
  }
  func.func @transform_1(%arg0: i32, %arg1: i32) -> (i32, i32, i32, i32) {
    %c16_i32 = arith.constant 16 : i32
    %0 = arith.muli %arg1, %c16_i32 : i32
    %c1_i32 = arith.constant 1 : i32
    %1 = arith.subi %0, %c1_i32 : i32
    %c0_i32 = arith.constant 0 : i32
    %2 = arith.maxsi %1, %c0_i32 : i32
    %c0_i32_0 = arith.constant 0 : i32
    %c0_i32_1 = arith.constant 0 : i32
    %c0_i32_2 = arith.constant 0 : i32
    return %arg0, %2, %c0_i32_0, %c0_i32_1 : i32, i32, i32, i32
  }
  func.func @transform_2(%arg0: i32, %arg1: i32) -> (i32, i32, i32, i32) {
    %c16_i32 = arith.constant 16 : i32
    %0 = arith.muli %arg1, %c16_i32 : i32
    %c16_i32_0 = arith.constant 16 : i32
    %1 = arith.addi %0, %c16_i32_0 : i32
    %c15_i32 = arith.constant 15 : i32
    %2 = arith.minsi %1, %c15_i32 : i32
    %c0_i32 = arith.constant 0 : i32
    %c0_i32_1 = arith.constant 0 : i32
    %c0_i32_2 = arith.constant 0 : i32
    return %arg0, %2, %c0_i32, %c0_i32_1 : i32, i32, i32, i32
  }
  func.func @transform_3(%arg0: i32, %arg1: i32) -> (i32, i32) {
    %c0_i32 = arith.constant 0 : i32
    %c0_i32_0 = arith.constant 0 : i32
    %c0_i32_1 = arith.constant 0 : i32
    return %c0_i32, %c0_i32_0 : i32, i32
  }
  func.func @transform_4(%arg0: i32, %arg1: i32) -> (i32, i32) {
    %c0_i32 = arith.constant 0 : i32
    %c0_i32_0 = arith.constant 0 : i32
    %c0_i32_1 = arith.constant 0 : i32
    return %c0_i32, %c0_i32_0 : i32, i32
  }
  func.func @transform_5(%arg0: i32, %arg1: i32) -> (i32, i32) {
    %c0_i32 = arith.constant 0 : i32
    %c0_i32_0 = arith.constant 0 : i32
    %c0_i32_1 = arith.constant 0 : i32
    return %c0_i32, %c0_i32_0 : i32, i32
  }
  func.func @transform_6(%arg0: i32, %arg1: i32) -> (i32, i32) {
    %c0_i32 = arith.constant 0 : i32
    %c0_i32_0 = arith.constant 0 : i32
    %c0_i32_1 = arith.constant 0 : i32
    return %c0_i32, %c0_i32_0 : i32, i32
  }
  func.func @transform_7(%arg0: i32, %arg1: i32) -> (i32, i32, i32, i32) {
    %c0_i32 = arith.constant 0 : i32
    %c0_i32_0 = arith.constant 0 : i32
    %c0_i32_1 = arith.constant 0 : i32
    return %arg0, %arg1, %c0_i32, %c0_i32_0 : i32, i32, i32, i32
  }
  func.func @transform_8(%arg0: i32, %arg1: i32) -> (i32, i32, i32, i32) {
    %c0_i32 = arith.constant 0 : i32
    %c0_i32_0 = arith.constant 0 : i32
    %c0_i32_1 = arith.constant 0 : i32
    return %arg0, %arg1, %c0_i32, %c0_i32_0 : i32, i32, i32, i32
  }
}

module attributes {stable_mosaic.version = 11 : i64} {
  func.func @_bn_relu_kernel(%arg0: i32, %arg1: memref<16x128xf32, #tpu.memory_space<vmem>>, %arg2: memref<1x128xf32, #tpu.memory_space<vmem>>, %arg3: memref<1x128xf32, #tpu.memory_space<vmem>>, %arg4: memref<16x128xf32, #tpu.memory_space<vmem>>) attributes {dimension_semantics = [#tpu.dimension_semantics<parallel>], iteration_bounds = array<i64: 2>, scalar_prefetch = 0 : i64, scratch_operands = 0 : i64, tpu.core_type = #tpu.core_type<tc>, window_params = [{transform_indices = @transform_0, window_bounds = array<i64: 16, 128>}, {pipeline_mode = #tpu.pipeline_mode<synchronous>, transform_indices = @transform_1, window_bounds = array<i64: 1, 128>}, {pipeline_mode = #tpu.pipeline_mode<synchronous>, transform_indices = @transform_2, window_bounds = array<i64: 1, 128>}, {transform_indices = @transform_3, window_bounds = array<i64: 16, 128>}]} {
    %c0 = arith.constant 0 : index
    %c0_0 = arith.constant 0 : index
    %0 = vector.load %arg1[%c0, %c0_0] : memref<16x128xf32, #tpu.memory_space<vmem>>, vector<16x128xf32>
    %c0_1 = arith.constant 0 : index
    %c0_2 = arith.constant 0 : index
    %1 = vector.load %arg2[%c0_1, %c0_2] : memref<1x128xf32, #tpu.memory_space<vmem>>, vector<1x128xf32>
    %2 = vector.broadcast %1 : vector<1x128xf32> to vector<16x128xf32>
    %3 = arith.mulf %0, %2 : vector<16x128xf32>
    %c0_3 = arith.constant 0 : index
    %c0_4 = arith.constant 0 : index
    %4 = vector.load %arg3[%c0_3, %c0_4] : memref<1x128xf32, #tpu.memory_space<vmem>>, vector<1x128xf32>
    %5 = vector.broadcast %4 : vector<1x128xf32> to vector<16x128xf32>
    %6 = arith.addf %3, %5 : vector<16x128xf32>
    %cst = arith.constant 0.000000e+00 : f32
    %7 = vector.broadcast %cst : f32 to vector<16x128xf32>
    %8 = arith.maximumf %6, %7 : vector<16x128xf32>
    %c0_5 = arith.constant 0 : index
    %c0_6 = arith.constant 0 : index
    %9 = vector.load %arg4[%c0_5, %c0_6] : memref<16x128xf32, #tpu.memory_space<vmem>>, vector<16x128xf32>
    tpu.vector_store %arg4[%c0_5, %c0_6], %8 {strides = array<i32>} : memref<16x128xf32, #tpu.memory_space<vmem>>, vector<16x128xf32>,
    return
  }
  func.func @transform_0(%arg0: i32) -> (i32, i32) {
    %c0_i32 = arith.constant 0 : i32
    %c0_i32_0 = arith.constant 0 : i32
    return %arg0, %c0_i32 : i32, i32
  }
  func.func @transform_1(%arg0: i32) -> (i32, i32) {
    %c0_i32 = arith.constant 0 : i32
    %c0_i32_0 = arith.constant 0 : i32
    %c0_i32_1 = arith.constant 0 : i32
    return %c0_i32, %c0_i32_0 : i32, i32
  }
  func.func @transform_2(%arg0: i32) -> (i32, i32) {
    %c0_i32 = arith.constant 0 : i32
    %c0_i32_0 = arith.constant 0 : i32
    %c0_i32_1 = arith.constant 0 : i32
    return %c0_i32, %c0_i32_0 : i32, i32
  }
  func.func @transform_3(%arg0: i32) -> (i32, i32) {
    %c0_i32 = arith.constant 0 : i32
    %c0_i32_0 = arith.constant 0 : i32
    return %arg0, %c0_i32 : i32, i32
  }
}

</mosaic_0001>

<bundles_post_ra>
// kernel: up_forward.5
= control target key start
LH: loop header
LB: loop body
LE: loop exit
PB: predicated region body
PF: predicated region fallthrough
CT: control target
= control target key end

     0   :  { %s297_s12 = smov 0   ;;  %s314_s0 = inlined_call_operand.vmem [shape: f32[32,128], index: 0, kind: input, shape index: {}]   ;;  %s315_s1 = inlined_call_operand.vmem [shape: f32[1,128], index: 1, kind: input, shape index: {}]   ;;  %s316_s2 = inlined_call_operand.vmem [shape: f32[1,128], index: 2, kind: input, shape index: {}]   ;;  %s317_s3 = inlined_call_operand.vmem [shape: f32[32,128], index: 3, kind: output, shape index: {}]  }
   0x1 LB: > { %s248_s13 = sadd.s32 4294967295, %s275_s12   ;;  %p252_p0 = scmp.ge.s32.totalorder %s275_s12, 1  ;;  %s275_s12 = sphi %s297_s12, %s13_s12  }
   0x2   : > { %p138_p1 = scmp.lt.s32.totalorder %s275_s12, 3 }
   0x4   : > { %p139_p2 = pnand %p252_p0, %p138_p1 }
   0x5   : > { %s253_s14 = sshll.u32 (!%p139_p2), %s248_s13, 1 }
   0x6   : > { %142 = sbr.rel (%p139_p2) target bundleno = 23 (0x17), region = 32  ;;  %p163_p3 = scmp.lt.s32.totalorder (!%p139_p2), %s253_s14, 3 }
   0xb   : > { %s319_s14 = smov (!%p163_p3, %s253_s14), 3  ;;  %v267_v0 = vld [vmem:[%s315_s1] ss:$0 sm:$0xff] }
   0xc   : > { %s254_s17 = sshll.u32 %s319_s14, 3  ;;  %v268_v1 = vld [vmem:[%s316_s2] ss:$0 sm:$0xff] }
   0xd   : > { %s166_s20 = scalar_lea.vmem %s314_s0, %s254_s17  ;;  %s172_s25 = scalar_lea.vmem %s317_s3, %s254_s17 }
   0xe   : > { %v174_v2 = vld [vmem:[%s166_s20] sm:$0xff]  ;;  %v175_v3 = vld [vmem:[%s166_s20 + $0x8] sm:$0xff] }
   0xf   : > { %v180_v4 = vmul.f32 %v267_v0, %v174_v2  ;;  %v181_v5 = vmul.f32 %v267_v0, %v175_v3 }
  0x11   : > { %v186_v6 = vadd.f32 %v268_v1, %v180_v4  ;;  %v187_v7 = vadd.f32 %v268_v1, %v181_v5 }
  0x13   : > { %v188_v8 = vmax.f32 %v186_v6, 0.0  ;;  %v189_v9 = vmax.f32 %v187_v7, 0.0 }
  0x15   : > { %190 = vst [vmem:[%s172_s25] sm:$0xff] %v188_v8 }
  0x16   : > { %191 = vst [vmem:[%s172_s25 + $0x8] sm:$0xff] %v189_v9 }
  0x17 PF: > { %s13_s12 = sadd.s32 1, %s275_s12  }
  0x18   : > { %p10_p4 = scmp.ge.s32.totalorder %s13_s12, 4  }
  0x1a   :  { %12 = sbr.rel (!%p10_p4) target bundleno = 1 (0x1), region = 62 }

// kernel: up_forward.3
= control target key start
LH: loop header
LB: loop body
LE: loop exit
PB: predicated region body
PF: predicated region fallthrough
CT: control target
= control target key end

     0   :  { %s3221_s30 = smov 0   ;;  %s3223_s10 = smov 0   ;;  %s4617_s0 = inlined_call_operand.vmem [shape: bf16[2,16,16,4], index: 0, kind: input, shape index: {}, may-alias: {0,1,2}]   ;;  %s4618_s1 = inlined_call_operand.vmem [shape: bf16[2,16,16,4], index: 1, kind: input, shape index: {}, may-alias: {0,1,2}]   ;;  %s4619_s2 = inlined_call_operand.vmem [shape: bf16[2,16,16,4], index: 2, kind: input, shape index: {}, may-alias: {0,1,2}]   ;;  %s4620_s3 = inlined_call_operand.vmem [shape: bf16[2,16,16,4], index: 3, kind: input, shape index: {}, may-alias: {3,4,5}]   ;;  %s4621_s4 = inlined_call_operand.vmem [shape: bf16[2,16,16,4], index: 4, kind: input, shape index: {}, may-alias: {3,4,5}]   ;;  %s4622_s5 = inlined_call_operand.vmem [shape: bf16[2,16,16,4], index: 5, kind: input, shape index: {}, may-alias: {3,4,5}]   ;;  %s4623_s6 = inlined_call_operand.vmem [shape: bf16[72,4], index: 6, kind: input, shape index: {}]   ;;  %s4624_s7 = inlined_call_operand.vmem [shape: f32[1,4], index: 7, kind: input, shape index: {}]   ;;  %s4625_s8 = inlined_call_operand.vmem [shape: f32[2,16,16,4], index: 8, kind: output, shape index: {0}]   ;;  %s4626_s9 = inlined_call_operand.vmem [shape: f32[2,1,2,4], index: 9, kind: output, shape index: {1}]  }
   0x1   :  { %s3225_s11 = smov 0  }
   0x2 LB: > { %s32_s12 = sadd.s32 1, %s3154_s10  ;;  %p2838_p0 = scmp.ge.s32.totalorder %s3158_s11, 1  ;;  %s3158_s11 = sphi %s3225_s11, %s20_s11   ;;  %s3154_s10 = sphi %s3223_s10, %s4654_s10   ;;  %s3150_s30 = sphi %s3221_s30, %s4653_s30  }
   0x3   : > { %p34_p1 = scmp.ge.s32.totalorder %s32_s12, 2  ;;  %p460_p2 = scmp.lt.s32.totalorder %s3158_s11, 3 }
   0x5   : > { %s4656_s12 = smov (%p34_p1, %s32_s12), 0  ;;  %p461_p3 = pnand %p2838_p0, %p460_p2 }
   0x7   : > { %464 = sbr.rel (%p461_p3) target bundleno = 858 (0x35a), region = 52 }
   0xc   : > { %p576_p4 = scmp.lt.s32.totalorder %s3150_s30, 1  ;;  %s3160_s20 = smov 4   ;;  %vm700_vm0 = vcmask 31744   ;;  %vm1313_vm1 = vcmask 1040384   ;;  %vm1314_vm2 = vsmask.f32 256 }
   0xd   : > { %vm3312_vm3 = vmand %vm1313_vm1, %vm1314_vm2  ;;  %s3161_s15 = smov 24   ;;  %vm1618_vm4 = vcmask 1046528   ;;  %s3163_s17 = smov 16   ;;  %vm1361_vm5 = vsmask.f32 7424  ;;  %vm2253_vm6 = vcmask 1043456  }
   0xe   : > { %s4658_s30 = smov (!%p576_p4, %s3150_s30), 1  ;;  %s3164_s18 = smov 40   ;;  %vm1925_vm7 = vcmask 64512   ;;  %vm1958_vm8 = vcmask 130048   ;;  %vm1991_vm9 = vcmask 195584   ;;  %vm2024_vm10 = vcmask 261120  }
   0xf   : > { %s3242_s13 = sshll.u32 %s4658_s30, 7  ;;  %vm2057_vm11 = vcmask 326656   ;;  %vm2090_vm12 = vcmask 392192   ;;  %vm2123_vm13 = vcmask 457728   ;;  %vm2156_vm14 = vcmask 523264  }
  0x10   : > { %s643_s16 = scalar_lea.vmem %s4621_s4, %s3242_s13  ;;  %s3252_s19 = scalar_lea.vmem %s4620_s3, %s3242_s13  ;;  %vm2220_vm15 = vcmask 588800  }
  0x11   : > { %v3042_v0 = vld [vmem:[%s643_s16] sm:$0xff]  ;;  %v3060_v1 = vld [vmem:[%s3252_s19 + $0x8] sm:$0xff]  ;;  %v3062_v2 = vld [vmem:[%s3252_s19 + $0x18] sm:$0xff]  ;;  %s3035_s21 = sadd.s32 120, %s3242_s13  ;;  %s3298_s27 = scalar_lea.vmem %s4617_s0, %s3242_s13 }
  0x12   : > { %698 = vrot.lane.b32.xlu0 %v3042_v0, %s3160_s20  ;;  %931 = vrot.lane.b32.xlu1 %v3060_v1, %s3160_s20  ;;  %v3059_v3 = vld [vmem:[%s3252_s19] sm:$0xff]  ;;  %v3061_v4 = vld [vmem:[%s3252_s19 + $0x10] sm:$0xff]  ;;  %s660_s24 = scalar_lea.vmem %s4622_s5, %s3035_s21  ;;  %s598_s14 = scalar_lea.vmem %s4618_s1, %s3242_s13 }
  0x13   : > { %935 = vrot.lane.b32.xlu2 %v3062_v2, %s3160_s20  ;;  %v3063_v5 = vld [vmem:[%s3252_s19 + $0x20] sm:$0xff]  ;;  %v3064_v6 = vld [vmem:[%s3252_s19 + $0x28] sm:$0xff]  ;;  %v3065_v7 = vld [vmem:[%s3252_s19 + $0x30] sm:$0xff]  ;;  %s3162_s16 = smov 48   ;;  %s3167_s13 = smov 32  }
  0x14   : > { %v3066_v8 = vld [vmem:[%s3252_s19 + $0x38] sm:$0xff]  ;;  %v3067_v9 = vld [vmem:[%s3252_s19 + $0x40] sm:$0xff]  ;;  %v3068_v10 = vld [vmem:[%s3252_s19 + $0x48] sm:$0xff] }
  0x15   : > { %v3069_v11 = vld [vmem:[%s3252_s19 + $0x50] sm:$0xff]  ;;  %v3072_v12 = vld [vmem:[%s3252_s19 + $0x68] sm:$0xff]  ;;  %v3071_v13 = vld [vmem:[%s3252_s19 + $0x60] sm:$0xff] }
  0x16   : > { %v3074_v14 = vld [vmem:[%s3252_s19 + $0x78] sm:$0xff]  ;;  %v3076_v15 = vld [vmem:[%s660_s24] sm:$0xff]  ;;  %v3073_v20 = vld [vmem:[%s3252_s19 + $0x70] sm:$0xff]  ;;  %s615_s24 = scalar_lea.vmem %s4619_s2, %s3035_s21  ;;  %s3169_s21 = smov 56  }
  0x17   : > { %v3070_v17 = vld [vmem:[%s3252_s19 + $0x58] sm:$0xff]  ;;  %v3047_v18 = vld [vmem:[%s3298_s27 + $0x20] sm:$0xff]  ;;  %v3044_v32 = vld [vmem:[%s3298_s27 + $0x8] sm:$0xff]  ;;  %s3165_s19 = smov 64  }
  0x18   : > { %v3041_v28 = vld [vmem:[%s598_s14] sm:$0xff]  ;;  %v3048_v42 = vld [vmem:[%s3298_s27 + $0x28] sm:$0xff]  ;;  %v3045_v52 = vld [vmem:[%s3298_s27 + $0x10] sm:$0xff] }
  0x19   : > { %v3043_v33 = vld [vmem:[%s3298_s27] sm:$0xff]  ;;  %v3052_v57 = vld [vmem:[%s3298_s27 + $0x48] sm:$0xff] }
  0x1a   : > { %929 = vrot.lane.b32.xlu0 %v3059_v3, %s3160_s20  ;;  %933 = vrot.lane.b32.xlu1 %v3061_v4, %s3160_s20  ;;  %v3051_v55 = vld [vmem:[%s3298_s27 + $0x40] sm:$0xff] }
  0x1b   : > { %937 = vrot.lane.b32.xlu2 %v3063_v5, %s3160_s20 }
  0x22   : > { %939 = vrot.lane.b32.xlu0 %v3064_v6, %s3160_s20  ;;  %941 = vrot.lane.b32.xlu1 %v3065_v7, %s3160_s20 }
  0x23   : > { %943 = vrot.lane.b32.xlu2 %v3066_v8, %s3160_s20  ;;  %v3050_v8 = vld [vmem:[%s3298_s27 + $0x38] sm:$0xff] }
  0x2a   : > { %945 = vrot.lane.b32.xlu0 %v3067_v9, %s3160_s20  ;;  %947 = vrot.lane.b32.xlu1 %v3068_v10, %s3160_s20  ;;  %v3046_v9 = vld [vmem:[%s3298_s27 + $0x18] sm:$0xff] }
  0x2b   : > { %949 = vrot.lane.b32.xlu2 %v3069_v11, %s3160_s20 }
  0x32   : > { %953 = vrot.lane.b32.xlu1 %v3071_v13, %s3160_s20  ;;  %951 = vrot.lane.b32.xlu0 %v3070_v17, %s3160_s20 }
  0x33   : > { %955 = vrot.lane.b32.xlu2 %v3072_v12, %s3160_s20 }
  0x3a   : > { %959 = vrot.lane.b32.xlu1 %v3074_v14, %s3160_s20  ;;  %957 = vrot.lane.b32.xlu0 %v3073_v20, %s3160_s20 }
  0x3b   : > { %1023 = vrot.lane.b32.xlu2 %v3076_v15, %s3160_s20  ;;  %s3166_s20 = smov 8  }
  0x6d   : > { %v3290_v16 = vpop.permute.xlu2 %935 }
  0x75   : > { %v938_v19 = vpop.permute.xlu2 %937 }
  0x76   : > { %v975_v21 = vsel %vm700_vm0, %v3047_v18, %v938_v19 }
  0x77   : > { %v1187_v22 = vshrl.u32 %v975_v21, 16  ;;  %v1190_v23 = vshll.u32 %v975_v21, 16  ;;  %v972_v21 = vsel %vm700_vm0, %v3046_v9, %v3290_v16 }
  0x79   : > { %v3304_v24 = vrot.slane %v1187_v22, 7 }
  0x7b   : > { %v1192_v25 = vor.u32 %v1190_v23, %v3304_v24  ;;  %v3396_v16 = vsel %vm3312_vm3, %v3304_v24, 0 }
  0x7d   : > { %v3318_v27 = vsel %vm3312_vm3, 0, %v1192_v25  ;;  %v944_v11 = vpop.permute.xlu2 %943 }
  0x7e   : > { %1708 = vrot.lane.b32.xlu2 %v3318_v27, %s3161_s15  ;;  %v984_v20 = vsel %vm700_vm0, %v3050_v8, %v944_v11 }
  0x84   : > { %v699_v29 = vpop.permute.xlu0 %698  ;;  %v932_v31 = vpop.permute.xlu1 %931 }
  0x85   : > { %v3323_v30 = vsel %vm700_vm0, %v3041_v28, %v699_v29  ;;  %v966_v35 = vsel %vm700_vm0, %v3044_v32, %v932_v31  ;;  %v1208_v28 = vshrl.u32 %v984_v20, 16  ;;  %v1180_v29 = vshrl.u32 %v972_v21, 16 }
  0x86   : > { %v1166_v39 = vshrl.u32 %v966_v35, 16  ;;  %v1169_v45 = vshll.u32 %v966_v35, 16 }
  0x87   : > { %v1210_v35 = vrot.slane %v1208_v28, 7  ;;  %v3075_v28 = vld [vmem:[%s615_s24] sm:$0xff] }
  0x88   : > { %v1168_v44 = vrot.slane %v1166_v39, 7 }
  0x8a   : > { %v1171_v51 = vor.u32 %v1169_v45, %v1168_v44  ;;  %v3387_v22 = vsel %vm3312_vm3, %v1168_v44, 0 }
  0x8b   : > { %v1626_v32 = vrot.slane %v3387_v22, 1 }
  0x8c   : > { %v930_v34 = vpop.permute.xlu0 %929  ;;  %v934_v38 = vpop.permute.xlu1 %933  ;;  %v3347_v58 = vsel %vm3312_vm3, 0, %v1171_v51  ;;  %v3433_v51 = vsel %vm3312_vm3, %v1210_v35, 0 }
  0x8d   : > { %v963_v36 = vsel %vm700_vm0, %v3043_v33, %v930_v34  ;;  %v969_v59 = vsel %vm700_vm0, %v3045_v52, %v934_v38  ;;  %v1625_v31 = vrot.slane %v3347_v58, 1  ;;  %v1183_v38 = vshll.u32 %v972_v21, 16 }
  0x8e   : > { %v1159_v37 = vshrl.u32 %v963_v36, 16  ;;  %v1162_v41 = vshll.u32 %v963_v36, 16  ;;  %v1173_v1 = vshrl.u32 %v969_v59, 16  ;;  %v1176_v12 = vshll.u32 %v969_v59, 16  ;;  %v3450_v59 = vpop.permute.xlu2 %949 }
  0x8f   : > { %v1211_v36 = vshll.u32 %v984_v20, 16  ;;  %v3411_v24 = vsel %vm1618_vm4, %v1625_v31, %v1626_v32 }
  0x90   : > { %v1161_v40 = vrot.slane %v1159_v37, 7  ;;  %v1175_v14 = vrot.slane %v1173_v1, 7  ;;  %v1182_v37 = vrot.slane %v1180_v29, 7 }
  0x92   : > { %v1164_v43 = vor.u32 %v1162_v41, %v1161_v40  ;;  %v3362_v3 = vsel %vm3312_vm3, %v1161_v40, 0  ;;  %v1178_v23 = vor.u32 %v1176_v12, %v1175_v14  ;;  %v3415_v39 = vsel %vm3312_vm3, %v1175_v14, 0 }
  0x93   : > { %v1623_v13 = vrot.slane %v3362_v3, 1  ;;  %v1634_v40 = vrot.slane %v3318_v27, 1  ;;  %v1635_v41 = vrot.slane %v3396_v16, 1  ;;  %v1185_v44 = vor.u32 %v1183_v38, %v1182_v37 }
  0x94   : > { %v940_v46 = vpop.permute.xlu0 %939  ;;  %v3332_v47 = vsel %vm3312_vm3, 0, %v1164_v43  ;;  %v3337_v50 = vpop.permute.xlu1 %941  ;;  %v3400_v33 = vsel %vm3312_vm3, 0, %v1178_v23  ;;  %v1338_v1 = vsel %vm3312_vm3, %v1182_v37, 0 }
  0x95   : > { %v978_v48 = vsel %vm700_vm0, %v3048_v42, %v940_v46  ;;  %1700 = vrot.lane.b32.xlu1 %v3332_v47, %s3161_s15  ;;  %v1622_v7 = vrot.slane %v3332_v47, 1  ;;  %4638 = vst [vmem:[#allocation3_spill] sm:$0xff] %v3400_v33  ;;  %v1213_v42 = vor.u32 %v1211_v36, %v1210_v35  ;;  %v1377_v43 = vshll.u32 %v3332_v47, 16 }
  0x96   : > { %v1194_v49 = vshrl.u32 %v978_v48, 16  ;;  %v1197_v54 = vshll.u32 %v978_v48, 16  ;;  %v1628_v45 = vrot.slane %v3400_v33, 1  ;;  %v1629_v46 = vrot.slane %v3415_v39, 1  ;;  %v3469_v9 = vpop.permute.xlu2 %955 }
  0x97   : > { %v1624_v19 = vsel %vm1618_vm4, %v1622_v7, %v1623_v13  ;;  %v3425_v48 = vsel %vm1618_vm4, %v1634_v40, %v1635_v41  ;;  %v1379_v52 = vrot.slane %v1377_v43, 1  ;;  %v1425_v13 = vshll.u32 %v3318_v27, 16 }
  0x98   : > { %v3340_v53 = vrot.slane %v1194_v49, 7  ;;  %v3429_v49 = vsel %vm3312_vm3, 0, %v1213_v42  ;;  %v1632_v31 = vrot.slane %v1338_v1, 1  ;;  %v1389_v40 = vshll.u32 %v3347_v58, 16 }
  0x99   : > { %v1427_v21 = vrot.slane %v1425_v13, 1  ;;  %v1047_v13 = vunpack.c.h.bf16 %v3323_v30 }
  0x9a   : > { %v1199_v56 = vor.u32 %v1197_v54, %v3340_v53  ;;  %v3437_v54 = vsel %vm3312_vm3, 0, %v1185_v44  ;;  %v1340_v41 = vsel %vm3312_vm3, %v3340_v53, 0  ;;  %v1387_v53 = vshrl.u32 %v3347_v58, 16 }
  0x9b   : > { %v1411_v7 = vshrl.u32 %v3437_v54, 16  ;;  %v1631_v29 = vrot.slane %v3437_v54, 1 }
  0x9c   : > { %v3352_v60 = vsel %vm3312_vm3, 0, %v1199_v56  ;;  %v946_v61 = vpop.permute.xlu0 %945  ;;  %v948_v0 = vpop.permute.xlu1 %947  ;;  %v1382_v56 = vshll.u32 %v3362_v3, 16 }
  0x9d   : > { %4637 = vst [vmem:[#allocation2_spill] sm:$0xff] %v3352_v60  ;;  %v987_v62 = vsel %vm700_vm0, %v3051_v55, %v946_v61  ;;  %1821 = vrot.lane.b32.xlu2 %v3352_v60, %s3162_s16  ;;  %1813 = vrot.lane.b32.xlu1 %v3347_v58, %s3162_s16  ;;  %v990_v2 = vsel %vm700_vm0, %v3052_v57, %v948_v0  ;;  %v1375_v57 = vshrl.u32 %v3332_v47, 16  ;;  %v1643_v61 = vrot.slane %v3429_v49, 1 }
  0x9e   : > { %v1215_v63 = vshrl.u32 %v987_v62, 16  ;;  %v1218_v5 = vshll.u32 %v987_v62, 16  ;;  %v1222_v6 = vshrl.u32 %v990_v2, 16  ;;  %v1225_v18 = vshll.u32 %v990_v2, 16  ;;  %v1024_v36 = vpop.permute.xlu2 %1023 }
  0x9f   : > { %v3444_v55 = vsel %vm1618_vm4, %v1628_v45, %v1629_v46  ;;  %v1644_v62 = vrot.slane %v3433_v51, 1  ;;  %v1413_v0 = vshll.u32 %v3437_v54, 16  ;;  %v1384_v2 = vrot.slane %v1382_v56, 1 }
  0xa0   : > { %v3364_v4 = vrot.slane %v1215_v63, 7  ;;  %v3375_v17 = vrot.slane %v1222_v6, 7  ;;  %v1380_v63 = vor.u32 %v1379_v52, %v1375_v57  ;;  %v1437_v35 = vshll.u32 %v3352_v60, 16 }
  0xa1   : > { %v3458_v3 = vsel %vm1618_vm4, %v1643_v61, %v1644_v62  ;;  %v1415_v8 = vrot.slane %v1413_v0, 1  ;;  %v3515_v42 = vsel %vm1618_vm4, %v1631_v29, %v1632_v31  ;;  %v1394_v45 = vshll.u32 %v3387_v22, 16 }
  0xa2   : > { %v1220_v10 = vor.u32 %v1218_v5, %v3364_v4  ;;  %v1227_v25 = vor.u32 %v1225_v18, %v3375_v17  ;;  %v1418_v5 = vshll.u32 %v1338_v1, 16  ;;  %v3461_v6 = vsel %vm1361_vm5, %v1380_v63, %v1384_v2 }
  0xa3   : > { %v1416_v11 = vor.u32 %v1415_v8, %v1411_v7  ;;  %v1439_v44 = vrot.slane %v1437_v35, 1  ;;  %v1391_v52 = vrot.slane %v1389_v40, 1  ;;  %v1442_v56 = vshll.u32 %v1340_v41, 16 }
  0xa4   : > { %v3373_v15 = vsel %vm3312_vm3, 0, %v1220_v10  ;;  %v3404_v34 = vsel %vm3312_vm3, 0, %v1227_v25  ;;  %v3474_v10 = vsel %vm3312_vm3, %v3364_v4, 0  ;;  %v1420_v12 = vrot.slane %v1418_v5, 1 }
  0xa5   : > { %1716 = vrot.lane.b32.xlu0 %v3373_v15, %s3161_s15  ;;  %1702 = vrot.lane.b32.xlu1 %v3347_v58, %s3161_s15  ;;  %4639 = vst [vmem:[#allocation4_spill] sm:$0xff] %v3404_v34  ;;  %v1646_v14 = vrot.slane %v3373_v15, 1  ;;  %v1647_v18 = vrot.slane %v3474_v10, 1  ;;  %v1423_v4 = vshrl.u32 %v3318_v27, 16  ;;  %v3499_v25 = vsel %vm3312_vm3, %v3375_v17, 0 }
  0xa6   : > { %1669 = vrot.lane.b32.xlu2 %v1624_v19, %s3163_s17  ;;  %v3486_v20 = vsel %vm1361_vm5, %v1416_v11, %v1420_v12  ;;  %v1649_v37 = vrot.slane %v3404_v34, 1  ;;  %v1650_v38 = vrot.slane %v3499_v25, 1  ;;  %v3509_v17 = vsel %vm700_vm0, %v3075_v28, %v1024_v36 }
  0xa7   : > { %v3490_v23 = vsel %vm1618_vm4, %v1646_v14, %v1647_v18  ;;  %v1428_v32 = vor.u32 %v1427_v21, %v1423_v4  ;;  %4641 = vst [vmem:[#allocation6_spill] sm:$0xff] %v3509_v17  ;;  %v1435_v57 = vshrl.u32 %v3352_v60, 16  ;;  %v1461_v22 = vshll.u32 %v3429_v49, 16 }
  0xa8   : > { %4640 = vst [vmem:[#allocation5_spill] sm:$0xff] %v3490_v23  ;;  %v3522_v46 = vsel %vm1618_vm4, %v1649_v37, %v1650_v38  ;;  %v1392_v62 = vor.u32 %v1391_v52, %v1387_v53  ;;  %v1396_v63 = vrot.slane %v1394_v45, 1  ;;  %v1466_v0 = vshll.u32 %v3433_v51, 16 }
  0xa9   : > { %v1440_v61 = vor.u32 %v1439_v44, %v1435_v57  ;;  %v1444_v1 = vrot.slane %v1442_v56, 1  ;;  %v1459_v2 = vshrl.u32 %v3429_v49, 16  ;;  %v1463_v5 = vrot.slane %v1461_v22, 1 }
  0xaa   : > { %v3168_v8 = vmov 0.0   ;;  %v1046_v12 = vunpack.c.l.bf16 %v3323_v30  ;;  %v1397_v14 = vsel %vm1361_vm5, %v1392_v62, %v1396_v63  ;;  %v1468_v18 = vrot.slane %v1466_v0, 1 }
  0xab   : > { %v3536_v7 = vsel %vm1361_vm5, %v1440_v61, %v1444_v1  ;;  %v3538_v11 = vunpack.c.l.bf16 %v3168_v8  ;;  %v1464_v51 = vor.u32 %v1463_v5, %v1459_v2  ;;  %v1473_v4 = vshll.u32 %v3373_v15, 16 }
  0xac   : > { %v1638_v28 = vrot.slane %v1340_v41, 1  ;;  %v1478_v36 = vshll.u32 %v3474_v10, 16  ;;  %v1471_v37 = vshrl.u32 %v3373_v15, 16  ;;  %v1485_v44 = vshll.u32 %v3404_v34, 16 }
  0xad   : > { %1829 = vrot.lane.b32.xlu0 %v3404_v34, %s3162_s16  ;;  %1815 = vrot.lane.b32.xlu1 %v3400_v33, %s3162_s16  ;;  %4642 = vst [vmem:[#allocation7_spill] sm:$0xff] %v3538_v11  ;;  %v1049_v21 = vmul.f32 %v3538_v11, %v1046_v12  ;;  %v1050_v30 = vmul.f32 %v3538_v11, %v1047_v13  ;;  %v1490_v56 = vshll.u32 %v3499_v25, 16  ;;  %v1401_v57 = vshll.u32 %v3400_v33, 16  ;;  %v3049_v12 = vld [vmem:[%s3298_s27 + $0x30] sm:$0xff] }
  0xae   : > { %1782 = vrot.lane.b32.xlu2 %v3411_v24, %s3164_s18  ;;  %v3553_v29 = vsel %vm1361_vm5, %v1464_v51, %v1468_v18  ;;  %v1480_v45 = vrot.slane %v1478_v36, 1  ;;  %v1487_v10 = vrot.slane %v1485_v44, 1  ;;  %v1406_v25 = vshll.u32 %v3415_v39, 16  ;;  %v3054_v51 = vld [vmem:[%s3298_s27 + $0x58] sm:$0xff]  ;;  %v954_v18 = vpop.permute.xlu1 %953 }
  0xaf   : > { %v1052_v35 = vpack.c.bf16 %v1050_v30, %v1050_v30  ;;  %v1492_v61 = vrot.slane %v1490_v56, 1  ;;  %v1399_v63 = vshrl.u32 %v3400_v33, 16 }
  0xb0   : > { %v1408_v39 = vrot.slane %v1406_v25, 1  ;;  %v3055_v25 = vld [vmem:[%s3298_s27 + $0x60] sm:$0xff] }
  0xb1   : > { %v1130_v41 = vunpack.c.l.b16 %v1052_v35 }
  0xb5   : > { %1704 = vrot.lane.b32.xlu0 %v3400_v33, %s3161_s15  ;;  %1677 = vrot.lane.b32.xlu1 %v3425_v48, %s3163_s17  ;;  %v3080_v33 = vld [vmem:[%s4623_s6 + $0x18] sm:$0xff] }
  0xb6   : > { %1895 = vrot.lane.b32.xlu2 %v3444_v55, %s3165_s19 }
  0xbd   : > { %1780 = vrot.lane.b32.xlu0 %v1624_v19, %s3164_s18  ;;  %1556 = vrot.lane.b32.xlu1 %v3461_v6, %s3166_s20  ;;  %v1430_v19 = vshll.u32 %v3396_v16, 16 }
  0xbe   : > { %1683 = vrot.lane.b32.xlu2 %v3458_v3, %s3163_s17 }
  0xbf   : > { %v1432_v16 = vrot.slane %v1430_v19, 1  ;;  %v1637_v19 = vrot.slane %v3352_v60, 1 }
  0xc1   : > { %v3518_v43 = vsel %vm1361_vm5, %v1428_v32, %v1432_v16  ;;  %v3556_v31 = vsel %vm1618_vm4, %v1637_v19, %v1638_v28  ;;  %v1475_v32 = vrot.slane %v1473_v4, 1  ;;  %v1051_v16 = vpack.c.bf16 %v1049_v21, %v1049_v21 }
  0xc2   : > { %v981_v4 = vsel %vm700_vm0, %v3049_v12, %v3337_v50 }
  0xc3   : > { %v1476_v38 = vor.u32 %v1475_v32, %v1471_v37  ;;  %v1129_v40 = vunpack.c.l.b16 %v1051_v16  ;;  %v1201_v32 = vshrl.u32 %v981_v4, 16 }
  0xc5   : > { %1893 = vrot.lane.b32.xlu0 %v3411_v24, %s3165_s19  ;;  %1562 = vrot.lane.b32.xlu1 %v3486_v20, %s3166_s20  ;;  %v3568_v53 = vsel %vm1361_vm5, %v1476_v38, %v1480_v45  ;;  %v1133_v52 = vpack.c.b16 %v1130_v41, %v1129_v40  ;;  %v1203_v38 = vrot.slane %v1201_v32, 7  ;;  %v1204_v40 = vshll.u32 %v981_v4, 16  ;;  %v3618_v45 = vpop.permute.xlu1 %959 }
  0xc6   : > { %1796 = vrot.lane.b32.xlu2 %v3490_v23, %s3164_s18  ;;  %4643 = vst [vmem:[#allocation8_spill] sm:$0xff] %v3568_v53 }
  0xc7   : > { %v1152_v62 = vshrl.u32 %v1133_v52, 16  ;;  %v1155_v5 = vshll.u32 %v1133_v52, 16  ;;  %4644 = vst [vmem:[#allocation9_spill] sm:$0xff] %v3618_v45 }
  0xc9   : > { %v1154_v2 = vrot.slane %v1152_v62, 7 }
  0xcb   : > { %v1157_v13 = vor.u32 %v1155_v5, %v1154_v2  ;;  %v1334_v50 = vsel %vm3312_vm3, %v1154_v2, 0 }
  0xcc   : > { %v1620_v37 = vrot.slane %v1334_v50, 1 }
  0xcd   : > { %1675 = vrot.lane.b32.xlu0 %v3515_v42, %s3163_s17  ;;  %1752 = vrot.lane.b32.xlu1 %v3518_v43, %s3167_s13  ;;  %v3603_v21 = vsel %vm3312_vm3, 0, %v1157_v13 }
  0xce   : > { %1909 = vrot.lane.b32.xlu2 %v3522_v46, %s3165_s19  ;;  %v1619_v16 = vrot.slane %v3603_v21, 1  ;;  %v1365_v35 = vshll.u32 %v3603_v21, 16 }
  0xd0   : > { %v1621_v41 = vsel %vm1618_vm4, %v1619_v16, %v1620_v37  ;;  %v1367_v44 = vrot.slane %v1365_v35, 1 }
  0xd5   : > { %1788 = vrot.lane.b32.xlu0 %v3425_v48, %s3164_s18  ;;  %1865 = vrot.lane.b32.xlu1 %v3536_v7, %s3169_s21 }
  0xd6   : > { %1558 = vrot.lane.b32.xlu2 %v1397_v14, %s3166_s20 }
  0xd8   : > { %v3586_v1 = vpop.permute.xlu2 %1708 }
  0xdd   : > { %1901 = vrot.lane.b32.xlu0 %v3556_v31, %s3165_s19  ;;  %1570 = vrot.lane.b32.xlu1 %v3553_v29, %s3166_s20 }
  0xde   : > { %1744 = vrot.lane.b32.xlu2 %v3461_v6, %s3167_s13  ;;  %v1483_v6 = vshrl.u32 %v3404_v34, 16 }
  0xe0   : > { %v1488_v22 = vor.u32 %v1487_v10, %v1483_v6  ;;  %v1363_v6 = vshrl.u32 %v3603_v21, 16  ;;  %v1370_v10 = vshll.u32 %v1334_v50, 16 }
  0xe2   : > { %v3582_v0 = vsel %vm1361_vm5, %v1488_v22, %v1492_v61  ;;  %v1368_v61 = vor.u32 %v1367_v44, %v1363_v6 }
  0xe5   : > { %1671 = vrot.lane.b32.xlu0 %v3411_v24, %s3163_s17  ;;  %1760 = vrot.lane.b32.xlu1 %v3568_v53, %s3167_s13  ;;  %v1403_v24 = vrot.slane %v1401_v57, 1  ;;  %v1206_v57 = vor.u32 %v1204_v40, %v1203_v38 }
  0xe6   : > { %1857 = vrot.lane.b32.xlu2 %v1397_v14, %s3169_s21 }
  0xe7   : > { %v1404_v8 = vor.u32 %v1403_v24, %v1399_v63  ;;  %v1372_v63 = vrot.slane %v1370_v10, 1  ;;  %v3628_v24 = vsel %vm3312_vm3, 0, %v1206_v57  ;;  %v3053_v10 = vld [vmem:[%s3298_s27 + $0x50] sm:$0xff] }
  0xe9   : > { %v3593_v19 = vsel %vm1361_vm5, %v1404_v8, %v1408_v39  ;;  %v1373_v2 = vsel %vm1361_vm5, %v1368_v61, %v1372_v63  ;;  %v1341_v8 = vsel %vm3312_vm3, %v1203_v38, 0  ;;  %v999_v39 = vsel %vm700_vm0, %v3055_v25, %v954_v18 }
  0xea   : > { %v1641_v50 = vrot.slane %v1341_v8, 1  ;;  %v1454_v57 = vshll.u32 %v1341_v8, 16 }
  0xed   : > { %1746 = vrot.lane.b32.xlu0 %v1397_v14, %s3167_s13  ;;  %1564 = vrot.lane.b32.xlu1 %v3518_v43, %s3166_s20  ;;  %v952_v14 = vpop.permute.xlu0 %951 }
  0xee   : > { %1873 = vrot.lane.b32.xlu2 %v3582_v0, %s3169_s21  ;;  %v996_v30 = vsel %vm700_vm0, %v3054_v51, %v952_v14  ;;  %v1243_v14 = vshrl.u32 %v999_v39, 16 }
  0xef   : > { %v1236_v36 = vshrl.u32 %v996_v30, 16  ;;  %v1239_v56 = vshll.u32 %v996_v30, 16  ;;  %v1640_v30 = vrot.slane %v3628_v24, 1 }
  0xf0   : > { %v1245_v35 = vrot.slane %v1243_v14, 7 }
  0xf1   : > { %v1238_v52 = vrot.slane %v1236_v36, 7  ;;  %v1246_v36 = vshll.u32 %v999_v39, 16  ;;  %v3658_v37 = vsel %vm1618_vm4, %v1640_v30, %v1641_v50  ;;  %v1456_v30 = vrot.slane %v1454_v57, 1 }
  0xf3   : > { %v1241_v62 = vor.u32 %v1239_v56, %v1238_v52  ;;  %v3650_v4 = vsel %vm3312_vm3, %v1238_v52, 0  ;;  %v1449_v56 = vshll.u32 %v3628_v24, 16  ;;  %v1248_v6 = vor.u32 %v1246_v36, %v1245_v35 }
  0xf4   : > { %v1514_v32 = vshll.u32 %v3650_v4, 16 }
  0xf5   : > { %1859 = vrot.lane.b32.xlu0 %v3593_v19, %s3169_s21  ;;  %1710 = vrot.lane.b32.xlu1 %v3352_v60, %s3161_s15  ;;  %v3633_v5 = vsel %vm3312_vm3, 0, %v1241_v62  ;;  %v3664_v38 = vpop.permute.xlu0 %957  ;;  %v1447_v62 = vshrl.u32 %v3628_v24, 16  ;;  %v1451_v25 = vrot.slane %v1449_v56, 1  ;;  %v3678_v63 = vsel %vm3312_vm3, 0, %v1248_v6 }
  0xf6   : > { %1748 = vrot.lane.b32.xlu2 %v3593_v19, %s3167_s13  ;;  %v1509_v51 = vshll.u32 %v3633_v5, 16  ;;  %v1507_v18 = vshrl.u32 %v3633_v5, 16  ;;  %v1516_v52 = vrot.slane %v1514_v32, 1  ;;  %v1521_v50 = vshll.u32 %v3678_v63, 16 }
  0xf7   : > { %v3608_v28 = vpop.permute.xlu2 %1821  ;;  %v1452_v14 = vor.u32 %v1451_v25, %v1447_v62  ;;  %v3697_v32 = vsel %vm3312_vm3, %v1245_v35, 0 }
  0xf8   : > { %v1511_v16 = vrot.slane %v1509_v51, 1  ;;  %v1526_v36 = vshll.u32 %v3697_v32, 16 }
  0xfa   : > { %v1512_v44 = vor.u32 %v1511_v16, %v1507_v18  ;;  %v3056_v16 = vld [vmem:[%s3298_s27 + $0x68] sm:$0xff] }
  0xfb   : > { %v1002_v35 = vsel %vm700_vm0, %v3056_v16, %v3469_v9 }
  0xfc   : > { %v3673_v61 = vsel %vm1361_vm5, %v1512_v44, %v1516_v52  ;;  %v1519_v44 = vshrl.u32 %v3678_v63, 16  ;;  %v1523_v52 = vrot.slane %v1521_v50, 1  ;;  %v1528_v50 = vrot.slane %v1526_v36, 1 }
  0xfd   : > { %1667 = vrot.lane.b32.xlu0 %v1621_v41, %s3163_s17  ;;  %1784 = vrot.lane.b32.xlu1 %v3444_v55, %s3164_s18 }
  0xfe   : > { %1790 = vrot.lane.b32.xlu2 %v3556_v31, %s3164_s18 }
 0x100   : > { %v3623_v22 = vpop.permute.xlu2 %1669 }
 0x105   : > { %1554 = vrot.lane.b32.xlu0 %v1373_v2, %s3166_s20  ;;  %1823 = vrot.lane.b32.xlu1 %v3628_v24, %s3162_s16  ;;  %v993_v2 = vsel %vm700_vm0, %v3053_v10, %v3450_v59  ;;  %v3702_v59 = vsel %vm1361_vm5, %v1452_v14, %v1456_v30  ;;  %v1360_v10 = vld [vmem:[%s4623_s6 + $0x20] sm:$0xf]  ;;  %v1524_v30 = vor.u32 %v1523_v52, %v1519_v44 }
 0x106   : > { %1861 = vrot.lane.b32.xlu2 %v3486_v20, %s3169_s21  ;;  %v1229_v18 = vshrl.u32 %v993_v2, 16  ;;  %v1232_v6 = vshll.u32 %v993_v2, 16  ;;  %v2210_v25 = vunpack.c.l.b16 %v1360_v10  ;;  %v1250_v2 = vshrl.u32 %v1002_v35, 16 }
 0x107   : > { %v3643_v12 = vpop.permute.xlu1 %1700  ;;  %v1253_v10 = vshll.u32 %v1002_v35, 16  ;;  %v1655_v35 = vrot.slane %v3633_v5, 1 }
 0x108   : > { %v3645_v13 = vpop.permute.xlu2 %1782  ;;  %v1231_v56 = vrot.slane %v1229_v18, 7  ;;  %v2215_v18 = vpack.c.b16 %v2210_v25, %v2210_v25  ;;  %v3728_v60 = vrot.slane %v1250_v2, 7  ;;  %v1656_v25 = vrot.slane %v3650_v4, 1 }
 0x10a   : > { %v1234_v9 = vor.u32 %v1232_v6, %v1231_v56  ;;  %v2255_v16 = vsel %vm2253_vm6, %v2215_v18, 0  ;;  %v1255_v2 = vor.u32 %v1253_v10, %v3728_v60  ;;  %v3759_v4 = vsel %vm1618_vm4, %v1655_v35, %v1656_v25 }
 0x10b   : > { %3083 = vmatpush.bf16.msra.mxu1 %v2255_v16  ;;  %3084 = vmatpush.bf16.msra.mxu2 %v2255_v16 }
 0x10c   : > { %v3736_v36 = vsel %vm3312_vm3, 0, %v1234_v9  ;;  %2260 = vmatpush.bf16.msra.mxu0 %v2255_v16  ;;  %3085 = vmatpush.bf16.msra.mxu3 %v2255_v16  ;;  %v3078_v16 = vld [vmem:[%s4623_s6 + $0x8] sm:$0xff] }
 0x10d   : > { %1754 = vrot.lane.b32.xlu0 %v3536_v7, %s3167_s13  ;;  %1897 = vrot.lane.b32.xlu1 %v3515_v42, %s3165_s19  ;;  %v1497_v18 = vshll.u32 %v3736_v36, 16 }
 0x10e   : > { %1903 = vrot.lane.b32.xlu2 %v3658_v37, %s3165_s19 }
 0x10f   : > { %v3666_v40 = vpop.permute.xlu1 %1813  ;;  %3086 = vmatpush.bf16.msra.mxu1 %v3080_v33  ;;  %3087 = vmatpush.bf16.msra.mxu2 %v3080_v33  ;;  %v1499_v10 = vrot.slane %v1497_v18, 1  ;;  %v3077_v18 = vld [vmem:[%s4623_s6] sm:$0xff] }
 0x110   : > { %v3668_v41 = vpop.permute.xlu2 %1895  ;;  %2261 = vmatpush.bf16.msra.mxu0 %v3080_v33  ;;  %3088 = vmatpush.bf16.msra.mxu3 %v3080_v33  ;;  %v1495_v33 = vshrl.u32 %v3736_v36, 16 }
 0x115   : > { %1817 = vrot.lane.b32.xlu0 %v3437_v54, %s3162_s16  ;;  %1578 = vrot.lane.b32.xlu1 %v3673_v61, %s3166_s20 }
 0x116   : > { %1685 = vrot.lane.b32.xlu2 %v3490_v23, %s3163_s17 }
 0x117   : > { %v3688_v8 = vpop.permute.xlu0 %1716  ;;  %v3690_v39 = vpop.permute.xlu1 %1702 }
 0x118   : > { %v3692_v51 = vpop.permute.xlu2 %1683 }
 0x11d   : > { %1867 = vrot.lane.b32.xlu0 %v3702_v59, %s3169_s21  ;;  %1718 = vrot.lane.b32.xlu1 %v3404_v34, %s3161_s15  ;;  %v3723_v34 = vsel %vm1361_vm5, %v1524_v30, %v1528_v50  ;;  %v3079_v30 = vld [vmem:[%s4623_s6 + $0x10] sm:$0xff]  ;;  %v3753_v50 = vsel %vm3312_vm3, %v1231_v56, 0  ;;  %v3766_v56 = vsel %vm3312_vm3, 0, %v1255_v2 }
 0x11e   : > { %1724 = vrot.lane.b32.xlu2 %v3678_v63, %s3161_s15  ;;  %v1502_v9 = vshll.u32 %v3753_v50, 16  ;;  %3089 = vmatpush.bf16.msra.mxu1 %v3079_v30 }
 0x11f   : > { %v3716_v57 = vpop.permute.xlu0 %1829  ;;  %v3718_v62 = vpop.permute.xlu1 %1815  ;;  %3090 = vmatpush.bf16.msra.mxu2 %v3079_v30  ;;  %2262 = vmatpush.bf16.msra.mxu0 %v3079_v30 }
 0x120   : > { %v3720_v14 = vpop.permute.xlu2 %1796  ;;  %3091 = vmatpush.bf16.msra.mxu3 %v3079_v30  ;;  %v1504_v45 = vrot.slane %v1502_v9, 1  ;;  %v1659_v30 = vrot.slane %v3697_v32, 1 }
 0x122   : > { %3092 = vmatpush.bf16.msra.mxu1 %v3078_v16 }
 0x123   : > { %3093 = vmatpush.bf16.msra.mxu2 %v3078_v16  ;;  %2263 = vmatpush.bf16.msra.mxu0 %v3078_v16 }
 0x124   : > { %3094 = vmatpush.bf16.msra.mxu3 %v3078_v16 }
 0x125   : > { %1572 = vrot.lane.b32.xlu0 %v3568_v53, %s3166_s20  ;;  %1768 = vrot.lane.b32.xlu1 %v3723_v34, %s3167_s13  ;;  %v1500_v53 = vor.u32 %v1499_v10, %v1495_v33  ;;  %v1661_v33 = vrot.slane %v3766_v56, 1 }
 0x126   : > { %1798 = vrot.lane.b32.xlu2 %v3522_v46, %s3164_s18  ;;  %3095 = vmatpush.bf16.msra.mxu1 %v3077_v18 }
 0x127   : > { %v3740_v44 = vpop.permute.xlu0 %1704  ;;  %v3742_v52 = vpop.permute.xlu1 %1677  ;;  %3096 = vmatpush.bf16.msra.mxu2 %v3077_v18  ;;  %2264 = vmatpush.bf16.msra.mxu0 %v3077_v18 }
 0x128   : > { %v3744_v6 = vpop.permute.xlu2 %1909  ;;  %3097 = vmatpush.bf16.msra.mxu3 %v3077_v18 }
 0x12d   : > { %1691 = vrot.lane.b32.xlu0 %v3759_v4, %s3163_s17  ;;  %1831 = vrot.lane.b32.xlu1 %v3736_v36, %s3162_s16 }
 0x12e   : > { %1837 = vrot.lane.b32.xlu2 %v3766_v56, %s3162_s16 }
 0x12f   : > { %v3775_v35 = vpop.permute.xlu0 %1780  ;;  %v1557_v25 = vpop.permute.xlu1 %1556 }
 0x130   : > { %v3777_v2 = vpop.permute.xlu2 %1558  ;;  %v1929_v11 = vsel %vm1925_vm7, %v3332_v47, %v1557_v25  ;;  %v3793_v47 = vsel %vm1361_vm5, %v1500_v53, %v1504_v45 }
 0x131   : > { %v1962_v17 = vsel %vm1958_vm8, %v1929_v11, %v3623_v22 }
 0x132   : > { %v3788_v23 = vsel %vm1991_vm9, %v1962_v17, %v3690_v39  ;;  %v1658_v39 = vrot.slane %v3678_v63, 1 }
 0x134   : > { %v3806_v53 = vsel %vm1618_vm4, %v1658_v39, %v1659_v30 }
 0x135   : > { %1762 = vrot.lane.b32.xlu0 %v3582_v0, %s3167_s13  ;;  %1566 = vrot.lane.b32.xlu1 %v3536_v7, %s3166_s20  ;;  %v1348_v7 = vsel %vm3312_vm3, %v3728_v60, 0  ;;  %v1533_v60 = vshll.u32 %v3766_v56, 16 }
 0x136   : > { %1875 = vrot.lane.b32.xlu2 %v3793_v47, %s3169_s21  ;;  %v1662_v10 = vrot.slane %v1348_v7, 1  ;;  %v1538_v18 = vshll.u32 %v1348_v7, 16 }
 0x137   : > { %v3799_v11 = vpop.permute.xlu0 %1893  ;;  %v1563_v17 = vpop.permute.xlu1 %1562 }
 0x138   : > { %v3801_v22 = vpop.permute.xlu2 %1744  ;;  %v1935_v32 = vsel %vm1925_vm7, %v3437_v54, %v1563_v17  ;;  %v3828_v39 = vsel %vm1618_vm4, %v1661_v33, %v1662_v10  ;;  %v1535_v17 = vrot.slane %v1533_v60, 1  ;;  %v1540_v10 = vrot.slane %v1538_v18, 1 }
 0x13d   : > { %1804 = vrot.lane.b32.xlu0 %v3806_v53, %s3164_s18  ;;  %1673 = vrot.lane.b32.xlu1 %v3444_v55, %s3163_s17  ;;  %v1531_v55 = vshrl.u32 %v3766_v56, 16 }
 0x13e   : > { %1679 = vrot.lane.b32.xlu2 %v3556_v31, %s3163_s17 }
 0x13f   : > { %v1676_v45 = vpop.permute.xlu0 %1675  ;;  %v1753_v9 = vpop.permute.xlu1 %1752  ;;  %v1536_v33 = vor.u32 %v1535_v17, %v1531_v55  ;;  %v1652_v55 = vrot.slane %v3736_v36, 1 }
 0x140   : > { %v3819_v16 = vpop.permute.xlu2 %1857  ;;  %v1968_v25 = vsel %vm1958_vm8, %v1935_v32, %v1676_v45 }
 0x141   : > { %v2001_v31 = vsel %vm1991_vm9, %v1968_v25, %v3586_v1  ;;  %v3841_v60 = vsel %vm1361_vm5, %v1536_v33, %v1540_v10 }
 0x142   : > { %v2034_v30 = vsel %vm2024_vm10, %v2001_v31, %v1753_v9  ;;  %v1653_v31 = vrot.slane %v3753_v50, 1  ;;  %v1931_v50 = vsel %vm1925_vm7, %v3347_v58, %v3777_v2 }
 0x145   : > { %1560 = vrot.lane.b32.xlu0 %v3593_v19, %s3166_s20  ;;  %1917 = vrot.lane.b32.xlu1 %v3828_v39, %s3165_s19 }
 0x146   : > { %1706 = vrot.lane.b32.xlu2 %v3437_v54, %s3161_s15 }
 0x147   : > { %v1789_v7 = vpop.permute.xlu0 %1788  ;;  %v1866_v1 = vpop.permute.xlu1 %1865 }
 0x148   : > { %v2067_v45 = vsel %vm2057_vm11, %v2034_v30, %v1789_v7  ;;  %v1874_v32 = vpop.permute.xlu2 %1873  ;;  %v3861_v30 = vsel %vm1618_vm4, %v1652_v55, %v1653_v31 }
 0x149   : > { %v2100_v19 = vsel %vm2090_vm12, %v2067_v45, %v3608_v28 }
 0x14a   : > { %v2133_v54 = vsel %vm2123_vm13, %v2100_v19, %v1866_v1 }
 0x14d   : > { %1881 = vrot.lane.b32.xlu0 %v3841_v60, %s3169_s21  ;;  %1750 = vrot.lane.b32.xlu1 %v3486_v20, %s3167_s13 }
 0x14e   : > { %1756 = vrot.lane.b32.xlu2 %v3702_v59, %s3167_s13 }
 0x14f   : > { %v1902_v9 = vpop.permute.xlu0 %1901  ;;  %v1571_v25 = vpop.permute.xlu1 %1570 }
 0x150   : > { %v3850_v28 = vpop.permute.xlu2 %1748  ;;  %v2166_v18 = vsel %vm2156_vm14, %v2133_v54, %v1902_v9  ;;  %v1943_v20 = vsel %vm1925_vm7, %v3429_v49, %v1571_v25 }
 0x151   : > { %3018 = vmatmul.msk.bf16.vlgmr.msra.gmra.mxu1 %vm2220_vm15, %v2166_v18  ;;  %v1976_v17 = vsel %vm1958_vm8, %v1943_v20, %v3692_v51  ;;  %v3057_v18 = vld [vmem:[%s3298_s27 + $0x70] sm:$0xff] }
 0x152   : > { %v2009_v51 = vsel %vm1991_vm9, %v1976_v17, %v3688_v8 }
 0x155   : > { %1911 = vrot.lane.b32.xlu0 %v3861_v30, %s3165_s19  ;;  %1792 = vrot.lane.b32.xlu1 %v3658_v37, %s3164_s18 }
 0x156   : > { %1819 = vrot.lane.b32.xlu2 %v3318_v27, %s3162_s16 }
 0x157   : > { %v1672_v7 = vpop.permute.xlu0 %1671  ;;  %v1761_v1 = vpop.permute.xlu1 %1760 }
 0x158   : > { %v1964_v45 = vsel %vm1958_vm8, %v1931_v50, %v1672_v7  ;;  %v3875_v33 = vpop.permute.xlu2 %1790  ;;  %v2042_v10 = vsel %vm2024_vm10, %v2009_v51, %v1761_v1 }
 0x159   : > { %v3880_v19 = vsel %vm1991_vm9, %v1964_v45, %v3740_v44  ;;  %v2075_v54 = vsel %vm2057_vm11, %v2042_v10, %v3720_v14 }
 0x15a   : > { %v2108_v58 = vsel %vm2090_vm12, %v2075_v54, %v3716_v57 }
 0x15b   : > { %v2141_v2 = vsel %vm2123_vm13, %v2108_v58, %v1874_v32 }
 0x15c   : > { %v2174_v8 = vsel %vm2156_vm14, %v2141_v2, %v3744_v6 }
 0x15d   : > { %1712 = vrot.lane.b32.xlu0 %v3628_v24, %s3161_s15  ;;  %1863 = vrot.lane.b32.xlu1 %v3518_v43, %s3169_s21 }
 0x15e   : > { %1869 = vrot.lane.b32.xlu2 %v3553_v29, %s3169_s21  ;;  %3022 = vmatmul.msk.bf16.vlgmr.msra.gmra.mxu2 %vm2220_vm15, %v2174_v8 }
 0x15f   : > { %v1747_v14 = vpop.permute.xlu0 %1746  ;;  %v1565_v44 = vpop.permute.xlu1 %1564 }
 0x160   : > { %v2028_v57 = vsel %vm2024_vm10, %v3788_v23, %v1747_v14  ;;  %v3898_v32 = vpop.permute.xlu2 %1861  ;;  %v1937_v14 = vsel %vm1925_vm7, %v3318_v27, %v1565_v44 }
 0x161   : > { %v2061_v6 = vsel %vm2057_vm11, %v2028_v57, %v3645_v13 }
 0x162   : > { %v2094_v9 = vsel %vm2090_vm12, %v2061_v6, %v3718_v62 }
 0x165   : > { %1786 = vrot.lane.b32.xlu0 %v3515_v42, %s3164_s18  ;;  %1905 = vrot.lane.b32.xlu1 %v3458_v3, %s3165_s19  ;;  %v1005_v42 = vsel %vm700_vm0, %v3057_v18, %v3664_v38 }
 0x166   : > { %1574 = vrot.lane.b32.xlu2 %v3582_v0, %s3166_s20  ;;  %v1257_v55 = vshrl.u32 %v1005_v42, 16  ;;  %v1260_v20 = vshll.u32 %v1005_v42, 16 }
 0x167   : > { %v1860_v43 = vpop.permute.xlu0 %1859  ;;  %v1711_v25 = vpop.permute.xlu1 %1710 }
 0x168   : > { %v3910_v23 = vpop.permute.xlu2 %1903  ;;  %v1259_v31 = vrot.slane %v1257_v55, 7 }
 0x16a   : > { %v1262_v7 = vor.u32 %v1260_v20, %v1259_v31 }
 0x16c   : > { %v3944_v10 = vsel %vm3312_vm3, 0, %v1262_v7 }
 0x16d   : > { %1825 = vrot.lane.b32.xlu0 %v3429_v49, %s3162_s16  ;;  %1687 = vrot.lane.b32.xlu1 %v3522_v46, %s3163_s17  ;;  %v1545_v2 = vshll.u32 %v3944_v10, 16 }
 0x16e   : > { %1693 = vrot.lane.b32.xlu2 %v3806_v53, %s3163_s17 }
 0x16f   : > { %v1668_v13 = vpop.permute.xlu0 %1667  ;;  %v3921_v62 = vpop.permute.xlu1 %1784  ;;  %v1547_v57 = vrot.slane %v1545_v2, 1  ;;  %v3058_v2 = vld [vmem:[%s3298_s27 + $0x78] sm:$0xff]  ;;  %s3040_s27 = sshll.u32 %s4658_s30, 8 }
 0x170   : > { %v3923_v0 = vpop.permute.xlu2 %1685  ;;  %s4124_s23 = scalar_lea.vmem %s4625_s8, %s3040_s27 }
 0x175   : > { %1899 = vrot.lane.b32.xlu0 %v3425_v48, %s3165_s19  ;;  %1726 = vrot.lane.b32.xlu1 %v3766_v56, %s3161_s15 }
 0x176   : > { %1764 = vrot.lane.b32.xlu2 %v3793_v47, %s3167_s13 }
 0x177   : > { %v1555_v46 = vpop.permute.xlu0 %1554  ;;  %v1824_v38 = vpop.permute.xlu1 %1823 }
 0x178   : > { %v1927_v17 = vsel %vm1925_vm7, %v3603_v21, %v1555_v46  ;;  %v3933_v50 = vpop.permute.xlu2 %1724 }
 0x179   : > { %v1960_v51 = vsel %vm1958_vm8, %v1927_v17, %v1668_v13 }
 0x17a   : > { %v1993_v1 = vsel %vm1991_vm9, %v1960_v51, %v3643_v12 }
 0x17b   : > { %v2026_v48 = vsel %vm2024_vm10, %v1993_v1, %v3801_v22 }
 0x17c   : > { %v2059_v45 = vsel %vm2057_vm11, %v2026_v48, %v3775_v35 }
 0x17d   : > { %1580 = vrot.lane.b32.xlu0 %v3723_v34, %s3166_s20  ;;  %1800 = vrot.lane.b32.xlu1 %v3861_v30, %s3164_s18  ;;  %v2092_v21 = vsel %vm2090_vm12, %v2059_v45, %v3666_v40  ;;  %v1349_v40 = vsel %vm3312_vm3, %v1259_v31, 0  ;;  %v2127_v31 = vsel %vm2123_vm13, %v2094_v9, %v1860_v43  ;;  %v1664_v43 = vrot.slane %v3944_v10, 1 }
 0x17e   : > { %1806 = vrot.lane.b32.xlu2 %v3828_v39, %s3164_s18  ;;  %v2125_v12 = vsel %vm2123_vm13, %v2092_v21, %v3819_v16  ;;  %v1550_v8 = vshll.u32 %v1349_v40, 16  ;;  %v1543_v16 = vshrl.u32 %v3944_v10, 16  ;;  %v2160_v9 = vsel %vm2156_vm14, %v2127_v31, %v3668_v41 }
 0x17f   : > { %v1755_v35 = vpop.permute.xlu0 %1754  ;;  %v1898_v22 = vpop.permute.xlu1 %1897  ;;  %v2158_v54 = vsel %vm2156_vm14, %v2125_v12, %v3799_v11  ;;  %v1970_v11 = vsel %vm1958_vm8, %v1937_v14, %v3742_v52  ;;  %v1665_v17 = vrot.slane %v1349_v40, 1  ;;  %v2030_v41 = vsel %vm2024_vm10, %v3880_v19, %v3850_v28  ;;  %v4646_v40 = vld [vmem:[#allocation9_spill] sm:$0xff]  ;;  %v4647_v14 = vld [vmem:[#allocation8_spill] sm:$0xff] }
 0x180   : > { %v3958_v58 = vpop.permute.xlu2 %1798  ;;  %3014 = vmatmul.msk.bf16.vlgmr.msra.gmra.mxu0 %vm2220_vm15, %v2158_v54  ;;  %v2003_v42 = vsel %vm1991_vm9, %v1970_v11, %v1711_v25  ;;  %v1548_v44 = vor.u32 %v1547_v57, %v1543_v16  ;;  %v1552_v13 = vrot.slane %v1550_v8, 1  ;;  %v2063_v1 = vsel %vm2057_vm11, %v2030_v41, %v3921_v62 }
 0x181   : > { %v2036_v55 = vsel %vm2024_vm10, %v2003_v42, %v1755_v35  ;;  %v1008_v8 = vsel %vm700_vm0, %v3058_v2, %v4646_v40 }
 0x182   : > { %v2069_v20 = vsel %vm2057_vm11, %v2036_v55, %v3875_v33  ;;  %v1264_v57 = vshrl.u32 %v1008_v8, 16  ;;  %v4648_v55 = vld [vmem:[#allocation6_spill] sm:$0xff] }
 0x183   : > { %v2102_v25 = vsel %vm2090_vm12, %v2069_v20, %v1824_v38  ;;  %v1071_v31 = vunpack.c.h.bf16 %v4648_v55 }
 0x185   : > { %1720 = vrot.lane.b32.xlu0 %v3736_v36, %s3161_s15  ;;  %1839 = vrot.lane.b32.xlu1 %v3944_v10, %s3162_s16 }
 0x186   : > { %1568 = vrot.lane.b32.xlu2 %v3702_v59, %s3166_s20  ;;  %v3983_v59 = vsel %vm1361_vm5, %v1548_v44, %v1552_v13  ;;  %v1266_v44 = vrot.slane %v1264_v57, 7  ;;  %v1267_v13 = vshll.u32 %v1008_v8, 16  ;;  %v4650_v57 = vld [vmem:[#allocation2_spill] sm:$0xff] }
 0x187   : > { %v1818_v6 = vpop.permute.xlu0 %1817  ;;  %v1579_v18 = vpop.permute.xlu1 %1578 }
 0x188   : > { %v3976_v27 = vpop.permute.xlu2 %1837  ;;  %v2096_v48 = vsel %vm2090_vm12, %v2063_v1, %v1818_v6 }
 0x189   : > { %v2129_v21 = vsel %vm2123_vm13, %v2096_v48, %v3898_v32  ;;  %v4645_v32 = vld [vmem:[#allocation5_spill] sm:$0xff] }
 0x18a   : > { %v2162_v19 = vsel %vm2156_vm14, %v2129_v21, %v1898_v22 }
 0x18d   : > { %1770 = vrot.lane.b32.xlu0 %v3841_v60, %s3167_s13  ;;  %1883 = vrot.lane.b32.xlu1 %v3983_v59, %s3169_s21 }
 0x18e   : > { %1681 = vrot.lane.b32.xlu2 %v3658_v37, %s3163_s17  ;;  %v4003_v37 = vsel %vm1618_vm4, %v1664_v43, %v1665_v17 }
 0x18f   : > { %v1868_v52 = vpop.permute.xlu0 %1867  ;;  %v1719_v46 = vpop.permute.xlu1 %1718 }
 0x190   : > { %v2135_v33 = vsel %vm2123_vm13, %v2102_v25, %v1868_v52  ;;  %3015 = vmatmul.msk.bf16.gmra.mxu0 %vm2220_vm15, %v2160_v9  ;;  %v3999_v51 = vpop.permute.xlu2 %1875  ;;  %v1269_v9 = vor.u32 %v1267_v13, %v1266_v44 }
 0x191   : > { %v2168_v7 = vsel %vm2156_vm14, %v2135_v33, %v3910_v23  ;;  %v4649_v33 = vld [vmem:[#allocation7_spill] sm:$0xff] }
 0x192   : > { %3019 = vmatmul.msk.bf16.gmra.mxu1 %vm2220_vm15, %v2168_v7 }
 0x195   : > { %1833 = vrot.lane.b32.xlu0 %v3633_v5, %s3162_s16  ;;  %1919 = vrot.lane.b32.xlu1 %v4003_v37, %s3165_s19 }
 0x196   : > { %1714 = vrot.lane.b32.xlu2 %v3429_v49, %s3161_s15 }
 0x197   : > { %v1573_v23 = vpop.permute.xlu0 %1572  ;;  %v1769_v38 = vpop.permute.xlu1 %1768 }
 0x198   : > { %v4017_v45 = vpop.permute.xlu2 %1679 }
 0x19d   : > { %1877 = vrot.lane.b32.xlu0 %v3673_v61, %s3169_s21  ;;  %1794 = vrot.lane.b32.xlu1 %v3458_v3, %s3164_s18 }
 0x19e   : > { %1827 = vrot.lane.b32.xlu2 %v3373_v15, %s3162_s16 }
 0x19f   : > { %v1692_v49 = vpop.permute.xlu0 %1691  ;;  %v1832_v28 = vpop.permute.xlu1 %1831 }
 0x1a0   : > { %3016 = vmatmul.msk.bf16.gmra.mxu0 %vm2220_vm15, %v2162_v19  ;;  %v4033_v62 = vpop.permute.xlu2 %1706 }
 0x1a5   : > { %1913 = vrot.lane.b32.xlu0 %v3759_v4, %s3165_s19  ;;  %1907 = vrot.lane.b32.xlu1 %v4645_v32, %s3165_s19 }
 0x1a6   : > { %1576 = vrot.lane.b32.xlu2 %v3793_v47, %s3166_s20  ;;  %v1951_v47 = vsel %vm1925_vm7, %v3633_v5, %v1579_v18 }
 0x1a7   : > { %v1763_v3 = vpop.permute.xlu0 %1762  ;;  %v4037_v12 = vpop.permute.xlu1 %1566 }
 0x1a8   : > { %v4047_v54 = vpop.permute.xlu2 %1756 }
 0x1ad   : > { %1758 = vrot.lane.b32.xlu0 %v3553_v29, %s3167_s13  ;;  %1689 = vrot.lane.b32.xlu1 %v3861_v30, %s3163_s17  ;;  %v1984_v29 = vsel %vm1958_vm8, %v1951_v47, %v1692_v49 }
 0x1ae   : > { %1695 = vrot.lane.b32.xlu2 %v3828_v39, %s3163_s17  ;;  %v1945_v39 = vsel %vm1925_vm7, %v3373_v15, %v1573_v23  ;;  %v2017_v11 = vsel %vm1991_vm9, %v1984_v29, %v3933_v50  ;;  %v1070_v15 = vunpack.c.l.bf16 %v4648_v55 }
 0x1af   : > { %v1805_v35 = vpop.permute.xlu0 %1804  ;;  %v4045_v22 = vpop.permute.xlu1 %1673  ;;  %v1978_v6 = vsel %vm1958_vm8, %v1945_v39, %v3923_v0  ;;  %v2050_v42 = vsel %vm2024_vm10, %v2017_v11, %v1769_v38  ;;  %v1939_v11 = vsel %vm1925_vm7, %v4650_v57, %v4037_v12 }
 0x1b0   : > { %v4069_v18 = vpop.permute.xlu2 %1819  ;;  %v2011_v20 = vsel %vm1991_vm9, %v1978_v6, %v1719_v46  ;;  %v1073_v43 = vmul.f32 %v1070_v15, %v4649_v33  ;;  %v1972_v12 = vsel %vm1958_vm8, %v1939_v11, %v4017_v45 }
 0x1b1   : > { %v2044_v0 = vsel %vm2024_vm10, %v2011_v20, %v1763_v3  ;;  %v4114_v3 = vld [vmem:[%s4624_s7] ss:$0 sm:$0xff] }
 0x1b2   : > { %v1075_v23 = vpack.c.bf16 %v1073_v43, %v1073_v43 }
 0x1b5   : > { %1871 = vrot.lane.b32.xlu0 %v4647_v14, %s3169_s21  ;;  %1728 = vrot.lane.b32.xlu1 %v3944_v10, %s3161_s15 }
 0x1b6   : > { %1766 = vrot.lane.b32.xlu2 %v3673_v61, %s3167_s13  ;;  %v2083_v61 = vsel %vm2057_vm11, %v2050_v42, %v1805_v35 }
 0x1b7   : > { %v4063_v30 = vpop.permute.xlu0 %1560  ;;  %v1918_v16 = vpop.permute.xlu1 %1917  ;;  %v2116_v52 = vsel %vm2090_vm12, %v2083_v61, %v3976_v27  ;;  %v1332_v27 = vsel %vm3312_vm3, 0, %v1269_v9 }
 0x1b8   : > { %v4094_v7 = vpop.permute.xlu2 %1869  ;;  %v1735_v29 = vshll.u32 %v1332_v27, 16  ;;  %v1733_v39 = vshrl.u32 %v1332_v27, 16 }
 0x1bd   : > { %1582 = vrot.lane.b32.xlu0 %v3841_v60, %s3166_s20  ;;  %1802 = vrot.lane.b32.xlu1 %v3759_v4, %s3164_s18  ;;  %v1074_v60 = vmul.f32 %v1071_v31, %v4649_v33  ;;  %v2077_v4 = vsel %vm2057_vm11, %v2044_v0, %v3958_v58  ;;  %v1350_v58 = vsel %vm3312_vm3, %v1266_v44, 0  ;;  %v4651_v0 = vld [vmem:[#allocation3_spill] sm:$0xff] }
 0x1be   : > { %1808 = vrot.lane.b32.xlu2 %v4003_v37, %s3164_s18  ;;  %v2110_v41 = vsel %vm2090_vm12, %v2077_v4, %v1832_v28  ;;  %v1131_v28 = vunpack.c.l.b16 %v1075_v23  ;;  %v1778_v32 = vrot.slane %v1350_v58, 1  ;;  %v1740_v14 = vshll.u32 %v1350_v58, 16 }
 0x1bf   : > { %v1882_v50 = vpop.permute.xlu0 %1881  ;;  %v4085_v25 = vpop.permute.xlu1 %1750  ;;  %v1076_v38 = vpack.c.bf16 %v1074_v60, %v1074_v60  ;;  %v2143_v21 = vsel %vm2123_vm13, %v2110_v41, %v3999_v51 }
 0x1c0   : > { %v2149_v46 = vsel %vm2123_vm13, %v2116_v52, %v1882_v50  ;;  %v4126_v35 = vpop.permute.xlu2 %1574  ;;  %v1742_v20 = vrot.slane %v1740_v14, 1 }
 0x1c1   : > { %v2182_v17 = vsel %vm2156_vm14, %v2149_v46, %v1918_v16  ;;  %v1132_v19 = vunpack.c.l.b16 %v1076_v38  ;;  %v1737_v16 = vrot.slane %v1735_v29, 1 }
 0x1c2   : > { %3026 = vmatmul.msk.bf16.vlgmr.msra.gmra.mxu3 %vm2220_vm15, %v2182_v17 }
 0x1c3   : > { %v1738_v31 = vor.u32 %v1737_v16, %v1733_v39 }
 0x1c5   : > { %1722 = vrot.lane.b32.xlu0 %v3633_v5, %s3161_s15  ;;  %1841 = vrot.lane.b32.xlu1 %v1332_v27, %s3162_s16  ;;  %v1777_v5 = vrot.slane %v1332_v27, 1  ;;  %v1743_v45 = vsel %vm1361_vm5, %v1738_v31, %v1742_v20 }
 0x1c6   : > { %1879 = vrot.lane.b32.xlu2 %v3723_v34, %s3169_s21  ;;  %v1150_v34 = vpack.c.b16 %v1132_v19, %v1131_v28 }
 0x1c7   : > { %v1912_v1 = vpop.permute.xlu0 %1911  ;;  %v1793_v48 = vpop.permute.xlu1 %1792  ;;  %v1779_v51 = vsel %vm1618_vm4, %v1777_v5, %v1778_v32 }
 0x1c8   : > { %v2176_v49 = vsel %vm2156_vm14, %v2143_v21, %v1912_v1  ;;  %v1274_v42 = vshll.u32 %v1150_v34, 16  ;;  %v1694_v15 = vpop.permute.xlu2 %1693 }
 0x1c9   : > { %3023 = vmatmul.msk.bf16.gmra.mxu2 %vm2220_vm15, %v2176_v49 }
 0x1cd   : > { %1772 = vrot.lane.b32.xlu0 %v3983_v59, %s3167_s13  ;;  %1915 = vrot.lane.b32.xlu1 %v3806_v53, %s3165_s19  ;;  %v1271_v53 = vshrl.u32 %v1150_v34, 16 }
 0x1ce   : > { %1921 = vrot.lane.b32.xlu2 %v1779_v51, %s3165_s19  ;;  %v2286_v2 = vpop.f32.mrf.mxu1 }
 0x1cf   : > { %v4130_v47 = vadd.f32 %v4114_v3, %v2286_v2  ;;  %v1713_v40 = vpop.permute.xlu0 %1712  ;;  %v1864_v8 = vpop.permute.xlu1 %1863  ;;  %v1273_v6 = vrot.slane %v1271_v53, 7 }
 0x1d0   : > { %v2005_v50 = vsel %vm1991_vm9, %v1972_v12, %v1713_v40 }
 0x1d1   : > { %2354 = vst.msk [vmem:[%s4124_s23 + $0x40] sm:$0xff] %vm700_vm0, %v4130_v47  ;;  %v1276_v52 = vor.u32 %v1274_v42, %v1273_v6  ;;  %v2038_v46 = vsel %vm2024_vm10, %v2005_v50, %v4047_v54 }
 0x1d2   : > { %v2071_v54 = vsel %vm2057_vm11, %v2038_v46, %v1793_v48 }
 0x1d3   : > { %v1333_v33 = vsel %vm3312_vm3, 0, %v1276_v52 }
 0x1d4   : > { %v1848_v28 = vshll.u32 %v1333_v33, 16  ;;  %v1846_v34 = vshrl.u32 %v1333_v33, 16 }
 0x1d5   : > { %1835 = vrot.lane.b32.xlu0 %v3678_v63, %s3162_s16  ;;  %1697 = vrot.lane.b32.xlu1 %v4003_v37, %s3163_s17  ;;  %v1933_v37 = vsel %vm1925_vm7, %v4651_v0, %v4063_v30  ;;  %v1351_v30 = vsel %vm3312_vm3, %v1273_v6, 0  ;;  %vm2590_vm3 = vcmask 25600  }
 0x1d6   : > { %1730 = vrot.lane.b32.xlu2 %v1332_v27, %s3161_s15  ;;  %v2288_v44 = vpop.f32.mrf.mxu1  ;;  %v1966_v9 = vsel %vm1958_vm8, %v1933_v37, %v4045_v22  ;;  %v1890_v27 = vrot.slane %v1333_v33, 1  ;;  %v1891_v41 = vrot.slane %v1351_v30, 1  ;;  %s2853_s15 = sshll.u32 %s4658_s30, 1 }
 0x1d7   : > { %v4144_v13 = vadd.f32 %v4114_v3, %v2288_v44  ;;  %v1787_v61 = vpop.permute.xlu0 %1786  ;;  %v1906_v55 = vpop.permute.xlu1 %1905  ;;  %v1999_v22 = vsel %vm1991_vm9, %v1966_v9, %v4033_v62 }
 0x1d8   : > { %v2032_v4 = vsel %vm2024_vm10, %v1999_v22, %v4085_v25  ;;  %v4178_v62 = vpop.permute.xlu2 %1764  ;;  %v1892_v48 = vsel %vm1618_vm4, %v1890_v27, %v1891_v41 }
 0x1d9   : > { %2355 = vst.msk [vmem:[%s4124_s23 + $0x48] sm:$0xff] %vm700_vm0, %v4144_v13  ;;  %v2065_v26 = vsel %vm2057_vm11, %v2032_v4, %v1787_v61 }
 0x1da   : > { %v2098_v25 = vsel %vm2090_vm12, %v2065_v26, %v4069_v18 }
 0x1db   : > { %v2131_v49 = vsel %vm2123_vm13, %v2098_v25, %v1864_v8 }
 0x1dd   : > { %1885 = vrot.lane.b32.xlu0 %v1743_v45, %s3169_s21  ;;  %1810 = vrot.lane.b32.xlu1 %v1779_v51, %s3164_s18  ;;  %v1850_v51 = vrot.slane %v1848_v28, 1  ;;  %s682_s18 = scalar_lea.vmem %s4626_s9, %s2853_s15 }
 0x1de   : > { %1843 = vrot.lane.b32.xlu2 %v1333_v33, %s3162_s16 }
 0x1df   : > { %v1826_v43 = vpop.permute.xlu0 %1825  ;;  %v4170_v60 = vpop.permute.xlu1 %1687  ;;  %v1851_v8 = vor.u32 %v1850_v51, %v1846_v34 }
 0x1e0   : > { %v2104_v17 = vsel %vm2090_vm12, %v2071_v54, %v1826_v43  ;;  %v1807_v32 = vpop.permute.xlu2 %1806 }
 0x1e1   : > { %v2306_v23 = vpop.f32.mrf.mxu2  ;;  %v2137_v38 = vsel %vm2123_vm13, %v2104_v17, %v4094_v7 }
 0x1e2   : > { %v4181_v58 = vadd.f32 %v4114_v3, %v2306_v23  ;;  %v2170_v1 = vsel %vm2156_vm14, %v2137_v38, %v1906_v55 }
 0x1e3   : > { %3020 = vmatmul.msk.bf16.gmra.mxu1 %vm2220_vm15, %v2170_v1 }
 0x1e4   : > { %2362 = vst.msk [vmem:[%s4124_s23 + $0x80] sm:$0xff] %vm700_vm0, %v4181_v58 }
 0x1e5   : > { %1584 = vrot.lane.b32.xlu0 %v3983_v59, %s3166_s20  ;;  %1923 = vrot.lane.b32.xlu1 %v1892_v48, %s3165_s19  ;;  %v1853_v59 = vshll.u32 %v1351_v30, 16 }
 0x1e7   : > { %v1900_v7 = vpop.permute.xlu0 %1899  ;;  %v1727_v21 = vpop.permute.xlu1 %1726  ;;  %v1855_v29 = vrot.slane %v1853_v59, 1 }
 0x1e8   : > { %v2164_v19 = vsel %vm2156_vm14, %v2131_v49, %v1900_v7  ;;  %v1569_v14 = vpop.permute.xlu2 %1568 }
 0x1e9   : > { %v2308_v5 = vpop.f32.mrf.mxu2  ;;  %3017 = vmatmul.msk.bf16.gmra.mxu0 %vm2220_vm15, %v2164_v19  ;;  %v1856_v53 = vsel %vm1361_vm5, %v1851_v8, %v1855_v29  ;;  %v1941_v19 = vsel %vm1925_vm7, %v3628_v24, %v1569_v14 }
 0x1ea   : > { %v4198_v18 = vadd.f32 %v4114_v3, %v2308_v5 }
 0x1ec   : > { %2363 = vst.msk [vmem:[%s4124_s23 + $0x88] sm:$0xff] %vm700_vm0, %v4198_v18 }
 0x1ed   : > { %1774 = vrot.lane.b32.xlu0 %v1743_v45, %s3167_s13  ;;  %v4652_v45 = vld [vmem:[#allocation4_spill] sm:$0xff] }
 0x1ee   : > { %v1947_v33 = vsel %vm1925_vm7, %v4652_v45, %v4126_v35 }
 0x1ef   : > { %v1581_v2 = vpop.permute.xlu0 %1580  ;;  %v1801_v40 = vpop.permute.xlu1 %1800  ;;  %v1980_v22 = vsel %vm1958_vm8, %v1947_v33, %v4170_v60 }
 0x1f0   : > { %v1953_v57 = vsel %vm1925_vm7, %v3678_v63, %v1581_v2  ;;  %v1682_v12 = vpop.permute.xlu2 %1681 }
 0x1f1   : > { %v1986_v11 = vsel %vm1958_vm8, %v1953_v57, %v1694_v15  ;;  %v1974_v34 = vsel %vm1958_vm8, %v1941_v19, %v1682_v12 }
 0x1f2   : > { %v2019_v61 = vsel %vm1991_vm9, %v1986_v11, %v1727_v21 }
 0x1f5   : > { %1887 = vrot.lane.b32.xlu0 %v1856_v53, %s3169_s21 }
 0x1f7   : > { %v1721_v39 = vpop.permute.xlu0 %1720  ;;  %v1840_v16 = vpop.permute.xlu1 %1839 }
 0x1f8   : > { %v1715_v46 = vpop.permute.xlu2 %1714  ;;  %v2013_v54 = vsel %vm1991_vm9, %v1980_v22, %v1721_v39 }
 0x1f9   : > { %v2046_v35 = vsel %vm2024_vm10, %v2013_v54, %v4178_v62  ;;  %v2007_v59 = vsel %vm1991_vm9, %v1974_v34, %v1715_v46 }
 0x1fa   : > { %v2079_v26 = vsel %vm2057_vm11, %v2046_v35, %v1801_v40 }
 0x1fd   : > { %v2266_v6 = vpop.f32.mrf.mxu0 }
 0x1fe   : > { %v4210_v42 = vadd.f32 %v4114_v3, %v2266_v6 }
 0x1ff   : > { %v1771_v44 = vpop.permute.xlu0 %1770  ;;  %v1884_v55 = vpop.permute.xlu1 %1883 }
 0x200   : > { %2346 = vst.msk [vmem:[%s4124_s23] sm:$0xff] %vm700_vm0, %v4210_v42  ;;  %v2052_v31 = vsel %vm2024_vm10, %v2019_v61, %v1771_v44  ;;  %v1828_v60 = vpop.permute.xlu2 %1827 }
 0x201   : > { %v2085_v20 = vsel %vm2057_vm11, %v2052_v31, %v1807_v32 }
 0x202   : > { %v2118_v63 = vsel %vm2090_vm12, %v2085_v20, %v1840_v16 }
 0x203   : > { %v2151_v37 = vsel %vm2123_vm13, %v2118_v63, %v1884_v55 }
 0x205   : > { %v2268_v15 = vpop.f32.mrf.mxu0 }
 0x206   : > { %v4220_v0 = vadd.f32 %v4114_v3, %v2268_v15 }
 0x207   : > { %v1834_v50 = vpop.permute.xlu0 %1833  ;;  %v1920_v52 = vpop.permute.xlu1 %1919 }
 0x208   : > { %2347 = vst.msk [vmem:[%s4124_s23 + $0x8] sm:$0xff] %vm700_vm0, %v4220_v0  ;;  %v2184_v9 = vsel %vm2156_vm14, %v2151_v37, %v1920_v52  ;;  %v2112_v38 = vsel %vm2090_vm12, %v2079_v26, %v1834_v50  ;;  %v1577_v5 = vpop.permute.xlu2 %1576 }
 0x209   : > { %3027 = vmatmul.msk.bf16.gmra.mxu3 %vm2220_vm15, %v2184_v9  ;;  %v1949_v31 = vsel %vm1925_vm7, %v3736_v36, %v1577_v5 }
 0x20d   : > { %v2271_v30 = vpop.f32.mrf.mxu0 }
 0x20e   : > { %v4234_v43 = vadd.f32 %v4114_v3, %v2271_v30 }
 0x20f   : > { %v1878_v4 = vpop.permute.xlu0 %1877  ;;  %v2291_v17 = vpop.f32.mrf.mxu1 }
 0x210   : > { %2348 = vst.msk [vmem:[%s4124_s23 + $0x10] sm:$0xff] %vm700_vm0, %v4234_v43  ;;  %v4241_v27 = vadd.f32 %v4114_v3, %v2291_v17  ;;  %v1795_v41 = vpop.permute.xlu1 %1794  ;;  %v2145_v25 = vsel %vm2123_vm13, %v2112_v38, %v1878_v4  ;;  %v1696_v39 = vpop.permute.xlu2 %1695 }
 0x212   : > { %2356 = vst.msk [vmem:[%s4124_s23 + $0x50] sm:$0xff] %vm700_vm0, %v4241_v27 }
 0x215   : > { %v2273_v23 = vpop.f32.mrf.mxu0 }
 0x216   : > { %v4251_v1 = vadd.f32 %v4114_v3, %v2273_v23 }
 0x217   : > { %v1914_v48 = vpop.permute.xlu0 %1913  ;;  %v2293_v7 = vpop.f32.mrf.mxu1 }
 0x218   : > { %2349 = vst.msk [vmem:[%s4124_s23 + $0x18] sm:$0xff] %vm700_vm0, %v4251_v1  ;;  %v4258_v62 = vadd.f32 %v4114_v3, %v2293_v7  ;;  %v1908_v21 = vpop.permute.xlu1 %1907  ;;  %v2178_v49 = vsel %vm2156_vm14, %v2145_v25, %v1914_v48  ;;  %v1767_v44 = vpop.permute.xlu2 %1766 }
 0x219   : > { %3024 = vmatmul.msk.bf16.gmra.mxu2 %vm2220_vm15, %v2178_v49 }
 0x21a   : > { %2357 = vst.msk [vmem:[%s4124_s23 + $0x58] sm:$0xff] %vm700_vm0, %v4258_v62 }
 0x21d   : > { %v2276_v28 = vpop.f32.mrf.mxu0 }
 0x21e   : > { %v4268_v32 = vadd.f32 %v4114_v3, %v2276_v28 }
 0x21f   : > { %v1759_v51 = vpop.permute.xlu0 %1758 }
 0x220   : > { %2350 = vst.msk [vmem:[%s4124_s23 + $0x20] sm:$0xff] %vm700_vm0, %v4268_v32  ;;  %v2040_v2 = vsel %vm2024_vm10, %v2007_v59, %v1759_v51  ;;  %v1690_v40 = vpop.permute.xlu1 %1689  ;;  %v1809_v12 = vpop.permute.xlu2 %1808 }
 0x221   : > { %v2073_v8 = vsel %vm2057_vm11, %v2040_v2, %v1795_v41  ;;  %v1982_v15 = vsel %vm1958_vm8, %v1949_v31, %v1690_v40 }
 0x222   : > { %v2106_v14 = vsel %vm2090_vm12, %v2073_v8, %v1828_v60 }
 0x225   : > { %v2278_v29 = vpop.f32.mrf.mxu0 }
 0x226   : > { %v4278_v24 = vadd.f32 %v4114_v3, %v2278_v29 }
 0x227   : > { %v1872_v53 = vpop.permute.xlu0 %1871 }
 0x228   : > { %2351 = vst.msk [vmem:[%s4124_s23 + $0x28] sm:$0xff] %vm700_vm0, %v4278_v24  ;;  %v2139_v16 = vsel %vm2123_vm13, %v2106_v14, %v1872_v53  ;;  %v1729_v11 = vpop.permute.xlu1 %1728  ;;  %v1880_v45 = vpop.permute.xlu2 %1879 }
 0x229   : > { %v2172_v57 = vsel %vm2156_vm14, %v2139_v16, %v1908_v21 }
 0x22a   : > { %3021 = vmatmul.msk.bf16.gmra.mxu1 %vm2220_vm15, %v2172_v57 }
 0x22f   : > { %v1583_v6 = vpop.permute.xlu0 %1582 }
 0x230   : > { %v1803_v61 = vpop.permute.xlu1 %1802  ;;  %v1955_v50 = vsel %vm1925_vm7, %v3766_v56, %v1583_v6  ;;  %v1922_v7 = vpop.permute.xlu2 %1921 }
 0x231   : > { %v1988_v9 = vsel %vm1958_vm8, %v1955_v50, %v1696_v39 }
 0x232   : > { %v2021_v22 = vsel %vm1991_vm9, %v1988_v9, %v1729_v11 }
 0x237   : > { %v1723_v55 = vpop.permute.xlu0 %1722 }
 0x238   : > { %v1842_v20 = vpop.permute.xlu1 %1841  ;;  %v2015_v37 = vsel %vm1991_vm9, %v1982_v15, %v1723_v55  ;;  %v1731_v59 = vpop.permute.xlu2 %1730 }
 0x239   : > { %v2048_v52 = vsel %vm2024_vm10, %v2015_v37, %v1767_v44 }
 0x23a   : > { %v2081_v30 = vsel %vm2057_vm11, %v2048_v52, %v1803_v61 }
 0x23f   : > { %v1773_v63 = vpop.permute.xlu0 %1772 }
 0x240   : > { %v2054_v54 = vsel %vm2024_vm10, %v2021_v22, %v1773_v63  ;;  %v1916_v4 = vpop.permute.xlu1 %1915  ;;  %v1844_v16 = vpop.permute.xlu2 %1843  ;;  %v2383_v22 = vsel %vm700_vm0, %v4251_v1, 0.0 }
 0x241   : > { %v2087_v35 = vsel %vm2057_vm11, %v2054_v54, %v1809_v12  ;;  %v2385_v54 = vsel %vm700_vm0, %v4268_v32, 0.0 }
 0x242   : > { %v2120_v48 = vsel %vm2090_vm12, %v2087_v35, %v1842_v20  ;;  %v2387_v35 = vsel %vm700_vm0, %v4278_v24, 0.0 }
 0x245   : > { %v2326_v46 = vpop.f32.mrf.mxu3 }
 0x246   : > { %v4296_v33 = vadd.f32 %v4114_v3, %v2326_v46  ;;  %v2379_v46 = vsel %vm700_vm0, %v4220_v0, 0.0 }
 0x247   : > { %v1836_v36 = vpop.permute.xlu0 %1835 }
 0x248   : > { %2370 = vst.msk [vmem:[%s4124_s23 + $0xc0] sm:$0xff] %vm700_vm0, %v4296_v33  ;;  %v2114_v56 = vsel %vm2090_vm12, %v2081_v30, %v1836_v36  ;;  %v1698_v28 = vpop.permute.xlu1 %1697  ;;  %v2381_v36 = vsel %vm700_vm0, %v4234_v43, 0.0 }
 0x249   : > { %v2147_v17 = vsel %vm2123_vm13, %v2114_v56, %v1880_v45  ;;  %v2378_v45 = vsel %vm700_vm0, %v4210_v42, 0.0 }
 0x24a   : > { %v2180_v41 = vsel %vm2156_vm14, %v2147_v17, %v1916_v4  ;;  %v2380_v30 = vadd.f32 %v2379_v46, %v2378_v45  ;;  %v2411_v46 = vsel %vm700_vm0, %v4198_v18, 0.0 }
 0x24b   : > { %3025 = vmatmul.msk.bf16.gmra.mxu2 %vm2220_vm15, %v2180_v41 }
 0x24c   : > { %v2311_v60 = vpop.f32.mrf.mxu2  ;;  %v2382_v56 = vadd.f32 %v2381_v36, %v2380_v30 }
 0x24d   : > { %v4310_v26 = vadd.f32 %v4114_v3, %v2311_v60  ;;  %v2328_v23 = vpop.f32.mrf.mxu3 }
 0x24e   : > { %v4313_v38 = vadd.f32 %v4114_v3, %v2328_v23  ;;  %v2384_v17 = vadd.f32 %v2383_v22, %v2382_v56 }
 0x24f   : > { %2364 = vst.msk [vmem:[%s4124_s23 + $0x90] sm:$0xff] %vm700_vm0, %v4310_v26  ;;  %v1886_v25 = vpop.permute.xlu0 %1885  ;;  %v2413_v36 = vsel %vm700_vm0, %v4310_v26, 0.0 }
 0x250   : > { %2371 = vst.msk [vmem:[%s4124_s23 + $0xc8] sm:$0xff] %vm700_vm0, %v4313_v38  ;;  %v2153_v21 = vsel %vm2123_vm13, %v2120_v48, %v1886_v25  ;;  %v1811_v40 = vpop.permute.xlu1 %1810  ;;  %v2386_v60 = vadd.f32 %v2385_v54, %v2384_v17 }
 0x251   : > { %v2186_v49 = vsel %vm2156_vm14, %v2153_v21, %v1922_v7 }
 0x252   : > { %3028 = vmatmul.msk.bf16.gmra.mxu3 %vm2220_vm15, %v2186_v49  ;;  %v2388_v25 = vadd.f32 %v2387_v35, %v2386_v60 }
 0x254   : > { %v2313_v19 = vpop.f32.mrf.mxu2 }
 0x255   : > { %v4326_v5 = vadd.f32 %v4114_v3, %v2313_v19 }
 0x257   : > { %2365 = vst.msk [vmem:[%s4124_s23 + $0x98] sm:$0xff] %vm700_vm0, %v4326_v5  ;;  %v1585_v34 = vpop.permute.xlu0 %1584  ;;  %v2415_v54 = vsel %vm700_vm0, %v4326_v5, 0.0 }
 0x258   : > { %v1957_v51 = vsel %vm1925_vm7, %v3944_v10, %v1585_v34  ;;  %v1924_v61 = vpop.permute.xlu1 %1923  ;;  %v2393_v34 = vsel %vm700_vm0, %v4130_v47, 0.0 }
 0x259   : > { %v1990_v2 = vsel %vm1958_vm8, %v1957_v51, %v1698_v28 }
 0x25a   : > { %v2023_v29 = vsel %vm1991_vm9, %v1990_v2, %v1731_v59  ;;  %v2395_v2 = vsel %vm700_vm0, %v4144_v13, 0.0 }
 0x25f   : > { %v1775_v8 = vpop.permute.xlu0 %1774 }
 0x260   : > { %v2296_v53 = vpop.f32.mrf.mxu1  ;;  %v2056_v14 = vsel %vm2024_vm10, %v2023_v29, %v1775_v8  ;;  %v2397_v29 = vsel %vm700_vm0, %v4241_v27, 0.0 }
 0x261   : > { %v4337_v39 = vadd.f32 %v4114_v3, %v2296_v53  ;;  %v2089_v10 = vsel %vm2057_vm11, %v2056_v14, %v1811_v40 }
 0x262   : > { %v2122_v44 = vsel %vm2090_vm12, %v2089_v10, %v1844_v16  ;;  %v2399_v10 = vsel %vm700_vm0, %v4258_v62, 0.0 }
 0x263   : > { %2358 = vst.msk [vmem:[%s4124_s23 + $0x60] sm:$0xff] %vm700_vm0, %v4337_v39 }
 0x266   : > { %v2281_v57 = vpop.f32.mrf.mxu0 }
 0x267   : > { %v4344_v11 = vadd.f32 %v4114_v3, %v2281_v57  ;;  %v1888_v6 = vpop.permute.xlu0 %1887  ;;  %v2401_v57 = vsel %vm700_vm0, %v4337_v39, 0.0 }
 0x268   : > { %v2155_v55 = vsel %vm2123_vm13, %v2122_v44, %v1888_v6  ;;  %v2298_v12 = vpop.f32.mrf.mxu1 }
 0x269   : > { %2352 = vst.msk [vmem:[%s4124_s23 + $0x30] sm:$0xff] %vm700_vm0, %v4344_v11  ;;  %v4352_v31 = vadd.f32 %v4114_v3, %v2298_v12  ;;  %v2188_v20 = vsel %vm2156_vm14, %v2155_v55, %v1924_v61  ;;  %v2389_v23 = vsel %vm700_vm0, %v4344_v11, 0.0 }
 0x26a   : > { %3029 = vmatmul.msk.bf16.gmra.mxu3 %vm2220_vm15, %v2188_v20  ;;  %v2390_v7 = vadd.f32 %v2389_v23, %v2388_v25 }
 0x26b   : > { %2359 = vst.msk [vmem:[%s4124_s23 + $0x68] sm:$0xff] %vm700_vm0, %v4352_v31  ;;  %v2403_v44 = vsel %vm700_vm0, %v4352_v31, 0.0 }
 0x26e   : > { %v2283_v63 = vpop.f32.mrf.mxu0 }
 0x26f   : > { %v4360_v15 = vadd.f32 %v4114_v3, %v2283_v63 }
 0x271   : > { %2353 = vst.msk [vmem:[%s4124_s23 + $0x38] sm:$0xff] %vm700_vm0, %v4360_v15  ;;  %v2391_v48 = vsel %vm700_vm0, %v4360_v15, 0.0 }
 0x272   : > { %v2392_v49 = vadd.f32 %v2391_v48, %v2390_v7 }
 0x274   : > { %v2394_v59 = vadd.f32 %v2393_v34, %v2392_v49 }
 0x276   : > { %v2396_v40 = vadd.f32 %v2395_v2, %v2394_v59 }
 0x278   : > { %v2398_v14 = vadd.f32 %v2397_v29, %v2396_v40 }
 0x27a   : > { %v2400_v16 = vadd.f32 %v2399_v10, %v2398_v14  ;;  %v2427_v14 = vsel %vm700_vm0, %v4313_v38, 0.0 }
 0x27c   : > { %v2402_v6 = vadd.f32 %v2401_v57, %v2400_v16 }
 0x27e   : > { %v2404_v55 = vadd.f32 %v2403_v44, %v2402_v6 }
 0x28c   : > { %v2331_v37 = vpop.f32.mrf.mxu3 }
 0x28d   : > { %v4366_v50 = vadd.f32 %v4114_v3, %v2331_v37  ;;  %v2409_v37 = vsel %vm700_vm0, %v4181_v58, 0.0 }
 0x28f   : > { %2372 = vst.msk [vmem:[%s4124_s23 + $0xd0] sm:$0xff] %vm700_vm0, %v4366_v50  ;;  %v2429_v16 = vsel %vm700_vm0, %v4366_v50, 0.0 }
 0x294   : > { %v2333_v52 = vpop.f32.mrf.mxu3 }
 0x295   : > { %v4372_v9 = vadd.f32 %v4114_v3, %v2333_v52 }
 0x297   : > { %2373 = vst.msk [vmem:[%s4124_s23 + $0xd8] sm:$0xff] %vm700_vm0, %v4372_v9  ;;  %v2431_v6 = vsel %vm700_vm0, %v4372_v9, 0.0 }
 0x29c   : > { %v2316_v4 = vpop.f32.mrf.mxu2 }
 0x29d   : > { %v4388_v41 = vadd.f32 %v4114_v3, %v2316_v4 }
 0x29f   : > { %2366 = vst.msk [vmem:[%s4124_s23 + $0xa0] sm:$0xff] %vm700_vm0, %v4388_v41  ;;  %v2417_v17 = vsel %vm700_vm0, %v4388_v41, 0.0 }
 0x2a4   : > { %v2318_v21 = vpop.f32.mrf.mxu2 }
 0x2a5   : > { %v4400_v28 = vadd.f32 %v4114_v3, %v2318_v21 }
 0x2a7   : > { %2367 = vst.msk [vmem:[%s4124_s23 + $0xa8] sm:$0xff] %vm700_vm0, %v4400_v28  ;;  %v2301_v19 = vpop.f32.mrf.mxu1  ;;  %v2419_v7 = vsel %vm700_vm0, %v4400_v28, 0.0 }
 0x2a8   : > { %v4408_v51 = vadd.f32 %v4114_v3, %v2301_v19 }
 0x2aa   : > { %2360 = vst.msk [vmem:[%s4124_s23 + $0x70] sm:$0xff] %vm700_vm0, %v4408_v51  ;;  %v2405_v61 = vsel %vm700_vm0, %v4408_v51, 0.0 }
 0x2ab   : > { %v2406_v20 = vadd.f32 %v2405_v61, %v2404_v55 }
 0x2af   : > { %v2303_v8 = vpop.f32.mrf.mxu1 }
 0x2b0   : > { %v4418_v53 = vadd.f32 %v4114_v3, %v2303_v8  ;;  %v2425_v8 = vsel %vm700_vm0, %v4296_v33, 0.0 }
 0x2b2   : > { %2361 = vst.msk [vmem:[%s4124_s23 + $0x78] sm:$0xff] %vm700_vm0, %v4418_v53  ;;  %v2407_v12 = vsel %vm700_vm0, %v4418_v53, 0.0 }
 0x2b3   : > { %v2408_v63 = vadd.f32 %v2407_v12, %v2406_v20 }
 0x2b5   : > { %v2410_v52 = vadd.f32 %v2409_v37, %v2408_v63  ;;  %v3170_v63 = vmov 256.0  }
 0x2b6   : > { %3134 = vrcp.f32 %v3170_v63 }
 0x2b7   : > { %v2412_v45 = vadd.f32 %v2411_v46, %v2410_v52 }
 0x2b9   : > { %v2414_v30 = vadd.f32 %v2413_v36, %v2412_v45 }
 0x2bb   : > { %v2416_v4 = vadd.f32 %v2415_v54, %v2414_v30 }
 0x2bc   : > { %v3135_v30 = vpop.eup %3134 }
 0x2bd   : > { %v2418_v35 = vadd.f32 %v2417_v17, %v2416_v4  ;;  %v2448_v17 = vmul.f32 256.0, %v3135_v30  ;;  %vm2452_vm2 = vweird.f32 %v3135_v30 }
 0x2bf   : > { %v2420_v49 = vadd.f32 %v2419_v7, %v2418_v35 }
 0x2ce   : > { %v2321_v22 = vpop.f32.mrf.mxu2 }
 0x2cf   : > { %v4440_v56 = vadd.f32 %v4114_v3, %v2321_v22 }
 0x2d1   : > { %2368 = vst.msk [vmem:[%s4124_s23 + $0xb0] sm:$0xff] %vm700_vm0, %v4440_v56  ;;  %v2421_v21 = vsel %vm700_vm0, %v4440_v56, 0.0 }
 0x2d2   : > { %v2422_v34 = vadd.f32 %v2421_v21, %v2420_v49 }
 0x2d5   : > { %v2336_v60 = vpop.f32.mrf.mxu3 }
 0x2d6   : > { %v4450_v23 = vadd.f32 %v4114_v3, %v2336_v60  ;;  %v2323_v25 = vpop.f32.mrf.mxu2 }
 0x2d7   : > { %v4453_v48 = vadd.f32 %v4114_v3, %v2323_v25  ;;  %v2449_v25 = vsub.f32 1.0, %v2448_v17 }
 0x2d8   : > { %2374 = vst.msk [vmem:[%s4124_s23 + $0xe0] sm:$0xff] %vm700_vm0, %v4450_v23  ;;  %v2433_v12 = vsel %vm700_vm0, %v4450_v23, 0.0 }
 0x2d9   : > { %2369 = vst.msk [vmem:[%s4124_s23 + $0xb8] sm:$0xff] %vm700_vm0, %v4453_v48  ;;  %v2423_v19 = vsel %vm700_vm0, %v4453_v48, 0.0  ;;  %v2450_v49 = vmul.f32 %v3135_v30, %v2449_v25 }
 0x2da   : > { %v2424_v59 = vadd.f32 %v2423_v19, %v2422_v34 }
 0x2db   : > { %v2451_v34 = vadd.f32 %v3135_v30, %v2450_v49 }
 0x2dc   : > { %v2426_v29 = vadd.f32 %v2425_v8, %v2424_v59 }
 0x2dd   : > { %v2338_v2 = vpop.f32.mrf.mxu3  ;;  %v2453_v59 = vsel %vm2452_vm2, %v3135_v30, %v2451_v34 }
 0x2de   : > { %v4468_v40 = vadd.f32 %v4114_v3, %v2338_v2  ;;  %v2428_v10 = vadd.f32 %v2427_v14, %v2426_v29 }
 0x2e0   : > { %2375 = vst.msk [vmem:[%s4124_s23 + $0xe8] sm:$0xff] %vm700_vm0, %v4468_v40  ;;  %v2430_v57 = vadd.f32 %v2429_v16, %v2428_v10  ;;  %v2435_v37 = vsel %vm700_vm0, %v4468_v40, 0.0 }
 0x2e2   : > { %v2432_v44 = vadd.f32 %v2431_v6, %v2430_v57 }
 0x2e4   : > { %v2434_v20 = vadd.f32 %v2433_v12, %v2432_v44 }
 0x2e6   : > { %v2436_v46 = vadd.f32 %v2435_v37, %v2434_v20 }
 0x2ed   : > { %v2341_v61 = vpop.f32.mrf.mxu3 }
 0x2ee   : > { %v4482_v55 = vadd.f32 %v4114_v3, %v2341_v61 }
 0x2f0   : > { %2376 = vst.msk [vmem:[%s4124_s23 + $0xf0] sm:$0xff] %vm700_vm0, %v4482_v55  ;;  %v2437_v52 = vsel %vm700_vm0, %v4482_v55, 0.0 }
 0x2f1   : > { %v2438_v22 = vadd.f32 %v2437_v52, %v2436_v46 }
 0x2f5   : > { %v2343_v45 = vpop.f32.mrf.mxu3 }
 0x2f6   : > { %v4494_v36 = vadd.f32 %v4114_v3, %v2343_v45 }
 0x2f8   : > { %2377 = vst.msk [vmem:[%s4124_s23 + $0xf8] sm:$0xff] %vm700_vm0, %v4494_v36  ;;  %v2439_v54 = vsel %vm700_vm0, %v4494_v36, 0.0 }
 0x2f9   : > { %v2440_v4 = vadd.f32 %v2439_v54, %v2438_v22 }
 0x2fb   : > { %v2441_v35 = vrot.slane %v2440_v4, 4 }
 0x2fd   : > { %v2442_v60 = vadd.f32 %v2441_v35, %v2440_v4 }
 0x2ff   : > { %v2443_v7 = vrot.slane %v2442_v60, 2 }
 0x301   : > { %v2444_v21 = vadd.f32 %v2443_v7, %v2442_v60 }
 0x303   : > { %v2445_v19 = vrot.slane %v2444_v21, 1 }
 0x305   : > { %v4501_v3 = vadd.f32 %v2445_v19, %v2444_v21 }
 0x307   : > { %v4504_v2 = vmul.f32 %v2453_v59, %v4501_v3 }
 0x309   : > { %v2455_v8 = vsub.f32 %v4210_v42, %v4504_v2  ;;  %v2456_v29 = vsub.f32 %v4220_v0, %v4504_v2  ;;  %v2457_v14 = vsub.f32 %v4234_v43, %v4504_v2  ;;  %v2458_v10 = vsub.f32 %v4251_v1, %v4504_v2 }
 0x30a   : > { %v2459_v6 = vsub.f32 %v4268_v32, %v4504_v2  ;;  %v2460_v61 = vsub.f32 %v4278_v24, %v4504_v2  ;;  %v2461_v43 = vsub.f32 %v4344_v11, %v4504_v2  ;;  %v2462_v32 = vsub.f32 %v4360_v15, %v4504_v2 }
 0x30b   : > { %v2487_v16 = vmul.f32 %v2455_v8, %v2455_v8  ;;  %v2488_v57 = vmul.f32 %v2456_v29, %v2456_v29  ;;  %v2489_v44 = vmul.f32 %v2457_v14, %v2457_v14  ;;  %v2490_v12 = vmul.f32 %v2458_v10, %v2458_v10 }
 0x30c   : > { %v2491_v63 = vmul.f32 %v2459_v6, %v2459_v6  ;;  %v2492_v52 = vmul.f32 %v2460_v61, %v2460_v61  ;;  %v2463_v45 = vsub.f32 %v4130_v47, %v4504_v2  ;;  %v2493_v30 = vmul.f32 %v2461_v43, %v2461_v43 }
 0x30d   : > { %v2519_v42 = vsel %vm700_vm0, %v2487_v16, 0.0  ;;  %v2520_v0 = vsel %vm700_vm0, %v2488_v57, 0.0  ;;  %v2522_v1 = vsel %vm700_vm0, %v2489_v44, 0.0  ;;  %v2524_v46 = vsel %vm700_vm0, %v2490_v12, 0.0 }
 0x30e   : > { %v2521_v20 = vadd.f32 %v2520_v0, %v2519_v42  ;;  %v2526_v22 = vsel %vm700_vm0, %v2491_v63, 0.0  ;;  %v2464_v11 = vsub.f32 %v4144_v13, %v4504_v2  ;;  %v2494_v4 = vmul.f32 %v2462_v32, %v2462_v32 }
 0x30f   : > { %v2528_v17 = vsel %vm700_vm0, %v2492_v52, 0.0  ;;  %v2465_v15 = vsub.f32 %v4241_v27, %v4504_v2  ;;  %v2495_v60 = vmul.f32 %v2463_v45, %v2463_v45  ;;  %v2530_v25 = vsel %vm700_vm0, %v2493_v30, 0.0 }
 0x310   : > { %v2523_v37 = vadd.f32 %v2522_v1, %v2521_v20  ;;  %v2466_v47 = vsub.f32 %v4258_v62, %v4504_v2  ;;  %v2496_v21 = vmul.f32 %v2464_v11, %v2464_v11  ;;  %v2532_v49 = vsel %vm700_vm0, %v2494_v4, 0.0 }
 0x311   : > { %v2467_v13 = vsub.f32 %v4337_v39, %v4504_v2  ;;  %v2497_v34 = vmul.f32 %v2465_v15, %v2465_v15  ;;  %v2534_v59 = vsel %vm700_vm0, %v2495_v60, 0.0  ;;  %v2468_v27 = vsub.f32 %v4352_v31, %v4504_v2 }
 0x312   : > { %v2525_v24 = vadd.f32 %v2524_v46, %v2523_v37  ;;  %v2498_v29 = vmul.f32 %v2466_v47, %v2466_v47  ;;  %v2536_v14 = vsel %vm700_vm0, %v2496_v21, 0.0  ;;  %v2469_v62 = vsub.f32 %v4408_v51, %v4504_v2 }
 0x313   : > { %v2499_v16 = vmul.f32 %v2467_v13, %v2467_v13  ;;  %v2538_v57 = vsel %vm700_vm0, %v2497_v34, 0.0  ;;  %v2470_v39 = vsub.f32 %v4418_v53, %v4504_v2  ;;  %v2500_v44 = vmul.f32 %v2468_v27, %v2468_v27 }
 0x314   : > { %v2527_v54 = vadd.f32 %v2526_v22, %v2525_v24  ;;  %v2540_v61 = vsel %vm700_vm0, %v2498_v29, 0.0  ;;  %v2471_v31 = vsub.f32 %v4181_v58, %v4504_v2  ;;  %v2501_v42 = vmul.f32 %v2469_v62, %v2469_v62 }
 0x315   : > { %v2542_v0 = vsel %vm700_vm0, %v2499_v16, 0.0  ;;  %v2472_v51 = vsub.f32 %v4198_v18, %v4504_v2  ;;  %v2502_v43 = vmul.f32 %v2470_v39, %v2470_v39  ;;  %v2544_v63 = vsel %vm700_vm0, %v2500_v44, 0.0 }
 0x316   : > { %v2529_v35 = vadd.f32 %v2528_v17, %v2527_v54  ;;  %v2473_v53 = vsub.f32 %v4310_v26, %v4504_v2  ;;  %v2503_v37 = vmul.f32 %v2471_v31, %v2471_v31  ;;  %v2546_v32 = vsel %vm700_vm0, %v2501_v42, 0.0 }
 0x317   : > { %v2474_v58 = vsub.f32 %v4326_v5, %v4504_v2  ;;  %v2504_v46 = vmul.f32 %v2472_v51, %v2472_v51  ;;  %v2548_v24 = vsel %vm700_vm0, %v2502_v43, 0.0  ;;  %v2475_v18 = vsub.f32 %v4388_v41, %v4504_v2 }
 0x318   : > { %v2531_v7 = vadd.f32 %v2530_v25, %v2529_v35  ;;  %v2505_v30 = vmul.f32 %v2473_v53, %v2473_v53  ;;  %v2550_v22 = vsel %vm700_vm0, %v2503_v37, 0.0  ;;  %v2476_v26 = vsub.f32 %v4400_v28, %v4504_v2 }
 0x319   : > { %v2506_v11 = vmul.f32 %v2474_v58, %v2474_v58  ;;  %v2552_v4 = vsel %vm700_vm0, %v2504_v46, 0.0  ;;  %v2477_v5 = vsub.f32 %v4440_v56, %v4504_v2  ;;  %v2507_v35 = vmul.f32 %v2475_v18, %v2475_v18 }
 0x31a   : > { %v2533_v19 = vadd.f32 %v2532_v49, %v2531_v7  ;;  %v2554_v15 = vsel %vm700_vm0, %v2505_v30, 0.0  ;;  %v2478_v41 = vsub.f32 %v4453_v48, %v4504_v2  ;;  %v2508_v25 = vmul.f32 %v2476_v26, %v2476_v26 }
 0x31b   : > { %v2556_v7 = vsel %vm700_vm0, %v2506_v11, 0.0  ;;  %v2479_v28 = vsub.f32 %v4296_v33, %v4504_v2  ;;  %v2509_v21 = vmul.f32 %v2477_v5, %v2477_v5  ;;  %v2558_v49 = vsel %vm700_vm0, %v2507_v35, 0.0 }
 0x31c   : > { %v2535_v8 = vadd.f32 %v2534_v59, %v2533_v19  ;;  %v2480_v56 = vsub.f32 %v4313_v38, %v4504_v2  ;;  %v2510_v13 = vmul.f32 %v2478_v41, %v2478_v41  ;;  %v2560_v34 = vsel %vm700_vm0, %v2508_v25, 0.0 }
 0x31d   : > { %v2481_v48 = vsub.f32 %v4366_v50, %v4504_v2  ;;  %v2562_v27 = vsel %vm700_vm0, %v2509_v21, 0.0  ;;  %v2482_v33 = vsub.f32 %v4372_v9, %v4504_v2  ;;  %v2483_v38 = vsub.f32 %v4450_v23, %v4504_v2 }
 0x31e   : > { %v2537_v10 = vadd.f32 %v2536_v14, %v2535_v8  ;;  %v2511_v8 = vmul.f32 %v2479_v28, %v2479_v28  ;;  %v2512_v14 = vmul.f32 %v2480_v56, %v2480_v56  ;;  %v2484_v50 = vsub.f32 %v4468_v40, %v4504_v2 }
 0x31f   : > { %v2513_v16 = vmul.f32 %v2481_v48, %v2481_v48  ;;  %v2514_v39 = vmul.f32 %v2482_v33, %v2482_v33  ;;  %v2485_v9 = vsub.f32 %v4482_v55, %v4504_v2  ;;  %v2486_v23 = vsub.f32 %v4494_v36, %v4504_v2 }
 0x320   : > { %v2539_v6 = vadd.f32 %v2538_v57, %v2537_v10  ;;  %v2564_v10 = vsel %vm700_vm0, %v2510_v13, 0.0  ;;  %v2566_v57 = vsel %vm700_vm0, %v2511_v8, 0.0  ;;  %v2568_v44 = vsel %vm700_vm0, %v2512_v14, 0.0 }
 0x321   : > { %v2570_v31 = vsel %vm700_vm0, %v2513_v16, 0.0  ;;  %v2517_v40 = vmul.f32 %v2485_v9, %v2485_v9 }
 0x322   : > { %v2541_v12 = vadd.f32 %v2540_v61, %v2539_v6 }
 0x323   : > { %v2578_v37 = vsel %vm700_vm0, %v2517_v40, 0.0 }
 0x324   : > { %v2543_v20 = vadd.f32 %v2542_v0, %v2541_v12  ;;  %v2515_v12 = vmul.f32 %v2483_v38, %v2483_v38  ;;  %v2516_v0 = vmul.f32 %v2484_v50, %v2484_v50 }
 0x326   : > { %v2545_v1 = vadd.f32 %v2544_v63, %v2543_v20  ;;  %v2572_v20 = vsel %vm700_vm0, %v2514_v39, 0.0  ;;  %v2574_v43 = vsel %vm700_vm0, %v2515_v12, 0.0  ;;  %v2576_v53 = vsel %vm700_vm0, %v2516_v0, 0.0 }
 0x328   : > { %v2547_v52 = vadd.f32 %v2546_v32, %v2545_v1  ;;  %v2518_v1 = vmul.f32 %v2486_v23, %v2486_v23 }
 0x32a   : > { %v2549_v45 = vadd.f32 %v2548_v24, %v2547_v52  ;;  %v2580_v52 = vsel %vm700_vm0, %v2518_v1, 0.0 }
 0x32c   : > { %v2551_v54 = vadd.f32 %v2550_v22, %v2549_v45 }
 0x32e   : > { %v2553_v17 = vadd.f32 %v2552_v4, %v2551_v54 }
 0x330   : > { %v2555_v60 = vadd.f32 %v2554_v15, %v2553_v17 }
 0x332   : > { %v2557_v47 = vadd.f32 %v2556_v7, %v2555_v60 }
 0x334   : > { %v2559_v19 = vadd.f32 %v2558_v49, %v2557_v47 }
 0x336   : > { %v2561_v59 = vadd.f32 %v2560_v34, %v2559_v19 }
 0x338   : > { %v2563_v29 = vadd.f32 %v2562_v27, %v2561_v59 }
 0x33a   : > { %v2565_v62 = vadd.f32 %v2564_v10, %v2563_v29 }
 0x33c   : > { %v2567_v6 = vadd.f32 %v2566_v57, %v2565_v62 }
 0x33e   : > { %v2569_v61 = vadd.f32 %v2568_v44, %v2567_v6 }
 0x340   : > { %v2571_v42 = vadd.f32 %v2570_v31, %v2569_v61 }
 0x342   : > { %v2573_v51 = vadd.f32 %v2572_v20, %v2571_v42 }
 0x344   : > { %v2575_v63 = vadd.f32 %v2574_v43, %v2573_v51 }
 0x346   : > { %v2577_v55 = vadd.f32 %v2576_v53, %v2575_v63 }
 0x348   : > { %v2579_v32 = vadd.f32 %v2578_v37, %v2577_v55 }
 0x34a   : > { %v2581_v58 = vadd.f32 %v2580_v52, %v2579_v32 }
 0x34c   : > { %v2582_v36 = vrot.slane %v2581_v58, 4 }
 0x34e   : > { %v2583_v2 = vadd.f32 %v2582_v36, %v2581_v58 }
 0x350   : > { %v2584_v46 = vrot.slane %v2583_v2, 2 }
 0x352   : > { %v2585_v24 = vadd.f32 %v2584_v46, %v2583_v2 }
 0x354   : > { %v2586_v45 = vrot.slane %v2585_v24, 1 }
 0x356   : > { %v2587_v18 = vadd.f32 %v2586_v45, %v2585_v24 }
 0x358   : > { %v2589_v30 = vsel %vm1313_vm1, %v4501_v3, %v2587_v18 }
 0x359   : > { %2591 = vst.msk [vmem:[%s682_s18] sm:$0x3] %vm2590_vm3, %v2589_v30 }
 0x35a PF: > { %s20_s11 = sadd.s32 1, %s3158_s11   ;;  %s4653_s30 = smov %s3154_s10 }
 0x35b   : > { %p17_p5 = scmp.ge.s32.totalorder %s20_s11, 4   ;;  %s4654_s10 = smov %s4656_s12 }
 0x35d   :  { %19 = sbr.rel (!%p17_p5) target bundleno = 2 (0x2), region = 109 }

// kernel: up_forward.4
= control target key start
LH: loop header
LB: loop body
LE: loop exit
PB: predicated region body
PF: predicated region fallthrough
CT: control target
= control target key end

     0   :  { %s3508_s27 = smov 0   ;;  %s3510_s28 = smov 0   ;;  %s5371_s0 = inlined_call_operand.vmem [shape: f32[2,16,16,4], index: 0, kind: input, shape index: {}, may-alias: {0,1,2}]   ;;  %s5372_s1 = inlined_call_operand.vmem [shape: f32[2,16,16,4], index: 1, kind: input, shape index: {}, may-alias: {0,1,2}]   ;;  %s5373_s2 = inlined_call_operand.vmem [shape: f32[2,16,16,4], index: 2, kind: input, shape index: {}, may-alias: {0,1,2}]   ;;  %s5374_s3 = inlined_call_operand.vmem [shape: f32[1,4], index: 3, kind: input, shape index: {}]   ;;  %s5375_s4 = inlined_call_operand.vmem [shape: f32[1,4], index: 4, kind: input, shape index: {}]   ;;  %s5376_s5 = inlined_call_operand.vmem [shape: bf16[36,8], index: 5, kind: input, shape index: {}]   ;;  %s5377_s6 = inlined_call_operand.vmem [shape: f32[1,8], index: 6, kind: input, shape index: {}]   ;;  %s5378_s7 = inlined_call_operand.vmem [shape: f32[2,16,16,8], index: 7, kind: output, shape index: {0}]   ;;  %s5379_s8 = inlined_call_operand.vmem [shape: f32[2,1,2,8], index: 8, kind: output, shape index: {1}]  }
   0x1   :  { %s3512_s29 = smov 0  }
   0x2 LB: > { %s31_s30 = sadd.s32 1, %s3448_s28  ;;  %p2697_p0 = scmp.ge.s32.totalorder %s3452_s29, 1  ;;  %s3452_s29 = sphi %s3512_s29, %s19_s29   ;;  %s3448_s28 = sphi %s3510_s28, %s5552_s28   ;;  %s3444_s27 = sphi %s3508_s27, %s5551_s27  }
   0x3   : > { %p33_p1 = scmp.ge.s32.totalorder %s31_s30, 2  ;;  %p353_p2 = scmp.lt.s32.totalorder %s3452_s29, 3 }
   0x5   : > { %s5554_s30 = smov (%p33_p1, %s31_s30), 0  ;;  %p354_p3 = pnand %p2697_p0, %p353_p2 }
   0x7   : > { %357 = sbr.rel (%p354_p3) target bundleno = 763 (0x2fb), region = 48 }
   0xc   : > { %p431_p4 = scmp.lt.s32.totalorder %s3444_s27, 1  ;;  %v3531_v0 = vld [vmem:[%s5374_s3] ss:$0 sm:$0xff]  ;;  %vm694_vm0 = vcmask 1040384   ;;  %vm874_vm1 = vcmask 1046528   ;;  %s3454_s17 = smov 4  }
   0xd   : > { %v3545_v1 = vld [vmem:[%s5375_s4] ss:$0 sm:$0xff]  ;;  %vm1051_vm2 = vcmask 1045504   ;;  %s3455_s21 = smov 8   ;;  %s3456_s22 = smov 12   ;;  %vm1828_vm3 = vcmask 31744  }
   0xe   : > { %s5556_s27 = smov (!%p431_p4, %s3444_s27), 1  ;;  %s3457_s23 = smov 16   ;;  %vm1861_vm4 = vcmask 64512   ;;  %vm1894_vm5 = vcmask 97280   ;;  %vm1927_vm6 = vcmask 130048   ;;  %vm2176_vm7 = vcmask 1041408  }
   0xf   : > { %s3534_s11 = sshll.u32 %s5556_s27, 8  ;;  %s3458_s24 = smov 20   ;;  %vm1960_vm8 = vcmask 162816   ;;  %vm1993_vm9 = vcmask 195584   ;;  %vm2026_vm10 = vcmask 228352   ;;  %vm2059_vm11 = vcmask 261120  }
  0x10   : > { %s3540_s14 = scalar_lea.vmem %s5371_s0, %s3534_s11  ;;  %s453_s20 = scalar_lea.vmem %s5372_s1, %s3534_s11  ;;  %vm2127_vm12 = vcmask 293888   ;;  %vm2512_vm14 = vcmask 58368  }
  0x11   : > { %v516_v2 = vld [vmem:[%s3540_s14 + $0x30] sm:$0xff]  ;;  %v517_v3 = vld [vmem:[%s3540_s14 + $0x38] sm:$0xff]  ;;  %v510_v9 = vld [vmem:[%s3540_s14] sm:$0xff]  ;;  %s3459_s25 = smov 32   ;;  %s3460_s26 = smov 28  }
  0x12   : > { %v512_v4 = vld [vmem:[%s3540_s14 + $0x10] sm:$0xff]  ;;  %v548_v5 = vmul.f32 %v3531_v0, %v516_v2  ;;  %v549_v6 = vmul.f32 %v3531_v0, %v517_v3  ;;  %v513_v7 = vld [vmem:[%s3540_s14 + $0x18] sm:$0xff]  ;;  %v511_v10 = vld [vmem:[%s3540_s14 + $0x8] sm:$0xff]  ;;  %v542_v12 = vmul.f32 %v3531_v0, %v510_v9  ;;  %s3461_s9 = smov 24   ;;  %s4963_s12 = scalar_lea.vmem %s5378_s7, %s3534_s11 }
  0x13   : > { %v544_v8 = vmul.f32 %v3531_v0, %v512_v4  ;;  %v545_v11 = vmul.f32 %v3531_v0, %v513_v7  ;;  %v543_v13 = vmul.f32 %v3531_v0, %v511_v10  ;;  %v518_v14 = vld [vmem:[%s3540_s14 + $0x40] sm:$0xff]  ;;  %v519_v15 = vld [vmem:[%s3540_s14 + $0x48] sm:$0xff]  ;;  %v520_v2 = vld [vmem:[%s3540_s14 + $0x50] sm:$0xff] }
  0x14   : > { %v580_v16 = vadd.f32 %v3545_v1, %v548_v5  ;;  %v581_v17 = vadd.f32 %v3545_v1, %v549_v6  ;;  %v550_v19 = vmul.f32 %v3531_v0, %v518_v14  ;;  %v574_v21 = vadd.f32 %v3545_v1, %v542_v12  ;;  %v514_v58 = vld [vmem:[%s3540_s14 + $0x20] sm:$0xff]  ;;  %v515_v59 = vld [vmem:[%s3540_s14 + $0x28] sm:$0xff]  ;;  %v521_v3 = vld [vmem:[%s3540_s14 + $0x58] sm:$0xff] }
  0x15   : > { %v576_v18 = vadd.f32 %v3545_v1, %v544_v8  ;;  %v577_v20 = vadd.f32 %v3545_v1, %v545_v11  ;;  %v575_v22 = vadd.f32 %v3545_v1, %v543_v13  ;;  %v551_v23 = vmul.f32 %v3531_v0, %v519_v15  ;;  %v524_v15 = vld [vmem:[%s3540_s14 + $0x70] sm:$0xff] }
  0x16   : > { %v612_v24 = vmax.f32 %v580_v16, 0.0  ;;  %v613_v25 = vmax.f32 %v581_v17, 0.0  ;;  %v582_v27 = vadd.f32 %v3545_v1, %v550_v19  ;;  %v606_v29 = vmax.f32 %v574_v21, 0.0  ;;  %v525_v19 = vld [vmem:[%s3540_s14 + $0x78] sm:$0xff] }
  0x17   : > { %v608_v26 = vmax.f32 %v576_v18, 0.0  ;;  %v609_v28 = vmax.f32 %v577_v20, 0.0  ;;  %v607_v30 = vmax.f32 %v575_v22, 0.0  ;;  %v583_v31 = vadd.f32 %v3545_v1, %v551_v23 }
  0x18   : > { %v707_v32 = vrot.slane %v612_v24, 7  ;;  %v708_v33 = vrot.slane %v613_v25, 7  ;;  %v698_v36 = vrot.slane %v606_v29, 7  ;;  %v614_v38 = vmax.f32 %v582_v27, 0.0 }
  0x19   : > { %v701_v34 = vrot.slane %v608_v26, 7  ;;  %v702_v35 = vrot.slane %v609_v28, 7  ;;  %v699_v37 = vrot.slane %v607_v30, 7  ;;  %v615_v46 = vmax.f32 %v583_v31, 0.0  ;;  %v522_v28 = vld [vmem:[%s3540_s14 + $0x60] sm:$0xff] }
  0x1a   : > { %v3572_v39 = vsel %vm694_vm0, %v707_v32, %v708_v33  ;;  %v3575_v40 = vsel %vm694_vm0, 0.0, %v707_v32  ;;  %v3578_v41 = vsel %vm694_vm0, %v708_v33, 0.0  ;;  %v3603_v56 = vsel %vm694_vm0, 0.0, %v698_v36  ;;  %v523_v33 = vld [vmem:[%s3540_s14 + $0x68] sm:$0xff] }
  0x1b   : > { %v3581_v42 = vsel %vm694_vm0, 0.0, %v701_v34  ;;  %v895_v43 = vrot.slane %v3575_v40, 1  ;;  %v896_v44 = vrot.slane %v3572_v39, 1  ;;  %v898_v45 = vrot.slane %v3578_v41, 1 }
  0x1c   : > { %v3587_v47 = vsel %vm694_vm0, %v701_v34, %v702_v35  ;;  %v3590_v48 = vsel %vm694_vm0, %v702_v35, 0.0  ;;  %v885_v49 = vrot.slane %v3581_v42, 1  ;;  %v3594_v50 = vsel %vm694_vm0, %v698_v36, %v699_v37 }
  0x1d   : > { %v897_v51 = vsel %vm874_vm1, %v895_v43, %v896_v44  ;;  %v899_v52 = vsel %vm874_vm1, %v896_v44, %v898_v45  ;;  %v886_v53 = vrot.slane %v3587_v47, 1  ;;  %v888_v54 = vrot.slane %v3590_v48, 1 }
  0x1e   : > { %v3600_v55 = vpack.i.bf16 %v899_v52, %v897_v51  ;;  %v3606_v57 = vsel %vm694_vm0, %v699_v37, 0.0  ;;  %v880_v62 = vrot.slane %v3603_v56, 1  ;;  %v881_v63 = vrot.slane %v3594_v50, 1 }
  0x1f   : > { %v887_v60 = vsel %vm874_vm1, %v885_v49, %v886_v53  ;;  %v889_v61 = vsel %vm874_vm1, %v886_v53, %v888_v54  ;;  %v883_v5 = vrot.slane %v3606_v57, 1  ;;  %v710_v6 = vrot.slane %v614_v38, 7 }
  0x20   : > { %5445 = vst [vmem:[#allocation2_spill] sm:$0xff] %v3600_v55  ;;  %2799 = vrot.lane.b32.xlu2 %v3600_v55, %s3454_s17  ;;  %v3618_v4 = vpack.i.bf16 %v889_v61, %v887_v60  ;;  %v882_v7 = vsel %vm874_vm1, %v880_v62, %v881_v63  ;;  %v711_v8 = vrot.slane %v615_v46, 7  ;;  %v546_v9 = vmul.f32 %v3531_v0, %v514_v58 }
  0x21   : > { %v547_v10 = vmul.f32 %v3531_v0, %v515_v59  ;;  %v884_v11 = vsel %vm874_vm1, %v881_v63, %v883_v5  ;;  %v3628_v12 = vsel %vm694_vm0, 0.0, %v710_v6  ;;  %v552_v13 = vmul.f32 %v3531_v0, %v520_v2 }
  0x22   : > { %5446 = vst [vmem:[#allocation3_spill] sm:$0xff] %v3618_v4  ;;  %2789 = vrot.lane.b32.xlu1 %v3618_v4, %s3454_s17  ;;  %v553_v14 = vmul.f32 %v3531_v0, %v521_v3  ;;  %v3633_v16 = vpack.i.bf16 %v884_v11, %v882_v7  ;;  %v3636_v17 = vsel %vm694_vm0, %v710_v6, %v711_v8  ;;  %v3639_v18 = vsel %vm694_vm0, %v711_v8, 0.0 }
  0x23   : > { %v900_v20 = vrot.slane %v3628_v12, 1  ;;  %v901_v21 = vrot.slane %v3636_v17, 1  ;;  %v903_v22 = vrot.slane %v3639_v18, 1  ;;  %v578_v23 = vadd.f32 %v3545_v1, %v546_v9 }
  0x24   : > { %5447 = vst [vmem:[#allocation4_spill] sm:$0xff] %v3633_v16  ;;  %2784 = vrot.lane.b32.xlu0 %v3633_v16, %s3454_s17  ;;  %v579_v24 = vadd.f32 %v3545_v1, %v547_v10  ;;  %v584_v25 = vadd.f32 %v3545_v1, %v552_v13  ;;  %v585_v26 = vadd.f32 %v3545_v1, %v553_v14  ;;  %v1075_v4 = vrot.slane %v3578_v41, 2 }
  0x25   : > { %v556_v27 = vmul.f32 %v3531_v0, %v524_v15  ;;  %v902_v29 = vsel %vm874_vm1, %v900_v20, %v901_v21  ;;  %v904_v30 = vsel %vm874_vm1, %v901_v21, %v903_v22  ;;  %v610_v31 = vmax.f32 %v578_v23, 0.0 }
  0x26   : > { %v557_v32 = vmul.f32 %v3531_v0, %v525_v19  ;;  %v3657_v34 = vpack.i.bf16 %v904_v30, %v902_v29  ;;  %v611_v35 = vmax.f32 %v579_v24, 0.0  ;;  %v616_v36 = vmax.f32 %v584_v25, 0.0  ;;  %v496_v19 = vld [vmem:[%s453_s20] sm:$0xff]  ;;  %v497_v24 = vld [vmem:[%s453_s20 + $0x8] sm:$0xff] }
  0x27   : > { %v617_v37 = vmax.f32 %v585_v26, 0.0  ;;  %v704_v38 = vrot.slane %v610_v31, 7  ;;  %v588_v43 = vadd.f32 %v3545_v1, %v556_v27  ;;  %v554_v45 = vmul.f32 %v3531_v0, %v522_v28  ;;  %v530_v25 = vld [vmem:[%s3540_s14 + $0xa0] sm:$0xff]  ;;  %v531_v26 = vld [vmem:[%s3540_s14 + $0xa8] sm:$0xff] }
  0x28   : > { %5448 = vst [vmem:[#allocation5_spill] sm:$0xff] %v3657_v34  ;;  %v589_v44 = vadd.f32 %v3545_v1, %v557_v32  ;;  %2804 = vrot.lane.b32.xlu2 %v3657_v34, %s3454_s17  ;;  %v705_v46 = vrot.slane %v611_v35, 7  ;;  %v713_v49 = vrot.slane %v616_v36, 7  ;;  %v555_v52 = vmul.f32 %v3531_v0, %v523_v33 }
  0x29   : > { %v714_v51 = vrot.slane %v617_v37, 7  ;;  %v3666_v53 = vsel %vm694_vm0, 0.0, %v704_v38  ;;  %v620_v54 = vmax.f32 %v588_v43, 0.0  ;;  %v586_v59 = vadd.f32 %v3545_v1, %v554_v45 }
  0x2a   : > { %v621_v58 = vmax.f32 %v589_v44, 0.0  ;;  %v3670_v60 = vsel %vm694_vm0, %v704_v38, %v705_v46  ;;  %v3673_v61 = vsel %vm694_vm0, %v705_v46, 0.0  ;;  %v890_v62 = vrot.slane %v3666_v53, 1 }
  0x2b   : > { %v3677_v63 = vsel %vm694_vm0, %v713_v49, %v714_v51  ;;  %v891_v2 = vrot.slane %v3670_v60, 1  ;;  %v893_v3 = vrot.slane %v3673_v61, 1  ;;  %v3686_v5 = vsel %vm694_vm0, 0.0, %v713_v49 }
  0x2c   : > { %v3689_v6 = vsel %vm694_vm0, %v714_v51, 0.0  ;;  %v905_v7 = vrot.slane %v3686_v5, 1  ;;  %v906_v8 = vrot.slane %v3677_v63, 1  ;;  %v719_v10 = vrot.slane %v620_v54, 7 }
  0x2d   : > { %v908_v9 = vrot.slane %v3689_v6, 1  ;;  %v892_v11 = vsel %vm874_vm1, %v890_v62, %v891_v2  ;;  %v894_v13 = vsel %vm874_vm1, %v891_v2, %v893_v3  ;;  %v720_v14 = vrot.slane %v621_v58, 7 }
  0x2e   : > { %v587_v15 = vadd.f32 %v3545_v1, %v555_v52  ;;  %v3697_v20 = vpack.i.bf16 %v894_v13, %v892_v11  ;;  %v907_v21 = vsel %vm874_vm1, %v905_v7, %v906_v8  ;;  %v3702_v23 = vsel %vm694_vm0, 0.0, %v719_v10 }
  0x2f   : > { %v909_v22 = vsel %vm874_vm1, %v906_v8, %v908_v9  ;;  %v3709_v28 = vsel %vm694_vm0, %v719_v10, %v720_v14  ;;  %v3712_v29 = vsel %vm694_vm0, %v720_v14, 0.0  ;;  %v915_v30 = vrot.slane %v3702_v23, 1  ;;  %v529_v8 = vld [vmem:[%s3540_s14 + $0x98] sm:$0xff] }
  0x30   : > { %5449 = vst [vmem:[#allocation6_spill] sm:$0xff] %v3697_v20  ;;  %v3706_v27 = vpack.i.bf16 %v909_v22, %v907_v21  ;;  %2794 = vrot.lane.b32.xlu1 %v3697_v20, %s3454_s17  ;;  %v916_v31 = vrot.slane %v3709_v28, 1  ;;  %v918_v32 = vrot.slane %v3712_v29, 1  ;;  %v618_v33 = vmax.f32 %v586_v59, 0.0  ;;  %v528_v59 = vld [vmem:[%s3540_s14 + $0x90] sm:$0xff]  ;;  %v526_v22 = vld [vmem:[%s3540_s14 + $0x80] sm:$0xff] }
  0x31   : > { %v619_v35 = vmax.f32 %v587_v15, 0.0  ;;  %v501_v36 = vmul.f32 %v3531_v0, %v496_v19  ;;  %v502_v37 = vmul.f32 %v3531_v0, %v497_v24  ;;  %v562_v38 = vmul.f32 %v3531_v0, %v530_v25 }
  0x32   : > { %5450 = vst [vmem:[#allocation7_spill] sm:$0xff] %v3706_v27  ;;  %2809 = vrot.lane.b32.xlu0 %v3706_v27, %s3454_s17  ;;  %v563_v43 = vmul.f32 %v3531_v0, %v531_v26  ;;  %v917_v44 = vsel %vm874_vm1, %v915_v30, %v916_v31  ;;  %v919_v45 = vsel %vm874_vm1, %v916_v31, %v918_v32  ;;  %v716_v46 = vrot.slane %v618_v33, 7 }
  0x33   : > { %v717_v49 = vrot.slane %v619_v35, 7  ;;  %v3727_v51 = vpack.i.bf16 %v919_v45, %v917_v44  ;;  %v506_v52 = vadd.f32 %v3545_v1, %v501_v36  ;;  %v507_v54 = vadd.f32 %v3545_v1, %v502_v37 }
  0x34   : > { %v594_v58 = vadd.f32 %v3545_v1, %v562_v38  ;;  %v3737_v2 = vsel %vm694_vm0, 0.0, %v716_v46  ;;  %v595_v7 = vadd.f32 %v3545_v1, %v563_v43  ;;  %v560_v21 = vmul.f32 %v3531_v0, %v528_v59 }
  0x35   : > { %5451 = vst [vmem:[#allocation8_spill] sm:$0xff] %v3727_v51  ;;  %v3734_v62 = vsel %vm694_vm0, %v716_v46, %v717_v49  ;;  %v3740_v3 = vsel %vm694_vm0, %v717_v49, 0.0  ;;  %2819 = vrot.lane.b32.xlu2 %v3727_v51, %s3454_s17  ;;  %v910_v9 = vrot.slane %v3737_v2, 1  ;;  %v508_v13 = vmax.f32 %v506_v52, 0.0 }
  0x36   : > { %v911_v10 = vrot.slane %v3734_v62, 1  ;;  %v913_v11 = vrot.slane %v3740_v3, 1  ;;  %v509_v14 = vmax.f32 %v507_v54, 0.0  ;;  %v626_v15 = vmax.f32 %v594_v58, 0.0 }
  0x37   : > { %v627_v19 = vmax.f32 %v595_v7, 0.0  ;;  %v650_v26 = vmul.f32 0.0, %v508_v13  ;;  %v561_v30 = vmul.f32 %v3531_v0, %v529_v8  ;;  %v592_v37 = vadd.f32 %v3545_v1, %v560_v21  ;;  %v527_v7 = vld [vmem:[%s3540_s14 + $0x88] sm:$0xff]  ;;  %v536_v13 = vld [vmem:[%s3540_s14 + $0xd0] sm:$0xff] }
  0x38   : > { %v912_v24 = vsel %vm874_vm1, %v910_v9, %v911_v10  ;;  %v914_v25 = vsel %vm874_vm1, %v911_v10, %v913_v11  ;;  %v651_v32 = vmul.f32 0.0, %v509_v14  ;;  %v728_v33 = vrot.slane %v626_v15, 7 }
  0x39   : > { %v3754_v31 = vpack.i.bf16 %v914_v25, %v912_v24  ;;  %v729_v35 = vrot.slane %v627_v19, 7  ;;  %v695_v36 = vrot.slane %v650_v26, 7  ;;  %v593_v38 = vadd.f32 %v3545_v1, %v561_v30  ;;  %v537_v30 = vld [vmem:[%s3540_s14 + $0xd8] sm:$0xff] }
  0x3a   : > { %v558_v43 = vmul.f32 %v3531_v0, %v526_v22  ;;  %v696_v44 = vrot.slane %v651_v32, 7  ;;  %v3765_v46 = vsel %vm694_vm0, 0.0, %v728_v33  ;;  %v624_v11 = vmax.f32 %v592_v37, 0.0  ;;  %v534_v37 = vld [vmem:[%s3540_s14 + $0xc0] sm:$0xff] }
  0x3b   : > { %5452 = vst [vmem:[#allocation9_spill] sm:$0xff] %v3754_v31  ;;  %2814 = vrot.lane.b32.xlu1 %v3754_v31, %s3454_s17  ;;  %v3762_v45 = vsel %vm694_vm0, %v728_v33, %v729_v35  ;;  %v3768_v49 = vsel %vm694_vm0, %v729_v35, 0.0  ;;  %v3771_v52 = vsel %vm694_vm0, 0.0, %v695_v36  ;;  %v930_v54 = vrot.slane %v3765_v46, 1 }
  0x3c   : > { %5453 = vst [vmem:[#allocation10_spill] sm:$0xff] %v3771_v52  ;;  %v931_v58 = vrot.slane %v3762_v45, 1  ;;  %v933_v59 = vrot.slane %v3768_v49, 1  ;;  %v3778_v8 = vsel %vm694_vm0, %v695_v36, %v696_v44  ;;  %v3781_v9 = vsel %vm694_vm0, %v696_v44, 0.0 }
  0x3d   : > { %5454 = vst [vmem:[#allocation11_spill] sm:$0xff] %v3778_v8  ;;  %v875_v10 = vrot.slane %v3771_v52, 1  ;;  %v876_v14 = vrot.slane %v3778_v8, 1  ;;  %v878_v15 = vrot.slane %v3781_v9, 1  ;;  %v625_v24 = vmax.f32 %v593_v38, 0.0 }
  0x3e   : > { %v932_v19 = vsel %vm874_vm1, %v930_v54, %v931_v58  ;;  %v934_v21 = vsel %vm874_vm1, %v931_v58, %v933_v59  ;;  %v725_v25 = vrot.slane %v624_v11, 7  ;;  %v559_v26 = vmul.f32 %v3531_v0, %v527_v7  ;;  %v535_v11 = vld [vmem:[%s3540_s14 + $0xc8] sm:$0xff] }
  0x3f   : > { %v3789_v22 = vpack.i.bf16 %v934_v21, %v932_v19  ;;  %v877_v32 = vsel %vm874_vm1, %v875_v10, %v876_v14  ;;  %v879_v33 = vsel %vm874_vm1, %v876_v14, %v878_v15  ;;  %v590_v35 = vadd.f32 %v3545_v1, %v558_v43 }
  0x40   : > { %v568_v36 = vmul.f32 %v3531_v0, %v536_v13  ;;  %v2823_v44 = vpack.i.bf16 %v879_v33, %v877_v32  ;;  %v726_v54 = vrot.slane %v625_v24, 7  ;;  %v3801_v38 = vsel %vm694_vm0, 0.0, %v725_v25 }
  0x41   : > { %5455 = vst [vmem:[#allocation12_spill] sm:$0xff] %v3789_v22  ;;  %2839 = vrot.lane.b32.xlu2 %v3789_v22, %s3454_s17  ;;  %v591_v58 = vadd.f32 %v3545_v1, %v559_v26  ;;  %v925_v59 = vrot.slane %v3801_v38, 1  ;;  %v622_v7 = vmax.f32 %v590_v35, 0.0  ;;  %v569_v10 = vmul.f32 %v3531_v0, %v537_v30  ;;  %v533_v22 = vld [vmem:[%s3540_s14 + $0xb8] sm:$0xff] }
  0x42   : > { %v600_v43 = vadd.f32 %v3545_v1, %v568_v36  ;;  %2824 = vrot.lane.b32.xlu0 %v2823_v44, %s3454_s17  ;;  %v3810_v13 = vsel %vm694_vm0, %v725_v25, %v726_v54  ;;  %v3813_v14 = vsel %vm694_vm0, %v726_v54, 0.0  ;;  %v566_v19 = vmul.f32 %v3531_v0, %v534_v37 }
  0x43   : > { %v623_v15 = vmax.f32 %v591_v58, 0.0  ;;  %v926_v21 = vrot.slane %v3810_v13, 1  ;;  %v928_v24 = vrot.slane %v3813_v14, 1  ;;  %v722_v26 = vrot.slane %v622_v7, 7  ;;  %v532_v58 = vld [vmem:[%s3540_s14 + $0xb0] sm:$0xff] }
  0x44   : > { %v601_v30 = vadd.f32 %v3545_v1, %v569_v10  ;;  %v632_v33 = vmax.f32 %v600_v43, 0.0  ;;  %v567_v25 = vmul.f32 %v3531_v0, %v535_v11  ;;  %v598_v35 = vadd.f32 %v3545_v1, %v566_v19 }
  0x45   : > { %v723_v32 = vrot.slane %v623_v15, 7  ;;  %v927_v36 = vsel %vm874_vm1, %v925_v59, %v926_v21  ;;  %v929_v44 = vsel %vm874_vm1, %v926_v21, %v928_v24  ;;  %v3824_v54 = vsel %vm694_vm0, 0.0, %v722_v26 }
  0x46   : > { %v633_v37 = vmax.f32 %v601_v30, 0.0  ;;  %v3828_v31 = vpack.i.bf16 %v929_v44, %v927_v36  ;;  %v920_v43 = vrot.slane %v3824_v54, 1  ;;  %v737_v15 = vrot.slane %v632_v33, 7 }
  0x47   : > { %v3831_v7 = vsel %vm694_vm0, %v722_v26, %v723_v32  ;;  %v3834_v10 = vsel %vm694_vm0, %v723_v32, 0.0  ;;  %v599_v21 = vadd.f32 %v3545_v1, %v567_v25  ;;  %v630_v24 = vmax.f32 %v598_v35, 0.0 }
  0x48   : > { %5456 = vst [vmem:[#allocation13_spill] sm:$0xff] %v3828_v31  ;;  %v921_v59 = vrot.slane %v3831_v7, 1  ;;  %v923_v11 = vrot.slane %v3834_v10, 1  ;;  %v738_v19 = vrot.slane %v633_v37, 7  ;;  %2834 = vrot.lane.b32.xlu1 %v3828_v31, %s3454_s17  ;;  %v564_v26 = vmul.f32 %v3531_v0, %v532_v58 }
  0x49   : > { %v565_v30 = vmul.f32 %v3531_v0, %v533_v22  ;;  %v3850_v33 = vsel %vm694_vm0, 0.0, %v737_v15  ;;  %v631_v58 = vmax.f32 %v599_v21, 0.0 }
  0x4a   : > { %v922_v32 = vsel %vm874_vm1, %v920_v43, %v921_v59  ;;  %v924_v36 = vsel %vm874_vm1, %v921_v59, %v923_v11  ;;  %v3847_v44 = vsel %vm694_vm0, %v737_v15, %v738_v19  ;;  %5458 = vst [vmem:[#allocation15_spill] sm:$0xff] %v3850_v33  ;;  %v3855_v31 = vsel %vm694_vm0, %v738_v19, 0.0 }
  0x4b   : > { %5457 = vst [vmem:[#allocation14_spill] sm:$0xff] %v3847_v44  ;;  %v3852_v37 = vpack.i.bf16 %v924_v36, %v922_v32  ;;  %v945_v25 = vrot.slane %v3850_v33, 1  ;;  %v946_v35 = vrot.slane %v3847_v44, 1  ;;  %v948_v22 = vrot.slane %v3855_v31, 1 }
  0x4c   : > { %v734_v43 = vrot.slane %v630_v24, 7  ;;  %v596_v59 = vadd.f32 %v3545_v1, %v564_v26  ;;  %v1060_v11 = vrot.slane %v3606_v57, 2  ;;  %v597_v19 = vadd.f32 %v3545_v1, %v565_v30 }
  0x4d   : > { %5459 = vst [vmem:[#allocation16_spill] sm:$0xff] %v3852_v37  ;;  %2829 = vrot.lane.b32.xlu0 %v3852_v37, %s3454_s17  ;;  %v947_v15 = vsel %vm874_vm1, %v945_v25, %v946_v35  ;;  %v949_v32 = vsel %vm874_vm1, %v946_v35, %v948_v22  ;;  %v735_v36 = vrot.slane %v631_v58, 7  ;;  %v1052_v35 = vrot.slane %v3771_v52, 2 }
  0x4e   : > { %v3868_v51 = vsel %vm694_vm0, 0.0, %v734_v43  ;;  %v628_v55 = vmax.f32 %v596_v59, 0.0  ;;  %v3870_v21 = vpack.i.bf16 %v949_v32, %v947_v15  ;;  %v629_v57 = vmax.f32 %v597_v19, 0.0 }
  0x4f   : > { %v940_v24 = vrot.slane %v3868_v51, 1  ;;  %v3874_v26 = vsel %vm694_vm0, %v734_v43, %v735_v36  ;;  %v3877_v25 = vsel %vm694_vm0, %v735_v36, 0.0  ;;  %v1053_v15 = vrot.slane %v3778_v8, 2  ;;  %v538_v36 = vld [vmem:[%s3540_s14 + $0xe0] sm:$0xff]  ;;  %v539_v8 = vld [vmem:[%s3540_s14 + $0xe8] sm:$0xff] }
  0x50   : > { %5460 = vst [vmem:[#allocation17_spill] sm:$0xff] %v3870_v21  ;;  %v731_v30 = vrot.slane %v628_v55, 7  ;;  %2854 = vrot.lane.b32.xlu2 %v3870_v21, %s3454_s17  ;;  %v941_v22 = vrot.slane %v3874_v26, 1  ;;  %v943_v58 = vrot.slane %v3877_v25, 1  ;;  %v732_v59 = vrot.slane %v629_v57, 7 }
  0x51   : > { %v1055_v19 = vrot.slane %v3781_v9, 2  ;;  %v1057_v55 = vrot.slane %v3603_v56, 2  ;;  %v1058_v32 = vrot.slane %v3594_v50, 2  ;;  %v1054_v41 = vsel %vm1051_vm2, %v1052_v35, %v1053_v15 }
  0x52   : > { %v3886_v43 = vsel %vm694_vm0, 0.0, %v731_v30  ;;  %v942_v52 = vsel %vm874_vm1, %v940_v24, %v941_v22  ;;  %v944_v21 = vsel %vm874_vm1, %v941_v22, %v943_v58  ;;  %v3895_v37 = vsel %vm694_vm0, %v731_v30, %v732_v59 }
  0x53   : > { %v3898_v57 = vsel %vm694_vm0, %v732_v59, 0.0  ;;  %v3901_v34 = vpack.i.bf16 %v944_v21, %v942_v52  ;;  %v935_v9 = vrot.slane %v3886_v43, 1  ;;  %v936_v16 = vrot.slane %v3895_v37, 1 }
  0x54   : > { %v938_v27 = vrot.slane %v3898_v57, 1  ;;  %v1059_v24 = vsel %vm1051_vm2, %v1057_v55, %v1058_v32  ;;  %v1061_v22 = vsel %vm1051_vm2, %v1058_v32, %v1060_v11  ;;  %v570_v30 = vmul.f32 %v3531_v0, %v538_v36 }
  0x55   : > { %2849 = vrot.lane.b32.xlu1 %v3901_v34, %s3454_s17  ;;  %v937_v52 = vsel %vm874_vm1, %v935_v9, %v936_v16  ;;  %v3914_v58 = vpack.i.bf16 %v1061_v22, %v1059_v24  ;;  %v571_v59 = vmul.f32 %v3531_v0, %v539_v8  ;;  %v1056_v55 = vsel %vm1051_vm2, %v1053_v15, %v1055_v19 }
  0x56   : > { %v939_v21 = vsel %vm874_vm1, %v936_v16, %v938_v27  ;;  %v602_v11 = vadd.f32 %v3545_v1, %v570_v30  ;;  %v1072_v36 = vrot.slane %v3575_v40, 2  ;;  %v1073_v9 = vrot.slane %v3572_v39, 2 }
  0x57   : > { %v3917_v20 = vpack.i.bf16 %v939_v21, %v937_v52  ;;  %v603_v32 = vadd.f32 %v3545_v1, %v571_v59  ;;  %v1067_v27 = vrot.slane %v3666_v53, 2  ;;  %v1068_v8 = vrot.slane %v3670_v60, 2 }
  0x58   : > { %2869 = vrot.lane.b32.xlu2 %v3914_v58, %s3455_s21  ;;  %v634_v16 = vmax.f32 %v602_v11, 0.0  ;;  %v2863_v35 = vpack.i.bf16 %v1056_v55, %v1054_v41  ;;  %v1074_v19 = vsel %vm1051_vm2, %v1072_v36, %v1073_v9  ;;  %v1076_v24 = vsel %vm1051_vm2, %v1073_v9, %v1075_v4 }
  0x59   : > { %5461 = vst [vmem:[#allocation18_spill] sm:$0xff] %v3917_v20  ;;  %2844 = vrot.lane.b32.xlu0 %v3917_v20, %s3454_s17  ;;  %v635_v15 = vmax.f32 %v603_v32, 0.0  ;;  %v1070_v30 = vrot.slane %v3673_v61, 2  ;;  %v1069_v59 = vsel %vm1051_vm2, %v1067_v27, %v1068_v8  ;;  %v3938_v11 = vpack.i.bf16 %v1076_v24, %v1074_v19 }
  0x5a   : > { %v740_v22 = vrot.slane %v634_v16, 7  ;;  %v1087_v61 = vrot.slane %v3737_v2, 2  ;;  %v1088_v16 = vrot.slane %v3734_v62, 2  ;;  %v1065_v27 = vrot.slane %v3590_v48, 2 }
  0x5b   : > { %v741_v52 = vrot.slane %v635_v15, 7  ;;  %5462 = vst [vmem:[#allocation19_spill] sm:$0xff] %v3938_v11  ;;  %v1071_v9 = vsel %vm1051_vm2, %v1068_v8, %v1070_v30  ;;  %v1062_v24 = vrot.slane %v3581_v42, 2 }
  0x5c   : > { %v3935_v21 = vsel %vm694_vm0, 0.0, %v740_v22  ;;  %v3963_v8 = vpack.i.bf16 %v1071_v9, %v1069_v59  ;;  %v1089_v30 = vsel %vm1051_vm2, %v1087_v61, %v1088_v16  ;;  %v1102_v59 = vrot.slane %v3801_v38, 2 }
  0x5d   : > { %2864 = vrot.lane.b32.xlu1 %v2863_v35, %s3455_s21  ;;  %v3942_v41 = vsel %vm694_vm0, %v740_v22, %v741_v52  ;;  %v3945_v55 = vsel %vm694_vm0, %v741_v52, 0.0  ;;  %v950_v4 = vrot.slane %v3935_v21, 1  ;;  %v1090_v35 = vrot.slane %v3740_v3, 2 }
  0x5e   : > { %v951_v32 = vrot.slane %v3942_v41, 1  ;;  %v953_v36 = vrot.slane %v3945_v55, 1  ;;  %v1063_v22 = vrot.slane %v3587_v47, 2  ;;  %v1082_v3 = vrot.slane %v3686_v5, 2 }
  0x5f   : > { %v1091_v48 = vsel %vm1051_vm2, %v1088_v16, %v1090_v35  ;;  %v1103_v61 = vrot.slane %v3810_v13, 2  ;;  %v1105_v9 = vrot.slane %v3813_v14, 2 }
  0x60   : > { %v952_v15 = vsel %vm874_vm1, %v950_v4, %v951_v32  ;;  %v954_v19 = vsel %vm874_vm1, %v951_v32, %v953_v36  ;;  %2884 = vrot.lane.b32.xlu2 %v3938_v11, %s3455_s21  ;;  %v1083_v4 = vrot.slane %v3677_v63, 2  ;;  %v1085_v32 = vrot.slane %v3689_v6, 2  ;;  %v5487_v11 = vld [vmem:[#allocation6_spill] sm:$0xff] }
  0x61   : > { %v3961_v52 = vpack.i.bf16 %v954_v19, %v952_v15  ;;  %v1064_v36 = vsel %vm1051_vm2, %v1062_v24, %v1063_v22  ;;  %v1066_v15 = vsel %vm1051_vm2, %v1063_v22, %v1065_v27  ;;  %v3974_v19 = vpack.i.bf16 %v1091_v48, %v1089_v30 }
  0x62   : > { %v1084_v6 = vsel %vm1051_vm2, %v1082_v3, %v1083_v4  ;;  %v1086_v16 = vsel %vm1051_vm2, %v1083_v4, %v1085_v32  ;;  %v3983_v35 = vpack.i.bf16 %v1066_v15, %v1064_v36  ;;  %v1077_v27 = vrot.slane %v3628_v12, 2 }
  0x63   : > { %5463 = vst [vmem:[#allocation20_spill] sm:$0xff] %v3961_v52  ;;  %2859 = vrot.lane.b32.xlu0 %v3961_v52, %s3454_s17  ;;  %v1078_v24 = vrot.slane %v3636_v17, 2  ;;  %v1080_v22 = vrot.slane %v3639_v18, 2  ;;  %v3990_v30 = vpack.i.bf16 %v1086_v16, %v1084_v6  ;;  %v1104_v48 = vsel %vm1051_vm2, %v1102_v59, %v1103_v61  ;;  %s2736_s17 = sadd.s32 240, %s3534_s11  ;;  %s2706_s11 = sshll.u32 %s5556_s27, 1 }
  0x64   : > { %5464 = vst [vmem:[#allocation21_spill] sm:$0xff] %v3974_v19  ;;  %v1106_v14 = vsel %vm1051_vm2, %v1103_v61, %v1105_v9  ;;  %v1097_v3 = vrot.slane %v3824_v54, 2  ;;  %v1098_v4 = vrot.slane %v3831_v7, 2  ;;  %v1100_v32 = vrot.slane %v3834_v10, 2  ;;  %s470_s20 = scalar_lea.vmem %s5373_s2, %s2736_s17  ;;  %s492_s15 = scalar_lea.vmem %s5379_s8, %s2706_s11 }
  0x65   : > { %2879 = vrot.lane.b32.xlu1 %v3963_v8, %s3455_s21  ;;  %5465 = vst [vmem:[#allocation22_spill] sm:$0xff] %v3990_v30  ;;  %v1079_v36 = vsel %vm1051_vm2, %v1077_v27, %v1078_v24  ;;  %v1081_v15 = vsel %vm1051_vm2, %v1078_v24, %v1080_v22  ;;  %v4001_v18 = vpack.i.bf16 %v1106_v14, %v1104_v48  ;;  %v1117_v59 = vrot.slane %v3868_v51, 2 }
  0x66   : > { %v1118_v61 = vrot.slane %v3874_v26, 2  ;;  %v1120_v9 = vrot.slane %v3877_v25, 2  ;;  %v1099_v10 = vsel %vm1051_vm2, %v1097_v3, %v1098_v4  ;;  %v1101_v6 = vsel %vm1051_vm2, %v1098_v4, %v1100_v32 }
  0x67   : > { %5466 = vst [vmem:[#allocation23_spill] sm:$0xff] %v4001_v18  ;;  %v4010_v16 = vpack.i.bf16 %v1081_v15, %v1079_v36  ;;  %v1092_v27 = vrot.slane %v3702_v23, 2  ;;  %v1093_v24 = vrot.slane %v3709_v28, 2  ;;  %v1095_v22 = vrot.slane %v3712_v29, 2 }
  0x68   : > { %2899 = vrot.lane.b32.xlu2 %v3974_v19, %s3455_s21  ;;  %v4017_v48 = vpack.i.bf16 %v1101_v6, %v1099_v10  ;;  %v1119_v14 = vsel %vm1051_vm2, %v1117_v59, %v1118_v61  ;;  %v1121_v25 = vsel %vm1051_vm2, %v1118_v61, %v1120_v9  ;;  %v1112_v3 = vrot.slane %v3886_v43, 2 }
  0x69   : > { %v1113_v4 = vrot.slane %v3895_v37, 2  ;;  %v1115_v32 = vrot.slane %v3898_v57, 2  ;;  %v1094_v36 = vsel %vm1051_vm2, %v1092_v27, %v1093_v24  ;;  %v1096_v15 = vsel %vm1051_vm2, %v1093_v24, %v1095_v22 }
  0x6a   : > { %5467 = vst [vmem:[#allocation24_spill] sm:$0xff] %v4017_v48  ;;  %v4028_v29 = vpack.i.bf16 %v1121_v25, %v1119_v14  ;;  %v4034_v9 = vpack.i.bf16 %v1096_v15, %v1094_v36  ;;  %v1107_v57 = vrot.slane %v3765_v46, 2  ;;  %v1108_v10 = vrot.slane %v3762_v45, 2 }
  0x6b   : > { %2874 = vrot.lane.b32.xlu0 %v3983_v35, %s3455_s21  ;;  %v1114_v59 = vsel %vm1051_vm2, %v1112_v3, %v1113_v4  ;;  %v1116_v61 = vsel %vm1051_vm2, %v1113_v4, %v1115_v32  ;;  %v1110_v6 = vrot.slane %v3768_v49, 2  ;;  %v1127_v24 = vrot.slane %v3935_v21, 2 }
  0x6c   : > { %5468 = vst [vmem:[#allocation25_spill] sm:$0xff] %v4028_v29  ;;  %v4041_v27 = vpack.i.bf16 %v1116_v61, %v1114_v59  ;;  %v1128_v22 = vrot.slane %v3942_v41, 2  ;;  %v1130_v14 = vrot.slane %v3945_v55, 2  ;;  %v1109_v25 = vsel %vm1051_vm2, %v1107_v57, %v1108_v10 }
  0x6d   : > { %2894 = vrot.lane.b32.xlu1 %v3990_v30, %s3455_s21  ;;  %5469 = vst [vmem:[#allocation26_spill] sm:$0xff] %v4034_v9  ;;  %v1111_v3 = vsel %vm1051_vm2, %v1108_v10, %v1110_v6  ;;  %v2943_v4 = vpack.i.bf16 %v3594_v50, %v3603_v56  ;;  %v1122_v55 = vrot.slane %v3850_v33, 2  ;;  %v1123_v15 = vrot.slane %v3847_v44, 2 }
  0x6e   : > { %5470 = vst [vmem:[#allocation27_spill] sm:$0xff] %v4041_v27  ;;  %v1129_v49 = vsel %vm1051_vm2, %v1127_v24, %v1128_v22  ;;  %v1131_v32 = vsel %vm1051_vm2, %v1128_v22, %v1130_v14  ;;  %v4056_v36 = vpack.i.bf16 %v1111_v3, %v1109_v25  ;;  %v1125_v59 = vrot.slane %v3855_v31, 2  ;;  %v540_v3 = vld [vmem:[%s3540_s14 + $0xf0] sm:$0xff] }
  0x6f   : > { %v4062_v61 = vpack.i.bf16 %v1131_v32, %v1129_v49  ;;  %v1124_v10 = vsel %vm1051_vm2, %v1122_v55, %v1123_v15  ;;  %v4072_v24 = vpack.i.bf16 %v3572_v39, %v3575_v40  ;;  %v4082_v22 = vpack.i.bf16 %v3670_v60, %v3666_v53 }
  0x70   : > { %2914 = vrot.lane.b32.xlu2 %v4001_v18, %s3455_s21  ;;  %5471 = vst [vmem:[#allocation28_spill] sm:$0xff] %v4056_v36  ;;  %v1126_v6 = vsel %vm1051_vm2, %v1123_v15, %v1125_v59  ;;  %v4088_v14 = vpack.i.bf16 %v3734_v62, %v3737_v2  ;;  %v4098_v49 = vpack.i.bf16 %v3587_v47, %v3581_v42 }
  0x71   : > { %5472 = vst [vmem:[#allocation29_spill] sm:$0xff] %v4062_v61  ;;  %v4076_v31 = vpack.i.bf16 %v1126_v6, %v1124_v10  ;;  %v4104_v32 = vpack.i.bf16 %v3677_v63, %v3686_v5  ;;  %v572_v55 = vmul.f32 %v3531_v0, %v540_v3  ;;  %v4112_v59 = vpack.i.bf16 %v3810_v13, %v3801_v38 }
  0x72   : > { %5473 = vst [vmem:[#allocation30_spill] sm:$0xff] %v4072_v24  ;;  %v4122_v3 = vpack.i.bf16 %v3636_v17, %v3628_v12  ;;  %v4191_v19 = vpack.i.bf16 %v3847_v44, %v3850_v33 }
  0x73   : > { %2889 = vrot.lane.b32.xlu0 %v4010_v16, %s3455_s21  ;;  %5474 = vst [vmem:[#allocation31_spill] sm:$0xff] %v4076_v31  ;;  %v604_v10 = vadd.f32 %v3545_v1, %v572_v55 }
  0x74   : > { %5475 = vst [vmem:[#allocation32_spill] sm:$0xff] %v4088_v14 }
  0x75   : > { %2909 = vrot.lane.b32.xlu1 %v4017_v48, %s3455_s21  ;;  %5476 = vst [vmem:[#allocation33_spill] sm:$0xff] %v4122_v3 }
  0x76   : > { %5486 = vst [vmem:[#allocation43_spill] sm:$0xff] %v4191_v19 }
  0x78   : > { %2929 = vrot.lane.b32.xlu2 %v4028_v29, %s3455_s21 }
  0x7a   : > { %v4064_v57 = vpop.permute.xlu2 %2799 }
  0x7b   : > { %2904 = vrot.lane.b32.xlu0 %v4034_v9, %s3455_s21  ;;  %v4142_v9 = vpack.i.bf16 %v3709_v28, %v3702_v23 }
  0x7d   : > { %2924 = vrot.lane.b32.xlu1 %v4041_v27, %s3455_s21  ;;  %5479 = vst [vmem:[#allocation36_spill] sm:$0xff] %v4142_v9 }
  0x80   : > { %2944 = vrot.lane.b32.xlu2 %v2943_v4, %s3456_s22  ;;  %v541_v4 = vld [vmem:[%s3540_s14 + $0xf8] sm:$0xff] }
  0x81   : > { %v573_v15 = vmul.f32 %v3531_v0, %v541_v4  ;;  %v4128_v0 = vpack.i.bf16 %v3831_v7, %v3824_v54  ;;  %v636_v4 = vmax.f32 %v604_v10, 0.0 }
  0x82   : > { %v4090_v25 = vpop.permute.xlu2 %2804 }
  0x83   : > { %2919 = vrot.lane.b32.xlu0 %v4056_v36, %s3455_s21  ;;  %v605_v6 = vadd.f32 %v3545_v1, %v573_v15  ;;  %5477 = vst [vmem:[#allocation34_spill] sm:$0xff] %v4128_v0  ;;  %v4134_v1 = vpack.i.bf16 %v3874_v26, %v3868_v51  ;;  %v743_v55 = vrot.slane %v636_v4, 7 }
  0x85   : > { %2939 = vrot.lane.b32.xlu1 %v4062_v61, %s3455_s21  ;;  %v637_v27 = vmax.f32 %v605_v6, 0.0  ;;  %5478 = vst [vmem:[#allocation35_spill] sm:$0xff] %v4134_v1  ;;  %v4152_v6 = vpack.i.bf16 %v3895_v37, %v3886_v43 }
  0x87   : > { %v4138_v15 = vrot.slane %v637_v27, 7  ;;  %5480 = vst [vmem:[#allocation37_spill] sm:$0xff] %v4152_v6  ;;  %v4159_v27 = vsel %vm694_vm0, 0.0, %v743_v55 }
  0x88   : > { %2959 = vrot.lane.b32.xlu2 %v4072_v24, %s3456_s22 }
  0x89   : > { %v4156_v4 = vsel %vm694_vm0, %v743_v55, %v4138_v15  ;;  %v4177_v55 = vpack.i.bf16 %v3942_v41, %v3935_v21 }
  0x8a   : > { %5481 = vst [vmem:[#allocation38_spill] sm:$0xff] %v4156_v4 }
  0x8b   : > { %2934 = vrot.lane.b32.xlu0 %v4076_v31, %s3455_s21  ;;  %5484 = vst [vmem:[#allocation41_spill] sm:$0xff] %v4177_v55 }
  0x8d   : > { %2954 = vrot.lane.b32.xlu1 %v4082_v22, %s3456_s22 }
  0x8f   : > { %v4118_v61 = vpop.permute.xlu2 %2819 }
  0x90   : > { %2974 = vrot.lane.b32.xlu2 %v4088_v14, %s3456_s22 }
  0x93   : > { %2949 = vrot.lane.b32.xlu0 %v4098_v49, %s3456_s22 }
  0x94   : > { %v4144_v36 = vpop.permute.xlu1 %2789 }
  0x95   : > { %2969 = vrot.lane.b32.xlu1 %v4104_v32, %s3456_s22 }
  0x98   : > { %2989 = vrot.lane.b32.xlu2 %v4112_v59, %s3456_s22 }
  0x9b   : > { %2964 = vrot.lane.b32.xlu0 %v4122_v3, %s3456_s22  ;;  %v4148_v10 = vpop.permute.xlu2 %2839  ;;  %v4171_v3 = vpack.i.bf16 %v3762_v45, %v3765_v46 }
  0x9d   : > { %2984 = vrot.lane.b32.xlu1 %v4128_v0, %s3456_s22  ;;  %v2785_v0 = vpop.permute.xlu0 %2784  ;;  %5483 = vst [vmem:[#allocation40_spill] sm:$0xff] %v4171_v3 }
  0x9e   : > { %v2786_v29 = vunpack.i.l.bf16 %v2785_v0 }
  0xa0   : > { %3004 = vrot.lane.b32.xlu2 %v4134_v1, %s3456_s22  ;;  %v4165_v1 = vpack.i.bf16 %v4156_v4, %v4159_v27  ;;  %v1831_v30 = vsel %vm1828_vm3, %v3603_v56, %v2786_v29  ;;  %v5492_v56 = vld [vmem:[#allocation4_spill] sm:$0xff] }
  0xa2   : > { %5482 = vst [vmem:[#allocation39_spill] sm:$0xff] %v4165_v1 }
  0xa3   : > { %2979 = vrot.lane.b32.xlu0 %v4142_v9, %s3456_s22  ;;  %v4179_v9 = vpop.permute.xlu1 %2794 }
  0xa5   : > { %2999 = vrot.lane.b32.xlu1 %v4152_v6, %s3456_s22  ;;  %v4187_v6 = vpop.permute.xlu0 %2809 }
  0xa8   : > { %3019 = vrot.lane.b32.xlu2 %v4165_v1, %s3456_s22  ;;  %v2787_v1 = vunpack.i.h.bf16 %v2785_v0  ;;  %v5488_v0 = vld [vmem:[#allocation3_spill] sm:$0xff] }
  0xaa   : > { %v4181_v31 = vpop.permute.xlu2 %2854  ;;  %v1832_v18 = vsel %vm1828_vm3, %v3594_v50, %v2787_v1 }
  0xab   : > { %5485 = vst [vmem:[#allocation42_spill] sm:$0xff] %v4181_v31  ;;  %2994 = vrot.lane.b32.xlu0 %v4171_v3, %s3456_s22 }
  0xad   : > { %3014 = vrot.lane.b32.xlu1 %v4177_v55, %s3456_s22  ;;  %v2815_v3 = vpop.permute.xlu1 %2814 }
  0xb0   : > { %3034 = vrot.lane.b32.xlu2 %v5487_v11, %s3457_s23  ;;  %v5491_v11 = vld [vmem:[#allocation7_spill] sm:$0xff] }
  0xb2   : > { %v2870_v24 = vpop.permute.xlu2 %2869 }
  0xb3   : > { %3009 = vrot.lane.b32.xlu0 %v4191_v19, %s3456_s22  ;;  %v2872_v55 = vunpack.i.h.bf16 %v2870_v24  ;;  %v2871_v14 = vunpack.i.l.bf16 %v2870_v24  ;;  %v2802_v19 = vunpack.i.h.bf16 %v4064_v57  ;;  %v2801_v24 = vunpack.i.l.bf16 %v4064_v57 }
  0xb4   : > { %v2825_v48 = vpop.permute.xlu0 %2824 }
  0xb5   : > { %3029 = vrot.lane.b32.xlu1 %v5488_v0, %s3457_s23  ;;  %v4204_v33 = vsel %vm1861_vm4, %v1831_v30, %v2871_v14  ;;  %v4207_v44 = vsel %vm1861_vm4, %v1832_v18, %v2872_v55  ;;  %v1838_v30 = vsel %vm1828_vm3, %v3572_v39, %v2802_v19  ;;  %v1837_v18 = vsel %vm1828_vm3, %v3575_v40, %v2801_v24  ;;  %v5493_v14 = vld [vmem:[#allocation5_spill] sm:$0xff]  ;;  %v5496_v40 = vld [vmem:[#allocation2_spill] sm:$0xff] }
  0xb6   : > { %5489 = vst [vmem:[#allocation3_spill] sm:$0xff] %v4204_v33  ;;  %v2817_v33 = vunpack.i.h.bf16 %v2815_v3 }
  0xb7   : > { %5490 = vst [vmem:[#allocation44_spill] sm:$0xff] %v4207_v44 }
  0xb8   : > { %3049 = vrot.lane.b32.xlu2 %v5491_v11, %s3457_s23 }
  0xba   : > { %v2885_v50 = vpop.permute.xlu2 %2884  ;;  %v2835_v55 = vpop.permute.xlu1 %2834 }
  0xbb   : > { %3024 = vrot.lane.b32.xlu0 %v5492_v56, %s3457_s23  ;;  %v2887_v29 = vunpack.i.h.bf16 %v2885_v50  ;;  %v2886_v1 = vunpack.i.l.bf16 %v2885_v50  ;;  %v2816_v56 = vunpack.i.l.bf16 %v2815_v3  ;;  %v5495_v50 = vld [vmem:[#allocation16_spill] sm:$0xff] }
  0xbd   : > { %3044 = vrot.lane.b32.xlu1 %v5493_v14, %s3457_s23  ;;  %v4222_v57 = vsel %vm1861_vm4, %v1838_v30, %v2887_v29  ;;  %v4225_v44 = vsel %vm1861_vm4, %v1837_v18, %v2886_v1  ;;  %v1844_v29 = vsel %vm1828_vm3, %v3734_v62, %v2817_v33  ;;  %v1843_v1 = vsel %vm1828_vm3, %v3737_v2, %v2816_v56  ;;  %v5497_v30 = vld [vmem:[#allocation8_spill] sm:$0xff]  ;;  %v5500_v62 = vld [vmem:[#allocation9_spill] sm:$0xff] }
  0xbe   : > { %5494 = vst [vmem:[#allocation7_spill] sm:$0xff] %v4225_v44  ;;  %v2837_v14 = vunpack.i.h.bf16 %v2835_v55 }
  0xbf   : > { %v4229_v31 = vpop.permute.xlu0 %2829 }
  0xc0   : > { %3064 = vrot.lane.b32.xlu2 %v5495_v50, %s3457_s23 }
  0xc2   : > { %v2900_v39 = vpop.permute.xlu2 %2899 }
  0xc3   : > { %3039 = vrot.lane.b32.xlu0 %v5496_v40, %s3457_s23  ;;  %v2902_v19 = vunpack.i.h.bf16 %v2900_v39  ;;  %v2901_v24 = vunpack.i.l.bf16 %v2900_v39  ;;  %v2836_v40 = vunpack.i.l.bf16 %v2835_v55  ;;  %v5501_v55 = vld [vmem:[#allocation12_spill] sm:$0xff] }
  0xc5   : > { %3059 = vrot.lane.b32.xlu1 %v5497_v30, %s3457_s23  ;;  %v4240_v3 = vsel %vm1861_vm4, %v1844_v29, %v2902_v19  ;;  %v4243_v18 = vsel %vm1861_vm4, %v1843_v1, %v2901_v24  ;;  %v1850_v19 = vsel %vm1828_vm3, %v3810_v13, %v2837_v14  ;;  %v1849_v24 = vsel %vm1828_vm3, %v3801_v38, %v2836_v40  ;;  %v5502_v38 = vld [vmem:[#allocation11_spill] sm:$0xff] }
  0xc6   : > { %5498 = vst [vmem:[#allocation4_spill] sm:$0xff] %v4240_v3  ;;  %v2827_v29 = vunpack.i.h.bf16 %v2825_v48  ;;  %v2826_v1 = vunpack.i.l.bf16 %v2825_v48  ;;  %v5503_v48 = vld [vmem:[#allocation10_spill] sm:$0xff] }
  0xc7   : > { %5499 = vst [vmem:[#allocation45_spill] sm:$0xff] %v4243_v18  ;;  %v2850_v50 = vpop.permute.xlu1 %2849 }
  0xc8   : > { %3079 = vrot.lane.b32.xlu2 %v3917_v20, %s3457_s23  ;;  %v2852_v3 = vunpack.i.h.bf16 %v2850_v50  ;;  %v1830_v13 = vsel %vm1828_vm3, %v5502_v38, %v2827_v29  ;;  %v1829_v14 = vsel %vm1828_vm3, %v5503_v48, %v2826_v1  ;;  %v2796_v1 = vunpack.i.l.bf16 %v4179_v9 }
  0xc9   : > { %v4291_v48 = vsel %vm694_vm0, %v4138_v15, 0.0 }
  0xca   : > { %v2915_v39 = vpop.permute.xlu2 %2914  ;;  %5506 = vst [vmem:[#allocation12_spill] sm:$0xff] %v4291_v48  ;;  %v1835_v15 = vsel %vm1828_vm3, %v3666_v53, %v2796_v1  ;;  %v2812_v53 = vunpack.i.h.bf16 %v4187_v6  ;;  %v2811_v1 = vunpack.i.l.bf16 %v4187_v6 }
  0xcb   : > { %3054 = vrot.lane.b32.xlu0 %v5500_v62, %s3457_s23  ;;  %v4249_v2 = vpop.permute.xlu0 %2844  ;;  %v2917_v33 = vunpack.i.h.bf16 %v2915_v39  ;;  %v2916_v56 = vunpack.i.l.bf16 %v2915_v39  ;;  %v2851_v39 = vunpack.i.l.bf16 %v2850_v50 }
  0xcd   : > { %3074 = vrot.lane.b32.xlu1 %v5501_v55, %s3457_s23  ;;  %v4258_v20 = vsel %vm1861_vm4, %v1850_v19, %v2917_v33  ;;  %v4261_v30 = vsel %vm1861_vm4, %v1849_v24, %v2916_v56  ;;  %v5504_v19 = vld [vmem:[#allocation13_spill] sm:$0xff]  ;;  %v1855_v29 = vsel %vm1828_vm3, %v3868_v51, %v2851_v39  ;;  %v1326_v51 = vrot.slane %v4159_v27, 1 }
  0xce   : > { %v1327_v39 = vrot.slane %v4156_v4, 1 }
  0xcf   : > { %v2865_v18 = vpop.permute.xlu1 %2864 }
  0xd0   : > { %v2867_v62 = vunpack.i.h.bf16 %v2865_v18  ;;  %v2866_v44 = vunpack.i.l.bf16 %v2865_v18  ;;  %3094 = vrot.lane.b32.xlu2 %v3961_v52, %s3457_s23  ;;  %v2797_v18 = vunpack.i.h.bf16 %v4179_v9  ;;  %v1856_v52 = vsel %vm1828_vm3, %v3874_v26, %v2852_v3 }
  0xd2   : > { %v1862_v40 = vsel %vm1861_vm4, %v1829_v14, %v2866_v44  ;;  %v1863_v33 = vsel %vm1861_vm4, %v1830_v13, %v2867_v62  ;;  %v2930_v56 = vpop.permute.xlu2 %2929  ;;  %v5505_v44 = vld [vmem:[#allocation17_spill] sm:$0xff]  ;;  %v1836_v14 = vsel %vm1828_vm3, %v3670_v60, %v2797_v18  ;;  %v1328_v60 = vsel %vm874_vm1, %v1326_v51, %v1327_v39 }
  0xd3   : > { %3069 = vrot.lane.b32.xlu0 %v5504_v19, %s3457_s23  ;;  %v2932_v50 = vunpack.i.h.bf16 %v2930_v56  ;;  %v2931_v24 = vunpack.i.l.bf16 %v2930_v56 }
  0xd5   : > { %v4279_v38 = vpop.permute.xlu0 %2859  ;;  %3089 = vrot.lane.b32.xlu1 %v5505_v44, %s3457_s23  ;;  %v4284_v62 = vsel %vm1861_vm4, %v1856_v52, %v2932_v50  ;;  %v4287_v13 = vsel %vm1861_vm4, %v1855_v29, %v2931_v24  ;;  %v1329_v52 = vrot.slane %v4291_v48, 1  ;;  %v2792_v29 = vunpack.i.h.bf16 %v4144_v36 }
  0xd7   : > { %v2880_v26 = vpop.permute.xlu1 %2879  ;;  %v1330_v18 = vsel %vm874_vm1, %v1327_v39, %v1329_v52  ;;  %v1834_v51 = vsel %vm1828_vm3, %v3587_v47, %v2792_v29  ;;  %v1842_v47 = vsel %vm1828_vm3, %v3677_v63, %v2812_v53  ;;  %v2831_v63 = vunpack.i.l.bf16 %v4229_v31 }
  0xd8   : > { %v2882_v3 = vunpack.i.h.bf16 %v2880_v26  ;;  %v2881_v9 = vunpack.i.l.bf16 %v2880_v26  ;;  %3109 = vrot.lane.b32.xlu2 %v3983_v35, %s3458_s24  ;;  %v2791_v26 = vunpack.i.l.bf16 %v4144_v36  ;;  %v4324_v52 = vpack.i.bf16 %v1330_v18, %v1328_v60 }
  0xd9   : > { %v2806_v60 = vunpack.i.l.bf16 %v4090_v25 }
  0xda   : > { %v1868_v56 = vsel %vm1861_vm4, %v1835_v15, %v2881_v9  ;;  %v1869_v50 = vsel %vm1861_vm4, %v1836_v14, %v2882_v3  ;;  %v2945_v24 = vpop.permute.xlu2 %2944  ;;  %v1833_v39 = vsel %vm1828_vm3, %v3581_v42, %v2791_v26  ;;  %v1841_v42 = vsel %vm1828_vm3, %v3686_v5, %v2811_v1 }
  0xdb   : > { %3084 = vrot.lane.b32.xlu0 %v3901_v34, %s3457_s23  ;;  %v2947_v48 = vunpack.i.h.bf16 %v2945_v24  ;;  %v2946_v4 = vunpack.i.l.bf16 %v2945_v24  ;;  %v2807_v26 = vunpack.i.h.bf16 %v4090_v25 }
  0xdd   : > { %v2875_v3 = vpop.permute.xlu0 %2874  ;;  %3104 = vrot.lane.b32.xlu1 %v3914_v58, %s3458_s24  ;;  %v4315_v9 = vsel %vm1894_vm5, %v1862_v40, %v2946_v4  ;;  %v4318_v36 = vsel %vm1894_vm5, %v1863_v33, %v2947_v48 }
  0xde   : > { %v2877_v14 = vunpack.i.h.bf16 %v2875_v3  ;;  %v2876_v15 = vunpack.i.l.bf16 %v2875_v3  ;;  %v2832_v3 = vunpack.i.h.bf16 %v4229_v31 }
  0xdf   : > { %v2895_v6 = vpop.permute.xlu1 %2894 }
  0xe0   : > { %v4327_v24 = vsel %vm1861_vm4, %v1834_v51, %v2877_v14  ;;  %v4330_v58 = vsel %vm1861_vm4, %v1833_v39, %v2876_v15  ;;  %v2897_v4 = vunpack.i.h.bf16 %v2895_v6  ;;  %v2896_v40 = vunpack.i.l.bf16 %v2895_v6  ;;  %3124 = vrot.lane.b32.xlu2 %v3983_v35, %s3459_s25 }
  0xe1   : > { %v1840_v15 = vsel %vm1828_vm3, %v3636_v17, %v2807_v26  ;;  %v1839_v51 = vsel %vm1828_vm3, %v3628_v12, %v2806_v60  ;;  %v1847_v17 = vsel %vm1828_vm3, %v3824_v54, %v2831_v63  ;;  %v2847_v26 = vunpack.i.h.bf16 %v4249_v2 }
  0xe2   : > { %v1874_v33 = vsel %vm1861_vm4, %v1841_v42, %v2896_v40  ;;  %v1875_v48 = vsel %vm1861_vm4, %v1842_v47, %v2897_v4  ;;  %v2960_v29 = vpop.permute.xlu2 %2959  ;;  %v2822_v47 = vunpack.i.h.bf16 %v4118_v61  ;;  %v2821_v42 = vunpack.i.l.bf16 %v4118_v61 }
  0xe3   : > { %3099 = vrot.lane.b32.xlu0 %v4324_v52, %s3457_s23  ;;  %v2962_v18 = vunpack.i.h.bf16 %v2960_v29  ;;  %v2961_v35 = vunpack.i.l.bf16 %v2960_v29 }
  0xe5   : > { %v2890_v53 = vpop.permute.xlu0 %2889  ;;  %3119 = vrot.lane.b32.xlu1 %v5488_v0, %s3460_s26  ;;  %v4349_v5 = vsel %vm1894_vm5, %v1869_v50, %v2962_v18  ;;  %v4352_v1 = vsel %vm1894_vm5, %v1868_v56, %v2961_v35  ;;  %v1848_v56 = vsel %vm1828_vm3, %v3831_v7, %v2832_v3  ;;  %v2846_v7 = vunpack.i.l.bf16 %v4249_v2 }
  0xe6   : > { %v2892_v25 = vunpack.i.h.bf16 %v2890_v53  ;;  %v2891_v14 = vunpack.i.l.bf16 %v2890_v53  ;;  %v1845_v3 = vsel %vm1828_vm3, %v3702_v23, %v2821_v42 }
  0xe7   : > { %v2910_v31 = vpop.permute.xlu1 %2909 }
  0xe8   : > { %v4359_v39 = vsel %vm1861_vm4, %v1840_v15, %v2892_v25  ;;  %v4362_v0 = vsel %vm1861_vm4, %v1839_v51, %v2891_v14  ;;  %v2912_v50 = vunpack.i.h.bf16 %v2910_v31  ;;  %v2911_v6 = vunpack.i.l.bf16 %v2910_v31  ;;  %3139 = vrot.lane.b32.xlu2 %v4104_v32, %s3461_s9 }
  0xe9   : > { %v2842_v15 = vunpack.i.h.bf16 %v4148_v10  ;;  %v2841_v51 = vunpack.i.l.bf16 %v4148_v10 }
  0xea   : > { %v1880_v12 = vsel %vm1861_vm4, %v1847_v17, %v2911_v6  ;;  %v1881_v4 = vsel %vm1861_vm4, %v1848_v56, %v2912_v50  ;;  %v2975_v40 = vpop.permute.xlu2 %2974  ;;  %v2862_v6 = vunpack.i.h.bf16 %v4279_v38 }
  0xeb   : > { %3114 = vrot.lane.b32.xlu0 %v4098_v49, %s3461_s9  ;;  %v2977_v29 = vunpack.i.h.bf16 %v2975_v40  ;;  %v2976_v32 = vunpack.i.l.bf16 %v2975_v40  ;;  %v1846_v49 = vsel %vm1828_vm3, %v3709_v28, %v2822_v47  ;;  %v1853_v28 = vsel %vm1828_vm3, %v3886_v43, %v2846_v7 }
  0xec   : > { %v1852_v47 = vsel %vm1828_vm3, %v3762_v45, %v2842_v15  ;;  %v1851_v42 = vsel %vm1828_vm3, %v3765_v46, %v2841_v51  ;;  %v5511_v15 = vld [vmem:[#allocation15_spill] sm:$0xff] }
  0xed   : > { %v2905_v60 = vpop.permute.xlu0 %2904  ;;  %3134 = vrot.lane.b32.xlu1 %v4082_v22, %s3461_s9  ;;  %v4381_v54 = vsel %vm1894_vm5, %v1874_v33, %v2976_v32  ;;  %v4384_v18 = vsel %vm1894_vm5, %v1875_v48, %v2977_v29  ;;  %v1854_v48 = vsel %vm1828_vm3, %v3895_v37, %v2847_v26  ;;  %v2861_v37 = vunpack.i.l.bf16 %v4279_v38 }
  0xee   : > { %v2907_v61 = vunpack.i.h.bf16 %v2905_v60  ;;  %v2906_v35 = vunpack.i.l.bf16 %v2905_v60  ;;  %v5507_v60 = vld [vmem:[#allocation42_spill] sm:$0xff] }
  0xef   : > { %v2925_v63 = vpop.permute.xlu1 %2924  ;;  %v1859_v45 = vsel %vm1828_vm3, %v3935_v21, %v2861_v37 }
  0xf0   : > { %v4391_v2 = vsel %vm1861_vm4, %v1846_v49, %v2907_v61  ;;  %v4394_v22 = vsel %vm1861_vm4, %v1845_v3, %v2906_v35  ;;  %v2927_v33 = vunpack.i.h.bf16 %v2925_v63  ;;  %v2926_v53 = vunpack.i.l.bf16 %v2925_v63  ;;  %3154 = vrot.lane.b32.xlu2 %v3963_v8, %s3459_s25  ;;  %v5508_v49 = vld [vmem:[#allocation6_spill] sm:$0xff] }
  0xf1   : > { %v2857_v61 = vunpack.i.h.bf16 %v5507_v60  ;;  %v2856_v35 = vunpack.i.l.bf16 %v5507_v60  ;;  %v5515_v60 = vld [vmem:[#allocation44_spill] sm:$0xff] }
  0xf2   : > { %v1886_v23 = vsel %vm1861_vm4, %v1853_v28, %v2926_v53  ;;  %v1887_v25 = vsel %vm1861_vm4, %v1854_v48, %v2927_v33  ;;  %v2990_v14 = vpop.permute.xlu2 %2989  ;;  %v5510_v28 = vld [vmem:[#allocation14_spill] sm:$0xff] }
  0xf3   : > { %3129 = vrot.lane.b32.xlu0 %v4010_v16, %s3458_s24  ;;  %v2992_v31 = vunpack.i.h.bf16 %v2990_v14  ;;  %v2991_v50 = vunpack.i.l.bf16 %v2990_v14  ;;  %v1858_v14 = vsel %vm1828_vm3, %v5510_v28, %v2857_v61  ;;  %v1857_v51 = vsel %vm1828_vm3, %v5511_v15, %v2856_v35  ;;  %v5517_v28 = vld [vmem:[#allocation30_spill] sm:$0xff] }
  0xf5   : > { %v2920_v56 = vpop.permute.xlu0 %2919  ;;  %3149 = vrot.lane.b32.xlu1 %v5491_v11, %s3460_s26  ;;  %v4413_v43 = vsel %vm1894_vm5, %v1880_v12, %v2991_v50  ;;  %v4416_v17 = vsel %vm1894_vm5, %v1881_v4, %v2992_v31  ;;  %v1860_v4 = vsel %vm1828_vm3, %v3942_v41, %v2862_v6  ;;  %v5509_v41 = vld [vmem:[#allocation24_spill] sm:$0xff] }
  0xf6   : > { %v2922_v10 = vunpack.i.h.bf16 %v2920_v56  ;;  %v2921_v40 = vunpack.i.l.bf16 %v2920_v56 }
  0xf7   : > { %v2940_v29 = vpop.permute.xlu1 %2939 }
  0xf8   : > { %v4423_v38 = vsel %vm1861_vm4, %v1852_v47, %v2922_v10  ;;  %v4426_v11 = vsel %vm1861_vm4, %v1851_v42, %v2921_v40  ;;  %v2942_v12 = vunpack.i.h.bf16 %v2940_v29  ;;  %v2941_v32 = vunpack.i.l.bf16 %v2940_v29  ;;  %3169 = vrot.lane.b32.xlu2 %v4112_v59, %s3461_s9  ;;  %v5512_v40 = vld [vmem:[#allocation22_spill] sm:$0xff] }
  0xfa   : > { %v1892_v46 = vsel %vm1861_vm4, %v1859_v45, %v2941_v32  ;;  %v1893_v26 = vsel %vm1861_vm4, %v1860_v4, %v2942_v12  ;;  %v3005_v7 = vpop.permute.xlu2 %3004  ;;  %v5513_v12 = vld [vmem:[#allocation23_spill] sm:$0xff] }
  0xfb   : > { %3144 = vrot.lane.b32.xlu0 %v5508_v49, %s3460_s26  ;;  %v3007_v3 = vunpack.i.h.bf16 %v3005_v7  ;;  %v3006_v59 = vunpack.i.l.bf16 %v3005_v7 }
  0xfd   : > { %v2935_v63 = vpop.permute.xlu0 %2934  ;;  %3164 = vrot.lane.b32.xlu1 %v5509_v41, %s3458_s24  ;;  %v4443_v21 = vsel %vm1894_vm5, %v1886_v23, %v3006_v59  ;;  %v4446_v33 = vsel %vm1894_vm5, %v1887_v25, %v3007_v3  ;;  %v5516_v3 = vld [vmem:[#allocation32_spill] sm:$0xff] }
  0xfe   : > { %v2937_v53 = vunpack.i.h.bf16 %v2935_v63  ;;  %v2936_v48 = vunpack.i.l.bf16 %v2935_v63 }
  0xff   : > { %v2955_v31 = vpop.permute.xlu1 %2954 }
 0x100   : > { %v4453_v50 = vsel %vm1861_vm4, %v1858_v14, %v2937_v53  ;;  %v4456_v6 = vsel %vm1861_vm4, %v1857_v51, %v2936_v48  ;;  %v2957_v23 = vunpack.i.h.bf16 %v2955_v31  ;;  %v2956_v37 = vunpack.i.l.bf16 %v2955_v31  ;;  %3184 = vrot.lane.b32.xlu2 %v3963_v8, %s3458_s24 }
 0x102   : > { %v1899_v25 = vsel %vm1894_vm5, %v4330_v58, %v2956_v37  ;;  %v1900_v56 = vsel %vm1894_vm5, %v4327_v24, %v2957_v23  ;;  %v3020_v10 = vpop.permute.xlu2 %3019  ;;  %v5514_v24 = vld [vmem:[#allocation3_spill] sm:$0xff] }
 0x103   : > { %3159 = vrot.lane.b32.xlu0 %v5512_v40, %s3459_s25  ;;  %v3022_v47 = vunpack.i.h.bf16 %v3020_v10  ;;  %v3021_v42 = vunpack.i.l.bf16 %v3020_v10 }
 0x105   : > { %v2950_v29 = vpop.permute.xlu0 %2949  ;;  %3179 = vrot.lane.b32.xlu1 %v5513_v12, %s3459_s25  ;;  %v4469_v32 = vsel %vm1894_vm5, %v1892_v46, %v3021_v42  ;;  %v4472_v8 = vsel %vm1894_vm5, %v1893_v26, %v3022_v47  ;;  %v5519_v47 = vld [vmem:[#allocation19_spill] sm:$0xff] }
 0x106   : > { %v2952_v58 = vunpack.i.h.bf16 %v2950_v29  ;;  %v2951_v4 = vunpack.i.l.bf16 %v2950_v29 }
 0x107   : > { %v2970_v45 = vpop.permute.xlu1 %2969 }
 0x108   : > { %v4476_v7 = vsel %vm1894_vm5, %v5514_v24, %v2951_v4  ;;  %v4480_v61 = vsel %vm1894_vm5, %v5515_v60, %v2952_v58  ;;  %v2972_v35 = vunpack.i.h.bf16 %v2970_v45  ;;  %v2971_v49 = vunpack.i.l.bf16 %v2970_v45  ;;  %3199 = vrot.lane.b32.xlu2 %v5516_v3, %s3461_s9  ;;  %v5520_v4 = vld [vmem:[#allocation9_spill] sm:$0xff] }
 0x10a   : > { %v1905_v46 = vsel %vm1894_vm5, %v4362_v0, %v2971_v49  ;;  %v1906_v26 = vsel %vm1894_vm5, %v4359_v39, %v2972_v35  ;;  %v3035_v59 = vpop.permute.xlu2 %3034  ;;  %v5521_v35 = vld [vmem:[#allocation4_spill] sm:$0xff] }
 0x10b   : > { %3174 = vrot.lane.b32.xlu0 %v5504_v19, %s3460_s26  ;;  %v3037_v63 = vunpack.i.h.bf16 %v3035_v59  ;;  %v3036_v53 = vunpack.i.l.bf16 %v3035_v59  ;;  %v5518_v19 = vld [vmem:[#allocation7_spill] sm:$0xff] }
 0x10d   : > { %v2965_v48 = vpop.permute.xlu0 %2964  ;;  %3194 = vrot.lane.b32.xlu1 %v5517_v28, %s3461_s9  ;;  %v4493_v14 = vsel %vm1927_vm6, %v1899_v25, %v3036_v53  ;;  %v4496_v15 = vsel %vm1927_vm6, %v1900_v56, %v3037_v63  ;;  %v5523_v53 = vld [vmem:[#allocation25_spill] sm:$0xff]  ;;  %v5524_v28 = vld [vmem:[#allocation2_spill] sm:$0xff] }
 0x10e   : > { %v2967_v0 = vunpack.i.h.bf16 %v2965_v48  ;;  %v2966_v51 = vunpack.i.l.bf16 %v2965_v48 }
 0x10f   : > { %v2985_v39 = vpop.permute.xlu1 %2984 }
 0x110   : > { %v4500_v31 = vsel %vm1894_vm5, %v4222_v57, %v2967_v0  ;;  %v4504_v23 = vsel %vm1894_vm5, %v5518_v19, %v2966_v51  ;;  %v2987_v37 = vunpack.i.h.bf16 %v2985_v39  ;;  %v2986_v10 = vunpack.i.l.bf16 %v2985_v39  ;;  %3214 = vrot.lane.b32.xlu2 %v5519_v47, %s3459_s25 }
 0x112   : > { %v4510_v25 = vsel %vm1894_vm5, %v4394_v22, %v2986_v10  ;;  %v4514_v56 = vsel %vm1894_vm5, %v4391_v2, %v2987_v37  ;;  %v3050_v42 = vpop.permute.xlu2 %3049 }
 0x113   : > { %3189 = vrot.lane.b32.xlu0 %v5512_v40, %s3458_s24  ;;  %v3052_v57 = vunpack.i.h.bf16 %v3050_v42  ;;  %v3051_v29 = vunpack.i.l.bf16 %v3050_v42  ;;  %v5522_v40 = vld [vmem:[#allocation45_spill] sm:$0xff] }
 0x115   : > { %v2980_v58 = vpop.permute.xlu0 %2979  ;;  %3209 = vrot.lane.b32.xlu1 %v5520_v4, %s3460_s26  ;;  %v4521_v45 = vsel %vm1927_vm6, %v1905_v46, %v3051_v29  ;;  %v4524_v22 = vsel %vm1927_vm6, %v1906_v26, %v3052_v57  ;;  %v5525_v29 = vld [vmem:[#allocation21_spill] sm:$0xff] }
 0x116   : > { %v2982_v24 = vunpack.i.h.bf16 %v2980_v58  ;;  %v2981_v60 = vunpack.i.l.bf16 %v2980_v58 }
 0x117   : > { %v3000_v2 = vpop.permute.xlu1 %2999 }
 0x118   : > { %v4528_v49 = vsel %vm1894_vm5, %v5521_v35, %v2982_v24  ;;  %v4532_v3 = vsel %vm1894_vm5, %v5522_v40, %v2981_v60  ;;  %v3002_v59 = vunpack.i.h.bf16 %v3000_v2  ;;  %v3001_v63 = vunpack.i.l.bf16 %v3000_v2  ;;  %3229 = vrot.lane.b32.xlu2 %v5523_v53, %s3458_s24 }
 0x11a   : > { %v1917_v46 = vsel %vm1894_vm5, %v4426_v11, %v3001_v63  ;;  %v1918_v26 = vsel %vm1894_vm5, %v4423_v38, %v3002_v59  ;;  %v4540_v48 = vpop.permute.xlu2 %3064  ;;  %v5527_v63 = vld [vmem:[#allocation31_spill] sm:$0xff] }
 0x11b   : > { %3204 = vrot.lane.b32.xlu0 %v5524_v28, %s3460_s26 }
 0x11d   : > { %v2995_v0 = vpop.permute.xlu0 %2994  ;;  %3224 = vrot.lane.b32.xlu1 %v5513_v12, %s3458_s24 }
 0x11e   : > { %v2997_v51 = vunpack.i.h.bf16 %v2995_v0  ;;  %v2996_v39 = vunpack.i.l.bf16 %v2995_v0 }
 0x11f   : > { %v3015_v19 = vpop.permute.xlu1 %3014 }
 0x120   : > { %v4548_v37 = vsel %vm1894_vm5, %v4258_v20, %v2997_v51  ;;  %v4552_v11 = vsel %vm1894_vm5, %v4261_v30, %v2996_v39  ;;  %v3017_v38 = vunpack.i.h.bf16 %v3015_v19  ;;  %v3016_v10 = vunpack.i.l.bf16 %v3015_v19  ;;  %3244 = vrot.lane.b32.xlu2 %v5501_v55, %s3460_s26  ;;  %v5526_v30 = vld [vmem:[#allocation43_spill] sm:$0xff]  ;;  %v5529_v39 = vld [vmem:[#allocation28_spill] sm:$0xff] }
 0x122   : > { %v1923_v42 = vsel %vm1894_vm5, %v4456_v6, %v3016_v10  ;;  %v1924_v12 = vsel %vm1894_vm5, %v4453_v50, %v3017_v38  ;;  %v3080_v57 = vpop.permute.xlu2 %3079 }
 0x123   : > { %3219 = vrot.lane.b32.xlu0 %v5525_v29, %s3459_s25  ;;  %v3082_v20 = vunpack.i.h.bf16 %v3080_v57  ;;  %v3081_v58 = vunpack.i.l.bf16 %v3080_v57  ;;  %v5530_v57 = vld [vmem:[#allocation33_spill] sm:$0xff] }
 0x125   : > { %v3010_v4 = vpop.permute.xlu0 %3009  ;;  %3239 = vrot.lane.b32.xlu1 %v5526_v30, %s3461_s9  ;;  %v4565_v24 = vsel %vm1927_vm6, %v1917_v46, %v3081_v58  ;;  %v4568_v55 = vsel %vm1927_vm6, %v1918_v26, %v3082_v20 }
 0x126   : > { %v3012_v6 = vunpack.i.h.bf16 %v3010_v4  ;;  %v3011_v60 = vunpack.i.l.bf16 %v3010_v4 }
 0x127   : > { %v3030_v2 = vpop.permute.xlu1 %3029 }
 0x128   : > { %v4572_v50 = vsel %vm1894_vm5, %v4284_v62, %v3012_v6  ;;  %v4576_v35 = vsel %vm1894_vm5, %v4287_v13, %v3011_v60  ;;  %v3032_v40 = vunpack.i.h.bf16 %v3030_v2  ;;  %v3031_v59 = vunpack.i.l.bf16 %v3030_v2  ;;  %3259 = vrot.lane.b32.xlu2 %v5527_v63, %s3459_s25  ;;  %v5528_v62 = vld [vmem:[#allocation40_spill] sm:$0xff] }
 0x12a   : > { %v4582_v46 = vsel %vm1927_vm6, %v4476_v7, %v3031_v59  ;;  %v4586_v26 = vsel %vm1927_vm6, %v4480_v61, %v3032_v40  ;;  %v3095_v28 = vpop.permute.xlu2 %3094 }
 0x12b   : > { %3234 = vrot.lane.b32.xlu0 %v5528_v62, %s3461_s9  ;;  %v3097_v0 = vunpack.i.h.bf16 %v3095_v28  ;;  %v3096_v13 = vunpack.i.l.bf16 %v3095_v28  ;;  %v5531_v28 = vld [vmem:[#allocation8_spill] sm:$0xff] }
 0x12d   : > { %v4590_v51 = vpop.permute.xlu0 %3024  ;;  %3254 = vrot.lane.b32.xlu1 %v5529_v39, %s3459_s25  ;;  %v4595_v19 = vsel %vm1927_vm6, %v1923_v42, %v3096_v13  ;;  %v4598_v7 = vsel %vm1927_vm6, %v1924_v12, %v3097_v0  ;;  %v841_v42 = vld [vmem:[%s5376_s5 + $0x10] sm:$0x3] }
 0x12e   : > { %v2121_v30 = vunpack.c.l.b16 %v841_v42 }
 0x12f   : > { %v3045_v38 = vpop.permute.xlu1 %3044 }
 0x130   : > { %v3047_v61 = vunpack.i.h.bf16 %v3045_v38  ;;  %v3046_v10 = vunpack.i.l.bf16 %v3045_v38  ;;  %3274 = vrot.lane.b32.xlu2 %v5530_v57, %s3461_s9  ;;  %v2124_v2 = vpack.c.b16 %v2121_v30, %v2121_v30 }
 0x132   : > { %v4604_v20 = vsel %vm1927_vm6, %v4504_v23, %v3046_v10  ;;  %v4608_v58 = vsel %vm1927_vm6, %v4500_v31, %v3047_v61  ;;  %v4610_v4 = vpop.permute.xlu2 %3109  ;;  %v2178_v0 = vsel %vm2176_vm7, %v2124_v2, 0 }
 0x133   : > { %3249 = vrot.lane.b32.xlu0 %v5505_v44, %s3460_s26  ;;  %2185 = vmatpush.bf16.msra.mxu0 %v2178_v0 }
 0x134   : > { %2741 = vmatpush.bf16.msra.mxu1 %v2178_v0  ;;  %2742 = vmatpush.bf16.msra.mxu2 %v2178_v0 }
 0x135   : > { %v3040_v12 = vpop.permute.xlu0 %3039  ;;  %3269 = vrot.lane.b32.xlu1 %v5525_v29, %s3458_s24  ;;  %2743 = vmatpush.bf16.msra.mxu3 %v2178_v0  ;;  %v5535_v0 = vld [vmem:[#allocation41_spill] sm:$0xff] }
 0x136   : > { %v3042_v23 = vunpack.i.h.bf16 %v3040_v12  ;;  %v3041_v6 = vunpack.i.l.bf16 %v3040_v12  ;;  %v2738_v12 = vld [vmem:[%s5376_s5] sm:$0xff] }
 0x137   : > { %v3060_v60 = vpop.permute.xlu1 %3059 }
 0x138   : > { %v4621_v31 = vsel %vm1927_vm6, %v4349_v5, %v3042_v23  ;;  %v4625_v44 = vsel %vm1927_vm6, %v4352_v1, %v3041_v6  ;;  %v3062_v40 = vunpack.i.h.bf16 %v3060_v60  ;;  %v3061_v59 = vunpack.i.l.bf16 %v3060_v60  ;;  %3289 = vrot.lane.b32.xlu2 %v5531_v28, %s3460_s26  ;;  %v2739_v1 = vld [vmem:[%s5376_s5 + $0x8] sm:$0xff]  ;;  %v5533_v23 = vld [vmem:[#allocation36_spill] sm:$0xff]  ;;  %v5534_v6 = vld [vmem:[#allocation26_spill] sm:$0xff] }
 0x139   : > { %2186 = vmatpush.bf16.msra.mxu0 %v2739_v1  ;;  %2744 = vmatpush.bf16.msra.mxu1 %v2739_v1 }
 0x13a   : > { %v4631_v29 = vsel %vm1927_vm6, %v4532_v3, %v3061_v59  ;;  %v4635_v62 = vsel %vm1927_vm6, %v4528_v49, %v3062_v40  ;;  %v4637_v5 = vpop.permute.xlu2 %3124  ;;  %v5532_v3 = vld [vmem:[#allocation5_spill] sm:$0xff]  ;;  %2745 = vmatpush.bf16.msra.mxu2 %v2739_v1  ;;  %2746 = vmatpush.bf16.msra.mxu3 %v2739_v1 }
 0x13b   : > { %3264 = vrot.lane.b32.xlu0 %v5519_v47, %s3458_s24 }
 0x13d   : > { %v3055_v13 = vpop.permute.xlu0 %3054  ;;  %3284 = vrot.lane.b32.xlu1 %v5532_v3, %s3460_s26  ;;  %2187 = vmatpush.bf16.msra.mxu0 %v2738_v12  ;;  %v5536_v3 = vld [vmem:[#allocation37_spill] sm:$0xff] }
 0x13e   : > { %v3057_v49 = vunpack.i.h.bf16 %v3055_v13  ;;  %v3056_v38 = vunpack.i.l.bf16 %v3055_v13  ;;  %2747 = vmatpush.bf16.msra.mxu1 %v2738_v12  ;;  %2748 = vmatpush.bf16.msra.mxu2 %v2738_v12 }
 0x13f   : > { %v3075_v61 = vpop.permute.xlu1 %3074  ;;  %2749 = vmatpush.bf16.msra.mxu3 %v2738_v12 }
 0x140   : > { %v4648_v10 = vsel %vm1927_vm6, %v4381_v54, %v3056_v38  ;;  %v4652_v47 = vsel %vm1927_vm6, %v4384_v18, %v3057_v49  ;;  %v3077_v57 = vunpack.i.h.bf16 %v3075_v61  ;;  %v3076_v42 = vunpack.i.l.bf16 %v3075_v61  ;;  %3304 = vrot.lane.b32.xlu2 %v5529_v39, %s3458_s24 }
 0x142   : > { %v4661_v54 = vsel %vm1927_vm6, %v4552_v11, %v3076_v42  ;;  %v4665_v18 = vsel %vm1927_vm6, %v4548_v37, %v3077_v57  ;;  %v4667_v30 = vpop.permute.xlu2 %3139  ;;  %v5538_v42 = vld [vmem:[#allocation20_spill] sm:$0xff] }
 0x143   : > { %3279 = vrot.lane.b32.xlu0 %v5533_v23, %s3461_s9 }
 0x145   : > { %v3070_v39 = vpop.permute.xlu0 %3069  ;;  %3299 = vrot.lane.b32.xlu1 %v5534_v6, %s3459_s25 }
 0x146   : > { %v3072_v60 = vunpack.i.h.bf16 %v3070_v39  ;;  %v3071_v2 = vunpack.i.l.bf16 %v3070_v39 }
 0x147   : > { %v3090_v11 = vpop.permute.xlu1 %3089 }
 0x148   : > { %v4675_v37 = vsel %vm1927_vm6, %v4413_v43, %v3071_v2  ;;  %v4679_v40 = vsel %vm1927_vm6, %v4416_v17, %v3072_v60  ;;  %v3092_v59 = vunpack.i.h.bf16 %v3090_v11  ;;  %v3091_v28 = vunpack.i.l.bf16 %v3090_v11  ;;  %3319 = vrot.lane.b32.xlu2 %v5535_v0, %s3461_s9  ;;  %v5541_v11 = vld [vmem:[#allocation34_spill] sm:$0xff] }
 0x149   : > { %v3027_v60 = vunpack.i.h.bf16 %v4590_v51  ;;  %v5542_v0 = vld [vmem:[#allocation18_spill] sm:$0xff] }
 0x14a   : > { %v4685_v1 = vsel %vm1927_vm6, %v4576_v35, %v3091_v28  ;;  %v4689_v13 = vsel %vm1927_vm6, %v4572_v50, %v3092_v59  ;;  %v4693_v43 = vpop.permute.xlu2 %3154 }
 0x14b   : > { %3294 = vrot.lane.b32.xlu0 %v4010_v16, %s3459_s25  ;;  %v5537_v16 = vld [vmem:[#allocation27_spill] sm:$0xff] }
 0x14d   : > { %v3085_v17 = vpop.permute.xlu0 %3084  ;;  %3314 = vrot.lane.b32.xlu1 %v5536_v3, %s3461_s9 }
 0x14e   : > { %v3087_v49 = vunpack.i.h.bf16 %v3085_v17  ;;  %v3086_v38 = vunpack.i.l.bf16 %v3085_v17 }
 0x14f   : > { %v3105_v61 = vpop.permute.xlu1 %3104 }
 0x150   : > { %v4699_v35 = vsel %vm1927_vm6, %v4443_v21, %v3086_v38  ;;  %v4703_v50 = vsel %vm1927_vm6, %v4446_v33, %v3087_v49  ;;  %3334 = vrot.lane.b32.xlu2 %v5537_v16, %s3459_s25  ;;  %v3026_v33 = vunpack.i.l.bf16 %v4590_v51  ;;  %v3107_v59 = vunpack.i.h.bf16 %v3105_v61 }
 0x151   : > { %v3106_v28 = vunpack.i.l.bf16 %v3105_v61  ;;  %v3127_v51 = vunpack.i.h.bf16 %v4637_v5  ;;  %v3126_v38 = vunpack.i.l.bf16 %v4637_v5 }
 0x152   : > { %v4711_v39 = vpop.permute.xlu2 %3169 }
 0x153   : > { %3309 = vrot.lane.b32.xlu0 %v5527_v63, %s3458_s24 }
 0x155   : > { %v3100_v57 = vpop.permute.xlu0 %3099  ;;  %3329 = vrot.lane.b32.xlu1 %v5538_v42, %s3460_s26  ;;  %v638_v42 = vld [vmem:[%s470_s20] sm:$0xff] }
 0x156   : > { %v3102_v12 = vunpack.i.h.bf16 %v3100_v57  ;;  %v3101_v23 = vunpack.i.l.bf16 %v3100_v57 }
 0x157   : > { %v3120_v21 = vpop.permute.xlu1 %3119 }
 0x158   : > { %v4717_v2 = vsel %vm1927_vm6, %v4469_v32, %v3101_v23  ;;  %v4721_v63 = vsel %vm1927_vm6, %v4472_v8, %v3102_v12  ;;  %3349 = vrot.lane.b32.xlu2 %v5541_v11, %s3461_s9  ;;  %v1928_v32 = vsel %vm1927_vm6, %v4315_v9, %v3026_v33  ;;  %v1929_v8 = vsel %vm1927_vm6, %v4318_v36, %v3027_v60  ;;  %v639_v23 = vld [vmem:[%s470_s20 + $0x8] sm:$0xff]  ;;  %v3428_v11 = vld [vmem:[%s5374_s3] ss:$0 sm:$0xff] }
 0x159   : > { %5539 = vst [vmem:[#allocation11_spill] sm:$0xff] %v4717_v2  ;;  %v3122_v17 = vunpack.i.h.bf16 %v3120_v21  ;;  %v3121_v3 = vunpack.i.l.bf16 %v3120_v21  ;;  %v1961_v9 = vsel %vm1960_vm8, %v1928_v32, %v3106_v28  ;;  %v1962_v36 = vsel %vm1960_vm8, %v1929_v8, %v3107_v59  ;;  %v5543_v8 = vld [vmem:[#allocation29_spill] sm:$0xff] }
 0x15a   : > { %5540 = vst [vmem:[#allocation10_spill] sm:$0xff] %v4721_v63  ;;  %v4743_v33 = vpop.permute.xlu2 %3184  ;;  %v640_v59 = vmul.f32 %v3428_v11, %v638_v42  ;;  %v641_v32 = vmul.f32 %v3428_v11, %v639_v23  ;;  %v3141_v11 = vunpack.i.l.bf16 %v4667_v30  ;;  %v5548_v63 = vld [vmem:[#allocation12_spill] sm:$0xff] }
 0x15b   : > { %3324 = vrot.lane.b32.xlu0 %v5542_v0, %s3460_s26 }
 0x15d   : > { %v3115_v49 = vpop.permute.xlu0 %3114  ;;  %3344 = vrot.lane.b32.xlu1 %v5534_v6, %s3458_s24 }
 0x15e   : > { %v3117_v61 = vunpack.i.h.bf16 %v3115_v49  ;;  %v3116_v57 = vunpack.i.l.bf16 %v3115_v49 }
 0x15f   : > { %v3135_v12 = vpop.permute.xlu1 %3134 }
 0x160   : > { %v1994_v21 = vsel %vm1993_vm9, %v1961_v9, %v3116_v57  ;;  %v1995_v60 = vsel %vm1993_vm9, %v1962_v36, %v3117_v61  ;;  %3364 = vrot.lane.b32.xlu2 %v5537_v16, %s3458_s24  ;;  %v3112_v57 = vunpack.i.h.bf16 %v4610_v4 }
 0x161   : > { %v2027_v5 = vsel %vm2026_vm10, %v1994_v21, %v3121_v3  ;;  %v2028_v6 = vsel %vm2026_vm10, %v1995_v60, %v3122_v17  ;;  %v3429_v17 = vld [vmem:[%s5375_s4] ss:$0 sm:$0xff]  ;;  %v3137_v21 = vunpack.i.h.bf16 %v3135_v12  ;;  %v5544_v60 = vld [vmem:[#allocation16_spill] sm:$0xff] }
 0x162   : > { %v2060_v28 = vsel %vm2059_vm11, %v2027_v5, %v3126_v38  ;;  %v2061_v0 = vsel %vm2059_vm11, %v2028_v6, %v3127_v51  ;;  %v642_v3 = vadd.f32 %v3429_v17, %v640_v59  ;;  %v643_v38 = vadd.f32 %v3429_v17, %v641_v32  ;;  %v4764_v9 = vpop.permute.xlu2 %3199 }
 0x163   : > { %3339 = vrot.lane.b32.xlu0 %v5543_v8, %s3459_s25  ;;  %v2092_v49 = vpack.c.bf16 %v2061_v0, %v2060_v28  ;;  %v3111_v51 = vunpack.i.l.bf16 %v4610_v4  ;;  %v1964_v5 = vsel %vm1960_vm8, %v4586_v26, %v3112_v57  ;;  %v3142_v6 = vunpack.i.h.bf16 %v4667_v30  ;;  %v5545_v0 = vld [vmem:[#allocation35_spill] sm:$0xff] }
 0x164   : > { %v644_v42 = vmax.f32 %v642_v3, 0.0  ;;  %v645_v36 = vmax.f32 %v643_v38, 0.0  ;;  %v3157_v4 = vunpack.i.h.bf16 %v4693_v43  ;;  %v3156_v59 = vunpack.i.l.bf16 %v4693_v43  ;;  %v5546_v3 = vld [vmem:[#allocation39_spill] sm:$0xff] }
 0x165   : > { %v3130_v16 = vpop.permute.xlu0 %3129  ;;  %2715 = vmatmul.msk.bf16.vlgmr.msra.gmra.mxu0 %vm2127_vm12, %v2092_v49  ;;  %3359 = vrot.lane.b32.xlu1 %v5509_v41, %s3459_s25  ;;  %v1963_v23 = vsel %vm1960_vm8, %v4582_v46, %v3111_v51  ;;  %v3136_v41 = vunpack.i.l.bf16 %v3135_v12  ;;  %v1997_v30 = vsel %vm1993_vm9, %v1964_v5, %v3137_v21 }
 0x166   : > { %v656_v46 = vmul.f32 0.0, %v644_v42  ;;  %v3131_v12 = vunpack.i.l.bf16 %v3130_v16  ;;  %v657_v17 = vmul.f32 0.0, %v645_v36  ;;  %v3132_v38 = vunpack.i.h.bf16 %v3130_v16  ;;  %v5547_v42 = vld [vmem:[#allocation38_spill] sm:$0xff] }
 0x167   : > { %v3150_v61 = vpop.permute.xlu1 %3149  ;;  %v1996_v26 = vsel %vm1993_vm9, %v1963_v23, %v3136_v41 }
 0x168   : > { %3379 = vrot.lane.b32.xlu2 %v5546_v3, %s3461_s9  ;;  %v1430_v3 = vrot.slane %v5548_v63, 2  ;;  %v746_v2 = vrot.slane %v656_v46, 7  ;;  %v1969_v23 = vsel %vm1960_vm8, %v4604_v20, %v3131_v12  ;;  %v747_v21 = vrot.slane %v657_v17, 7 }
 0x169   : > { %v1970_v41 = vsel %vm1960_vm8, %v4608_v58, %v3132_v38  ;;  %v3152_v5 = vunpack.i.h.bf16 %v3150_v61  ;;  %v3066_v63 = vunpack.i.l.bf16 %v4540_v48 }
 0x16b   : > { %3354 = vrot.lane.b32.xlu0 %v5544_v60, %s3460_s26  ;;  %v1427_v60 = vrot.slane %v4159_v27, 2  ;;  %v3067_v27 = vunpack.i.h.bf16 %v4540_v48 }
 0x16d   : > { %v3145_v28 = vpop.permute.xlu0 %3144  ;;  %3374 = vrot.lane.b32.xlu1 %v5545_v0, %s3461_s9  ;;  %v1428_v0 = vrot.slane %v5547_v42, 2 }
 0x16e   : > { %v3147_v32 = vunpack.i.h.bf16 %v3145_v28  ;;  %v3146_v49 = vunpack.i.l.bf16 %v3145_v28 }
 0x16f   : > { %v3165_v51 = vpop.permute.xlu1 %3164  ;;  %v1429_v20 = vsel %vm1051_vm2, %v1427_v60, %v1428_v0  ;;  %v1431_v58 = vsel %vm1051_vm2, %v1428_v0, %v1430_v3  ;;  %v3172_v3 = vunpack.i.h.bf16 %v4711_v39 }
 0x170   : > { %v2029_v43 = vsel %vm2026_vm10, %v1996_v26, %v3146_v49  ;;  %v2030_v57 = vsel %vm2026_vm10, %v1997_v30, %v3147_v32  ;;  %v3151_v32 = vunpack.i.l.bf16 %v3150_v61  ;;  %v748_v49 = vsel %vm694_vm0, %v746_v2, %v747_v21  ;;  %3394 = vrot.lane.b32.xlu2 %v5523_v53, %s3459_s25 }
 0x171   : > { %v2062_v28 = vsel %vm2059_vm11, %v2029_v43, %v3156_v59  ;;  %v2063_v36 = vsel %vm2059_vm11, %v2030_v57, %v3157_v4  ;;  %v4796_v59 = vpop.permute.xlu2 %3214  ;;  %v2002_v4 = vsel %vm1993_vm9, %v1969_v23, %v3141_v11  ;;  %v836_v26 = vsel %vm694_vm0, %v747_v21, 0.0 }
 0x172   : > { %v2093_v16 = vpack.c.bf16 %v2063_v36, %v2062_v28  ;;  %v2035_v48 = vsel %vm2026_vm10, %v2002_v4, %v3151_v32  ;;  %v3167_v30 = vunpack.i.h.bf16 %v3165_v51  ;;  %v3166_v38 = vunpack.i.l.bf16 %v3165_v51 }
 0x173   : > { %3369 = vrot.lane.b32.xlu0 %v5543_v8, %s3458_s24  ;;  %v2003_v8 = vsel %vm1993_vm9, %v1970_v41, %v3142_v6  ;;  %v3403_v60 = vpack.i.bf16 %v1431_v58, %v1429_v20  ;;  %v1728_v0 = vrot.slane %v748_v49, 2  ;;  %v1730_v53 = vrot.slane %v836_v26, 2 }
 0x174   : > { %v2036_v11 = vsel %vm2026_vm10, %v2003_v8, %v3152_v5  ;;  %v1944_v36 = vsel %vm1927_vm6, %v4510_v25, %v3066_v63  ;;  %v3171_v51 = vunpack.i.l.bf16 %v4711_v39  ;;  %v1627_v8 = vrot.slane %v748_v49, 1 }
 0x175   : > { %v3160_v46 = vpop.permute.xlu0 %3159  ;;  %2716 = vmatmul.msk.bf16.gmra.mxu0 %vm2127_vm12, %v2093_v16  ;;  %3389 = vrot.lane.b32.xlu1 %v4324_v52, %s3460_s26  ;;  %v818_v52 = vsel %vm694_vm0, 0.0, %v746_v2  ;;  %v1945_v2 = vsel %vm1927_vm6, %v4514_v56, %v3067_v27  ;;  %v1977_v23 = vsel %vm1960_vm8, %v1944_v36, %v3166_v38  ;;  %v1731_v27 = vsel %vm1051_vm2, %v1728_v0, %v1730_v53 }
 0x176   : > { %v3162_v61 = vunpack.i.h.bf16 %v3160_v46  ;;  %v3161_v12 = vunpack.i.l.bf16 %v3160_v46  ;;  %v1727_v42 = vrot.slane %v818_v52, 2  ;;  %v3408_v28 = vpack.i.bf16 %v748_v49, %v818_v52 }
 0x177   : > { %v3180_v17 = vpop.permute.xlu1 %3179  ;;  %v1978_v16 = vsel %vm1960_vm8, %v1945_v2, %v3167_v30  ;;  %v1626_v46 = vrot.slane %v818_v52, 1  ;;  %v3216_v53 = vunpack.i.l.bf16 %v4796_v59 }
 0x178   : > { %v2068_v6 = vsel %vm2059_vm11, %v2035_v48, %v3161_v12  ;;  %v2069_v43 = vsel %vm2059_vm11, %v2036_v11, %v3162_v61  ;;  %v3182_v21 = vunpack.i.h.bf16 %v3180_v17  ;;  %v3181_v41 = vunpack.i.l.bf16 %v3180_v17  ;;  %3409 = vrot.lane.b32.xlu2 %v3408_v28, %s3461_s9 }
 0x179   : > { %v2096_v57 = vpack.c.bf16 %v2069_v43, %v2068_v6  ;;  %v4827_v25 = vpop.permute.xlu2 %3229  ;;  %v1729_v39 = vsel %vm1051_vm2, %v1727_v42, %v1728_v0  ;;  %v2011_v63 = vsel %vm1993_vm9, %v1978_v16, %v3172_v3  ;;  %v1629_v61 = vrot.slane %v836_v26, 1 }
 0x17a   : > { %v3418_v11 = vpack.i.bf16 %v1731_v27, %v1729_v39  ;;  %v1628_v30 = vsel %vm874_vm1, %v1626_v46, %v1627_v8  ;;  %v3187_v43 = vunpack.i.h.bf16 %v4743_v33 }
 0x17b   : > { %3384 = vrot.lane.b32.xlu0 %v3901_v34, %s3460_s26  ;;  %2719 = vmatmul.msk.bf16.vlgmr.msra.gmra.mxu1 %vm2127_vm12, %v2096_v57  ;;  %v2010_v34 = vsel %vm1993_vm9, %v1977_v23, %v3171_v51  ;;  %v1630_v52 = vsel %vm874_vm1, %v1627_v8, %v1629_v61  ;;  %v3186_v57 = vunpack.i.l.bf16 %v4743_v33 }
 0x17c   : > { %v3413_v6 = vpack.i.bf16 %v1630_v52, %v1628_v30  ;;  %v1966_v2 = vsel %vm1960_vm8, %v4496_v15, %v3187_v43  ;;  %v3201_v15 = vunpack.i.l.bf16 %v4764_v9 }
 0x17d   : > { %v3175_v5 = vpop.permute.xlu0 %3174  ;;  %3404 = vrot.lane.b32.xlu1 %v3403_v60, %s3458_s24  ;;  %v1965_v36 = vsel %vm1960_vm8, %v4493_v14, %v3186_v57 }
 0x17e   : > { %v3177_v56 = vunpack.i.h.bf16 %v3175_v5  ;;  %v3176_v32 = vunpack.i.l.bf16 %v3175_v5 }
 0x17f   : > { %v3195_v4 = vpop.permute.xlu1 %3194 }
 0x180   : > { %v2043_v20 = vsel %vm2026_vm10, %v2010_v34, %v3176_v32  ;;  %v2044_v58 = vsel %vm2026_vm10, %v2011_v63, %v3177_v56  ;;  %v3197_v42 = vunpack.i.h.bf16 %v3195_v4  ;;  %v3196_v0 = vunpack.i.l.bf16 %v3195_v4 }
 0x181   : > { %v2076_v12 = vsel %vm2059_vm11, %v2043_v20, %v3181_v41  ;;  %v2077_v48 = vsel %vm2059_vm11, %v2044_v58, %v3182_v21  ;;  %v3245_v26 = vpop.permute.xlu2 %3244  ;;  %v3202_v32 = vunpack.i.h.bf16 %v4764_v9 }
 0x182   : > { %v2100_v17 = vpack.c.bf16 %v2077_v48, %v2076_v12  ;;  %v1998_v23 = vsel %vm1993_vm9, %v1965_v36, %v3196_v0  ;;  %v1999_v33 = vsel %vm1993_vm9, %v1966_v2, %v3197_v42 }
 0x183   : > { %3399 = vrot.lane.b32.xlu0 %v3403_v60, %s3459_s25  ;;  %v3217_v60 = vunpack.i.h.bf16 %v4796_v59 }
 0x184   : > { %2723 = vmatmul.msk.bf16.vlgmr.msra.gmra.mxu2 %vm2127_vm12, %v2100_v17 }
 0x185   : > { %v3190_v38 = vpop.permute.xlu0 %3189  ;;  %3419 = vrot.lane.b32.xlu1 %v3418_v11, %s3459_s25 }
 0x186   : > { %v3192_v16 = vunpack.i.h.bf16 %v3190_v38  ;;  %v3191_v21 = vunpack.i.l.bf16 %v3190_v38 }
 0x187   : > { %v3210_v49 = vpop.permute.xlu1 %3209 }
 0x188   : > { %v1971_v34 = vsel %vm1960_vm8, %v4521_v45, %v3191_v21  ;;  %v1972_v63 = vsel %vm1960_vm8, %v4524_v22, %v3192_v16  ;;  %v3212_v4 = vunpack.i.h.bf16 %v3210_v49  ;;  %v3211_v46 = vunpack.i.l.bf16 %v3210_v49 }
 0x189   : > { %v3260_v39 = vpop.permute.xlu2 %3259  ;;  %v2004_v58 = vsel %vm1993_vm9, %v1971_v34, %v3201_v15  ;;  %v2005_v8 = vsel %vm1993_vm9, %v1972_v63, %v3202_v32  ;;  %v3246_v49 = vunpack.i.l.bf16 %v3245_v26 }
 0x18a   : > { %v2037_v9 = vsel %vm2026_vm10, %v2004_v58, %v3211_v46  ;;  %v2038_v48 = vsel %vm2026_vm10, %v2005_v8, %v3212_v4 }
 0x18b   : > { %3414 = vrot.lane.b32.xlu0 %v3413_v6, %s3460_s26  ;;  %v3247_v6 = vunpack.i.h.bf16 %v3245_v26 }
 0x18d   : > { %v3205_v28 = vpop.permute.xlu0 %3204 }
 0x18e   : > { %v3207_v3 = vunpack.i.h.bf16 %v3205_v28  ;;  %v3206_v51 = vunpack.i.l.bf16 %v3205_v28 }
 0x18f   : > { %v3225_v41 = vpop.permute.xlu1 %3224 }
 0x190   : > { %v2031_v5 = vsel %vm2026_vm10, %v1998_v23, %v3206_v51  ;;  %v2032_v59 = vsel %vm2026_vm10, %v1999_v33, %v3207_v3  ;;  %v3227_v30 = vunpack.i.h.bf16 %v3225_v41  ;;  %v3226_v52 = vunpack.i.l.bf16 %v3225_v41 }
 0x191   : > { %v2064_v56 = vsel %vm2059_vm11, %v2031_v5, %v3216_v53  ;;  %v2065_v14 = vsel %vm2059_vm11, %v2032_v59, %v3217_v60  ;;  %v4872_v38 = vpop.permute.xlu2 %3274  ;;  %v3232_v23 = vunpack.i.h.bf16 %v4827_v25  ;;  %v3231_v33 = vunpack.i.l.bf16 %v4827_v25 }
 0x192   : > { %v2094_v27 = vpack.c.bf16 %v2065_v14, %v2064_v56  ;;  %v1979_v0 = vsel %vm1960_vm8, %v4675_v37, %v3226_v52  ;;  %v1980_v60 = vsel %vm1960_vm8, %v4679_v40, %v3227_v30  ;;  %v3262_v5 = vunpack.i.h.bf16 %v3260_v39 }
 0x193   : > { %v3261_v59 = vunpack.i.l.bf16 %v3260_v39  ;;  %v1985_v14 = vsel %vm1960_vm8, %v4699_v35, %v3231_v33  ;;  %v1986_v32 = vsel %vm1960_vm8, %v4703_v50, %v3232_v23 }
 0x194   : > { %2717 = vmatmul.msk.bf16.gmra.mxu0 %vm2127_vm12, %v2094_v27 }
 0x195   : > { %v3220_v20 = vpop.permute.xlu0 %3219 }
 0x196   : > { %v3222_v61 = vunpack.i.h.bf16 %v3220_v20  ;;  %v3221_v12 = vunpack.i.l.bf16 %v3220_v20 }
 0x197   : > { %v3240_v11 = vpop.permute.xlu1 %3239 }
 0x198   : > { %v2070_v45 = vsel %vm2059_vm11, %v2037_v9, %v3221_v12  ;;  %v2071_v22 = vsel %vm2059_vm11, %v2038_v48, %v3222_v61  ;;  %v3242_v40 = vunpack.i.h.bf16 %v3240_v11  ;;  %v3241_v21 = vunpack.i.l.bf16 %v3240_v11 }
 0x199   : > { %v2097_v17 = vpack.c.bf16 %v2071_v22, %v2070_v45  ;;  %v3290_v15 = vpop.permute.xlu2 %3289 }
 0x19a   : > { %v2018_v34 = vsel %vm1993_vm9, %v1985_v14, %v3241_v21  ;;  %v2019_v63 = vsel %vm1993_vm9, %v1986_v32, %v3242_v40  ;;  %v3292_v48 = vunpack.i.h.bf16 %v3290_v15  ;;  %v3291_v11 = vunpack.i.l.bf16 %v3290_v15 }
 0x19b   : > { %2720 = vmatmul.msk.bf16.gmra.mxu1 %vm2127_vm12, %v2097_v17 }
 0x19d   : > { %v3235_v43 = vpop.permute.xlu0 %3234 }
 0x19e   : > { %v3237_v57 = vunpack.i.h.bf16 %v3235_v43  ;;  %v3236_v42 = vunpack.i.l.bf16 %v3235_v43 }
 0x19f   : > { %v3255_v53 = vpop.permute.xlu1 %3254 }
 0x1a0   : > { %v2012_v28 = vsel %vm1993_vm9, %v1979_v0, %v3236_v42  ;;  %v2013_v36 = vsel %vm1993_vm9, %v1980_v60, %v3237_v57  ;;  %v3257_v2 = vunpack.i.h.bf16 %v3255_v53  ;;  %v3256_v3 = vunpack.i.l.bf16 %v3255_v53 }
 0x1a1   : > { %v2045_v51 = vsel %vm2026_vm10, %v2012_v28, %v3246_v49  ;;  %v2046_v26 = vsel %vm2026_vm10, %v2013_v36, %v3247_v6  ;;  %v3305_v61 = vpop.permute.xlu2 %3304  ;;  %v3277_v53 = vunpack.i.h.bf16 %v4872_v38 }
 0x1a2   : > { %v2078_v37 = vsel %vm2059_vm11, %v2045_v51, %v3256_v3  ;;  %v2079_v16 = vsel %vm2059_vm11, %v2046_v26, %v3257_v2  ;;  %v3276_v2 = vunpack.i.l.bf16 %v4872_v38 }
 0x1a3   : > { %v2101_v41 = vpack.c.bf16 %v2079_v16, %v2078_v37 }
 0x1a5   : > { %v3250_v56 = vpop.permute.xlu0 %3249  ;;  %2724 = vmatmul.msk.bf16.gmra.mxu2 %vm2127_vm12, %v2101_v41 }
 0x1a6   : > { %v3252_v25 = vunpack.i.h.bf16 %v3250_v56  ;;  %v3251_v27 = vunpack.i.l.bf16 %v3250_v56 }
 0x1a7   : > { %v3270_v4 = vpop.permute.xlu1 %3269 }
 0x1a8   : > { %v2051_v46 = vsel %vm2026_vm10, %v2018_v34, %v3251_v27  ;;  %v2052_v39 = vsel %vm2026_vm10, %v2019_v63, %v3252_v25  ;;  %v3272_v12 = vunpack.i.h.bf16 %v3270_v4  ;;  %v3271_v9 = vunpack.i.l.bf16 %v3270_v4 }
 0x1a9   : > { %v2084_v20 = vsel %vm2059_vm11, %v2051_v46, %v3261_v59  ;;  %v2085_v58 = vsel %vm2059_vm11, %v2052_v39, %v3262_v5  ;;  %v3307_v27 = vunpack.i.h.bf16 %v3305_v61  ;;  %v3306_v34 = vunpack.i.l.bf16 %v3305_v61 }
 0x1aa   : > { %v2104_v35 = vpack.c.bf16 %v2085_v58, %v2084_v20  ;;  %v1973_v52 = vsel %vm1960_vm8, %v4648_v10, %v3271_v9  ;;  %v1974_v6 = vsel %vm1960_vm8, %v4652_v47, %v3272_v12  ;;  %v3320_v10 = vpop.permute.xlu2 %3319 }
 0x1ab   : > { %v1981_v58 = vsel %vm1960_vm8, %v4661_v54, %v3306_v34 }
 0x1ac   : > { %2727 = vmatmul.msk.bf16.vlgmr.msra.gmra.mxu3 %vm2127_vm12, %v2104_v35  ;;  %v1982_v35 = vsel %vm1960_vm8, %v4665_v18, %v3307_v27  ;;  %v3321_v18 = vunpack.i.l.bf16 %v3320_v10 }
 0x1ad   : > { %v3265_v50 = vpop.permute.xlu0 %3264 }
 0x1ae   : > { %v3266_v22 = vunpack.i.l.bf16 %v3265_v50  ;;  %v3267_v49 = vunpack.i.h.bf16 %v3265_v50 }
 0x1af   : > { %v3285_v8 = vpop.permute.xlu1 %3284 }
 0x1b0   : > { %v1967_v47 = vsel %vm1960_vm8, %v4625_v44, %v3266_v22  ;;  %v1968_v26 = vsel %vm1960_vm8, %v4621_v31, %v3267_v49  ;;  %v3287_v23 = vunpack.i.h.bf16 %v3285_v8  ;;  %v3286_v33 = vunpack.i.l.bf16 %v3285_v8 }
 0x1b1   : > { %v2000_v40 = vsel %vm1993_vm9, %v1967_v47, %v3276_v2  ;;  %v2001_v38 = vsel %vm1993_vm9, %v1968_v26, %v3277_v53 }
 0x1b2   : > { %v2033_v44 = vsel %vm2026_vm10, %v2000_v40, %v3286_v33  ;;  %v2034_v5 = vsel %vm2026_vm10, %v2001_v38, %v3287_v23  ;;  %v3335_v32 = vpop.permute.xlu2 %3334 }
 0x1b3   : > { %v3337_v46 = vunpack.i.h.bf16 %v3335_v32  ;;  %v3336_v39 = vunpack.i.l.bf16 %v3335_v32 }
 0x1b5   : > { %v3280_v45 = vpop.permute.xlu0 %3279 }
 0x1b6   : > { %v3282_v17 = vunpack.i.h.bf16 %v3280_v45  ;;  %v3281_v30 = vunpack.i.l.bf16 %v3280_v45 }
 0x1b7   : > { %v3300_v43 = vpop.permute.xlu1 %3299 }
 0x1b8   : > { %v2006_v57 = vsel %vm1993_vm9, %v1973_v52, %v3281_v30  ;;  %v2007_v42 = vsel %vm1993_vm9, %v1974_v6, %v3282_v17  ;;  %v3302_v0 = vunpack.i.h.bf16 %v3300_v43  ;;  %v3301_v60 = vunpack.i.l.bf16 %v3300_v43 }
 0x1b9   : > { %v2039_v28 = vsel %vm2026_vm10, %v2006_v57, %v3291_v11  ;;  %v2040_v36 = vsel %vm2026_vm10, %v2007_v42, %v3292_v48  ;;  %v3322_v52 = vunpack.i.h.bf16 %v3320_v10 }
 0x1ba   : > { %v2072_v3 = vsel %vm2059_vm11, %v2039_v28, %v3301_v60  ;;  %v2073_v51 = vsel %vm2059_vm11, %v2040_v36, %v3302_v0  ;;  %v3350_v50 = vpop.permute.xlu2 %3349 }
 0x1bb   : > { %v2098_v37 = vpack.c.bf16 %v2073_v51, %v2072_v3  ;;  %v3352_v33 = vunpack.i.h.bf16 %v3350_v50 }
 0x1bd   : > { %v3295_v16 = vpop.permute.xlu0 %3294  ;;  %2721 = vmatmul.msk.bf16.gmra.mxu1 %vm2127_vm12, %v2098_v37  ;;  %v3351_v37 = vunpack.i.l.bf16 %v3350_v50 }
 0x1be   : > { %v3297_v21 = vunpack.i.h.bf16 %v3295_v16  ;;  %v3296_v41 = vunpack.i.l.bf16 %v3295_v16 }
 0x1bf   : > { %v3315_v59 = vpop.permute.xlu1 %3314 }
 0x1c0   : > { %v2066_v56 = vsel %vm2059_vm11, %v2033_v44, %v3296_v41  ;;  %v2067_v31 = vsel %vm2059_vm11, %v2034_v5, %v3297_v21  ;;  %v3317_v63 = vunpack.i.h.bf16 %v3315_v59  ;;  %v3316_v4 = vunpack.i.l.bf16 %v3315_v59 }
 0x1c1   : > { %v2095_v14 = vpack.c.bf16 %v2067_v31, %v2066_v56  ;;  %v4953_v31 = vld [vmem:[%s5377_s6] ss:$0 sm:$0xff] }
 0x1c2   : > { %v2014_v9 = vsel %vm1993_vm9, %v1981_v58, %v3316_v4  ;;  %v2015_v48 = vsel %vm1993_vm9, %v1982_v35, %v3317_v63 }
 0x1c3   : > { %2718 = vmatmul.msk.bf16.gmra.mxu0 %vm2127_vm12, %v2095_v14 }
 0x1c5   : > { %v3310_v15 = vpop.permute.xlu0 %3309 }
 0x1c6   : > { %v3312_v11 = vunpack.i.h.bf16 %v3310_v15  ;;  %v3311_v61 = vunpack.i.l.bf16 %v3310_v15 }
 0x1c7   : > { %v3330_v25 = vpop.permute.xlu1 %3329 }
 0x1c8   : > { %v1987_v49 = vsel %vm1960_vm8, %v4685_v1, %v3311_v61  ;;  %v1988_v43 = vsel %vm1960_vm8, %v4689_v13, %v3312_v11  ;;  %v3332_v57 = vunpack.i.h.bf16 %v3330_v25  ;;  %v3331_v42 = vunpack.i.l.bf16 %v3330_v25  ;;  %v3365_v1 = vpop.permute.xlu2 %3364 }
 0x1c9   : > { %v2020_v60 = vsel %vm1993_vm9, %v1987_v49, %v3321_v18  ;;  %v2021_v53 = vsel %vm1993_vm9, %v1988_v43, %v3322_v52 }
 0x1ca   : > { %v2053_v2 = vsel %vm2026_vm10, %v2020_v60, %v3331_v42  ;;  %v2054_v10 = vsel %vm2026_vm10, %v2021_v53, %v3332_v57 }
 0x1cd   : > { %v3325_v20 = vpop.permute.xlu0 %3324 }
 0x1ce   : > { %v3327_v8 = vunpack.i.h.bf16 %v3325_v20  ;;  %v3326_v12 = vunpack.i.l.bf16 %v3325_v20  ;;  %v3367_v20 = vunpack.i.h.bf16 %v3365_v1 }
 0x1cf   : > { %v3345_v45 = vpop.permute.xlu1 %3344 }
 0x1d0   : > { %v2047_v22 = vsel %vm2026_vm10, %v2014_v9, %v3326_v12  ;;  %v2048_v17 = vsel %vm2026_vm10, %v2015_v48, %v3327_v8  ;;  %v3347_v3 = vunpack.i.h.bf16 %v3345_v45  ;;  %v3346_v51 = vunpack.i.l.bf16 %v3345_v45 }
 0x1d1   : > { %v2080_v30 = vsel %vm2059_vm11, %v2047_v22, %v3336_v39  ;;  %v2081_v54 = vsel %vm2059_vm11, %v2048_v17, %v3337_v46  ;;  %v3366_v39 = vunpack.i.l.bf16 %v3365_v1  ;;  %v1984_v45 = vsel %vm1960_vm8, %v4568_v55, %v3367_v20 }
 0x1d2   : > { %v2102_v6 = vpack.c.bf16 %v2081_v54, %v2080_v30  ;;  %v1975_v16 = vsel %vm1960_vm8, %v4631_v29, %v3346_v51  ;;  %v1976_v40 = vsel %vm1960_vm8, %v4635_v62, %v3347_v3  ;;  %v3380_v62 = vpop.permute.xlu2 %3379 }
 0x1d3   : > { %v2008_v59 = vsel %vm1993_vm9, %v1975_v16, %v3351_v37  ;;  %v2009_v56 = vsel %vm1993_vm9, %v1976_v40, %v3352_v33  ;;  %v1983_v9 = vsel %vm1960_vm8, %v4565_v24, %v3366_v39  ;;  %v3382_v42 = vunpack.i.h.bf16 %v3380_v62 }
 0x1d4   : > { %2725 = vmatmul.msk.bf16.gmra.mxu2 %vm2127_vm12, %v2102_v6 }
 0x1d5   : > { %v3340_v0 = vpop.permute.xlu0 %3339 }
 0x1d6   : > { %v3342_v28 = vunpack.i.h.bf16 %v3340_v0  ;;  %v3341_v36 = vunpack.i.l.bf16 %v3340_v0  ;;  %v3381_v0 = vunpack.i.l.bf16 %v3380_v62 }
 0x1d7   : > { %v3360_v47 = vpop.permute.xlu1 %3359 }
 0x1d8   : > { %v2086_v13 = vsel %vm2059_vm11, %v2053_v2, %v3341_v36  ;;  %v2087_v26 = vsel %vm2059_vm11, %v2054_v10, %v3342_v28  ;;  %v3362_v38 = vunpack.i.h.bf16 %v3360_v47  ;;  %v3361_v21 = vunpack.i.l.bf16 %v3360_v47 }
 0x1d9   : > { %v2105_v23 = vpack.c.bf16 %v2087_v26, %v2086_v13 }
 0x1da   : > { %v3395_v35 = vpop.permute.xlu2 %3394 }
 0x1db   : > { %2728 = vmatmul.msk.bf16.gmra.mxu3 %vm2127_vm12, %v2105_v23  ;;  %v3397_v11 = vunpack.i.h.bf16 %v3395_v35  ;;  %v3396_v61 = vunpack.i.l.bf16 %v3395_v35 }
 0x1dd   : > { %v3355_v41 = vpop.permute.xlu0 %3354 }
 0x1de   : > { %v3357_v44 = vunpack.i.h.bf16 %v3355_v41  ;;  %v3356_v5 = vunpack.i.l.bf16 %v3355_v41 }
 0x1df   : > { %v3375_v14 = vpop.permute.xlu1 %3374 }
 0x1e0   : > { %v2041_v29 = vsel %vm2026_vm10, %v2008_v59, %v3356_v5  ;;  %v2042_v32 = vsel %vm2026_vm10, %v2009_v56, %v3357_v44  ;;  %v3377_v50 = vunpack.i.h.bf16 %v3375_v14  ;;  %v3376_v8 = vunpack.i.l.bf16 %v3375_v14  ;;  %v5549_v14 = vld [vmem:[#allocation11_spill] sm:$0xff] }
 0x1e1   : > { %v2074_v15 = vsel %vm2059_vm11, %v2041_v29, %v3361_v21  ;;  %v2075_v25 = vsel %vm2059_vm11, %v2042_v32, %v3362_v38  ;;  %v5550_v32 = vld [vmem:[#allocation10_spill] sm:$0xff] }
 0x1e2   : > { %v2189_v27 = vpop.f32.mrf.mxu0  ;;  %v2099_v34 = vpack.c.bf16 %v2075_v25, %v2074_v15  ;;  %v2016_v54 = vsel %vm1993_vm9, %v1983_v9, %v3376_v8  ;;  %v2017_v52 = vsel %vm1993_vm9, %v1984_v45, %v3377_v50  ;;  %v3410_v33 = vpop.permute.xlu2 %3409 }
 0x1e3   : > { %v4966_v63 = vadd.f32 %v4953_v31, %v2189_v27  ;;  %v3412_v5 = vunpack.i.h.bf16 %v3410_v33  ;;  %v3411_v59 = vunpack.i.l.bf16 %v3410_v33 }
 0x1e4   : > { %2722 = vmatmul.msk.bf16.gmra.mxu1 %vm2127_vm12, %v2099_v34 }
 0x1e5   : > { %2269 = vst.msk [vmem:[%s4963_s12] sm:$0xff] %vm1861_vm4, %v4966_v63  ;;  %v3370_v4 = vpop.permute.xlu0 %3369 }
 0x1e6   : > { %v3371_v22 = vunpack.i.l.bf16 %v3370_v4  ;;  %v3372_v18 = vunpack.i.h.bf16 %v3370_v4 }
 0x1e7   : > { %v3390_v46 = vpop.permute.xlu1 %3389 }
 0x1e8   : > { %v1989_v55 = vsel %vm1960_vm8, %v4595_v19, %v3371_v22  ;;  %v1990_v28 = vsel %vm1960_vm8, %v4598_v7, %v3372_v18  ;;  %v3392_v36 = vunpack.i.h.bf16 %v3390_v46  ;;  %v3391_v2 = vunpack.i.l.bf16 %v3390_v46 }
 0x1e9   : > { %v2022_v19 = vsel %vm1993_vm9, %v1989_v55, %v3381_v0  ;;  %v2023_v1 = vsel %vm1993_vm9, %v1990_v28, %v3382_v42 }
 0x1ea   : > { %v2191_v58 = vpop.f32.mrf.mxu0  ;;  %v2055_v7 = vsel %vm2026_vm10, %v2022_v19, %v3391_v2  ;;  %v2056_v13 = vsel %vm2026_vm10, %v2023_v1, %v3392_v36 }
 0x1eb   : > { %v4973_v12 = vadd.f32 %v4953_v31, %v2191_v58 }
 0x1ed   : > { %2270 = vst.msk [vmem:[%s4963_s12 + $0x8] sm:$0xff] %vm1861_vm4, %v4973_v12  ;;  %v3385_v48 = vpop.permute.xlu0 %3384  ;;  %v2302_v1 = vsel %vm1861_vm4, %v4973_v12, 0.0 }
 0x1ee   : > { %v3387_v17 = vunpack.i.h.bf16 %v3385_v48  ;;  %v3386_v30 = vunpack.i.l.bf16 %v3385_v48 }
 0x1ef   : > { %v3405_v49 = vpop.permute.xlu1 %3404 }
 0x1f0   : > { %v2049_v24 = vsel %vm2026_vm10, %v2016_v54, %v3386_v30  ;;  %v2050_v6 = vsel %vm2026_vm10, %v2017_v52, %v3387_v17  ;;  %v3407_v26 = vunpack.i.h.bf16 %v3405_v49  ;;  %v3406_v23 = vunpack.i.l.bf16 %v3405_v49 }
 0x1f1   : > { %v2082_v43 = vsel %vm2059_vm11, %v2049_v24, %v3396_v61  ;;  %v2083_v57 = vsel %vm2059_vm11, %v2050_v6, %v3397_v11 }
 0x1f2   : > { %v2194_v60 = vpop.f32.mrf.mxu0  ;;  %v2103_v53 = vpack.c.bf16 %v2083_v57, %v2082_v43  ;;  %v1991_v29 = vsel %vm1960_vm8, %v5549_v14, %v3406_v23  ;;  %v1992_v62 = vsel %vm1960_vm8, %v5550_v32, %v3407_v26 }
 0x1f3   : > { %v4993_v10 = vadd.f32 %v4953_v31, %v2194_v60  ;;  %v2024_v46 = vsel %vm1993_vm9, %v1991_v29, %v3411_v59  ;;  %v2025_v39 = vsel %vm1993_vm9, %v1992_v62, %v3412_v5 }
 0x1f4   : > { %2726 = vmatmul.msk.bf16.gmra.mxu2 %vm2127_vm12, %v2103_v53 }
 0x1f5   : > { %2271 = vst.msk [vmem:[%s4963_s12 + $0x10] sm:$0xff] %vm1861_vm4, %v4993_v10  ;;  %v3400_v47 = vpop.permute.xlu0 %3399 }
 0x1f6   : > { %v3402_v3 = vunpack.i.h.bf16 %v3400_v47  ;;  %v3401_v51 = vunpack.i.l.bf16 %v3400_v47 }
 0x1f7   : > { %v3420_v44 = vpop.permute.xlu1 %3419 }
 0x1f8   : > { %v2209_v37 = vpop.f32.mrf.mxu1  ;;  %v2088_v16 = vsel %vm2059_vm11, %v2055_v7, %v3401_v51  ;;  %v2089_v40 = vsel %vm2059_vm11, %v2056_v13, %v3402_v3  ;;  %v3422_v25 = vunpack.i.h.bf16 %v3420_v44  ;;  %v3421_v27 = vunpack.i.l.bf16 %v3420_v44 }
 0x1f9   : > { %v5006_v38 = vadd.f32 %v4953_v31, %v2209_v37  ;;  %v2106_v21 = vpack.c.bf16 %v2089_v40, %v2088_v16  ;;  %v2301_v7 = vsel %vm1861_vm4, %v4966_v63, 0.0  ;;  %v2304_v13 = vsel %vm1861_vm4, %v4993_v10, 0.0 }
 0x1fa   : > { %v2196_v41 = vpop.f32.mrf.mxu0  ;;  %v2303_v26 = vadd.f32 %v2302_v1, %v2301_v7 }
 0x1fb   : > { %2277 = vst.msk [vmem:[%s4963_s12 + $0x40] sm:$0xff] %vm1861_vm4, %v5006_v38  ;;  %v5012_v56 = vadd.f32 %v4953_v31, %v2196_v41  ;;  %2729 = vmatmul.msk.bf16.gmra.mxu3 %vm2127_vm12, %v2106_v21  ;;  %v2316_v62 = vsel %vm1861_vm4, %v5006_v38, 0.0 }
 0x1fc   : > { %v2305_v33 = vadd.f32 %v2304_v13, %v2303_v26 }
 0x1fd   : > { %2272 = vst.msk [vmem:[%s4963_s12 + $0x18] sm:$0xff] %vm1861_vm4, %v5012_v56  ;;  %v3415_v15 = vpop.permute.xlu0 %3414  ;;  %v2306_v23 = vsel %vm1861_vm4, %v5012_v56, 0.0 }
 0x1fe   : > { %v3417_v34 = vunpack.i.h.bf16 %v3415_v15  ;;  %v3416_v4 = vunpack.i.l.bf16 %v3415_v15  ;;  %v2307_v40 = vadd.f32 %v2306_v23, %v2305_v33 }
 0x200   : > { %v2057_v20 = vsel %vm2026_vm10, %v2024_v46, %v3416_v4  ;;  %v2058_v58 = vsel %vm2026_vm10, %v2025_v39, %v3417_v34  ;;  %v2211_v35 = vpop.f32.mrf.mxu1 }
 0x201   : > { %v5027_v50 = vadd.f32 %v4953_v31, %v2211_v35  ;;  %v2090_v8 = vsel %vm2059_vm11, %v2057_v20, %v3421_v27  ;;  %v2091_v9 = vsel %vm2059_vm11, %v2058_v58, %v3422_v25 }
 0x202   : > { %v2107_v48 = vpack.c.bf16 %v2091_v9, %v2090_v8 }
 0x203   : > { %2278 = vst.msk [vmem:[%s4963_s12 + $0x48] sm:$0xff] %vm1861_vm4, %v5027_v50  ;;  %v2318_v27 = vsel %vm1861_vm4, %v5027_v50, 0.0 }
 0x207   : > { %v2229_v11 = vpop.f32.mrf.mxu2 }
 0x208   : > { %v5035_v61 = vadd.f32 %v4953_v31, %v2229_v11 }
 0x20a   : > { %2285 = vst.msk [vmem:[%s4963_s12 + $0x80] sm:$0xff] %vm1861_vm4, %v5035_v61  ;;  %v2332_v7 = vsel %vm1861_vm4, %v5035_v61, 0.0 }
 0x20b   : > { %2730 = vmatmul.msk.bf16.gmra.mxu3 %vm2127_vm12, %v2107_v48 }
 0x20f   : > { %v2231_v45 = vpop.f32.mrf.mxu2 }
 0x210   : > { %v5042_v22 = vadd.f32 %v4953_v31, %v2231_v45 }
 0x211   : > { %v2199_v17 = vpop.f32.mrf.mxu0 }
 0x212   : > { %2286 = vst.msk [vmem:[%s4963_s12 + $0x88] sm:$0xff] %vm1861_vm4, %v5042_v22  ;;  %v5048_v30 = vadd.f32 %v4953_v31, %v2199_v17  ;;  %v2334_v26 = vsel %vm1861_vm4, %v5042_v22, 0.0 }
 0x214   : > { %2273 = vst.msk [vmem:[%s4963_s12 + $0x20] sm:$0xff] %vm1861_vm4, %v5048_v30  ;;  %v2308_v37 = vsel %vm1861_vm4, %v5048_v30, 0.0 }
 0x215   : > { %v2309_v44 = vadd.f32 %v2308_v37, %v2307_v40 }
 0x218   : > { %v2214_v54 = vpop.f32.mrf.mxu1 }
 0x219   : > { %v5054_v52 = vadd.f32 %v4953_v31, %v2214_v54  ;;  %v2201_v18 = vpop.f32.mrf.mxu0 }
 0x21a   : > { %v5057_v24 = vadd.f32 %v4953_v31, %v2201_v18 }
 0x21b   : > { %2279 = vst.msk [vmem:[%s4963_s12 + $0x50] sm:$0xff] %vm1861_vm4, %v5054_v52  ;;  %v2320_v46 = vsel %vm1861_vm4, %v5054_v52, 0.0 }
 0x21c   : > { %2274 = vst.msk [vmem:[%s4963_s12 + $0x28] sm:$0xff] %vm1861_vm4, %v5057_v24  ;;  %v2310_v41 = vsel %vm1861_vm4, %v5057_v24, 0.0 }
 0x21d   : > { %v2311_v59 = vadd.f32 %v2310_v41, %v2309_v44 }
 0x220   : > { %v2216_v6 = vpop.f32.mrf.mxu1 }
 0x221   : > { %v5066_v49 = vadd.f32 %v4953_v31, %v2216_v6 }
 0x223   : > { %2280 = vst.msk [vmem:[%s4963_s12 + $0x58] sm:$0xff] %vm1861_vm4, %v5066_v49  ;;  %v2322_v8 = vsel %vm1861_vm4, %v5066_v49, 0.0 }
 0x228   : > { %v2234_v43 = vpop.f32.mrf.mxu2 }
 0x229   : > { %v5072_v57 = vadd.f32 %v4953_v31, %v2234_v43 }
 0x22b   : > { %2287 = vst.msk [vmem:[%s4963_s12 + $0x90] sm:$0xff] %vm1861_vm4, %v5072_v57  ;;  %v2336_v33 = vsel %vm1861_vm4, %v5072_v57, 0.0 }
 0x22f   : > { %v2249_v55 = vpop.f32.mrf.mxu3 }
 0x230   : > { %v5078_v42 = vadd.f32 %v4953_v31, %v2249_v55  ;;  %v2236_v0 = vpop.f32.mrf.mxu2 }
 0x231   : > { %v5081_v60 = vadd.f32 %v4953_v31, %v2236_v0 }
 0x232   : > { %2293 = vst.msk [vmem:[%s4963_s12 + $0xc0] sm:$0xff] %vm1861_vm4, %v5078_v42 }
 0x233   : > { %2288 = vst.msk [vmem:[%s4963_s12 + $0x98] sm:$0xff] %vm1861_vm4, %v5081_v60 }
 0x237   : > { %v2251_v53 = vpop.f32.mrf.mxu3 }
 0x238   : > { %v5090_v28 = vadd.f32 %v4953_v31, %v2251_v53 }
 0x23a   : > { %2294 = vst.msk [vmem:[%s4963_s12 + $0xc8] sm:$0xff] %vm1861_vm4, %v5090_v28  ;;  %v2219_v36 = vpop.f32.mrf.mxu1 }
 0x23b   : > { %v5096_v2 = vadd.f32 %v4953_v31, %v2219_v36 }
 0x23d   : > { %2281 = vst.msk [vmem:[%s4963_s12 + $0x60] sm:$0xff] %vm1861_vm4, %v5096_v2  ;;  %v2324_v17 = vsel %vm1861_vm4, %v5096_v2, 0.0 }
 0x240   : > { %v2204_v47 = vpop.f32.mrf.mxu0 }
 0x241   : > { %v5102_v19 = vadd.f32 %v4953_v31, %v2204_v47 }
 0x242   : > { %v2221_v3 = vpop.f32.mrf.mxu1 }
 0x243   : > { %2275 = vst.msk [vmem:[%s4963_s12 + $0x30] sm:$0xff] %vm1861_vm4, %v5102_v19  ;;  %v5110_v51 = vadd.f32 %v4953_v31, %v2221_v3  ;;  %v2312_v5 = vsel %vm1861_vm4, %v5102_v19, 0.0 }
 0x244   : > { %v2313_v29 = vadd.f32 %v2312_v5, %v2311_v59 }
 0x245   : > { %2282 = vst.msk [vmem:[%s4963_s12 + $0x68] sm:$0xff] %vm1861_vm4, %v5110_v51  ;;  %v2326_v43 = vsel %vm1861_vm4, %v5110_v51, 0.0 }
 0x248   : > { %v2206_v16 = vpop.f32.mrf.mxu0 }
 0x249   : > { %v5124_v21 = vadd.f32 %v4953_v31, %v2206_v16  ;;  %v2338_v16 = vsel %vm1861_vm4, %v5081_v60, 0.0 }
 0x24b   : > { %2276 = vst.msk [vmem:[%s4963_s12 + $0x38] sm:$0xff] %vm1861_vm4, %v5124_v21  ;;  %v2314_v14 = vsel %vm1861_vm4, %v5124_v21, 0.0 }
 0x24c   : > { %v2315_v32 = vadd.f32 %v2314_v14, %v2313_v29 }
 0x24e   : > { %v2317_v15 = vadd.f32 %v2316_v62, %v2315_v32 }
 0x250   : > { %v2319_v4 = vadd.f32 %v2318_v27, %v2317_v15 }
 0x252   : > { %v2321_v39 = vadd.f32 %v2320_v46, %v2319_v4 }
 0x254   : > { %v2323_v48 = vadd.f32 %v2322_v8, %v2321_v39  ;;  %v2350_v8 = vsel %vm1861_vm4, %v5090_v28, 0.0 }
 0x256   : > { %v2325_v54 = vadd.f32 %v2324_v17, %v2323_v48 }
 0x257   : > { %v2239_v25 = vpop.f32.mrf.mxu2 }
 0x258   : > { %v5140_v34 = vadd.f32 %v4953_v31, %v2239_v25  ;;  %v2327_v0 = vadd.f32 %v2326_v43, %v2325_v54 }
 0x25a   : > { %2289 = vst.msk [vmem:[%s4963_s12 + $0xa0] sm:$0xff] %vm1861_vm4, %v5140_v34  ;;  %v2340_v44 = vsel %vm1861_vm4, %v5140_v34, 0.0 }
 0x25e   : > { %v2254_v20 = vpop.f32.mrf.mxu3 }
 0x25f   : > { %v5148_v58 = vadd.f32 %v4953_v31, %v2254_v20  ;;  %v2241_v35 = vpop.f32.mrf.mxu2  ;;  %v2348_v20 = vsel %vm1861_vm4, %v5078_v42, 0.0 }
 0x260   : > { %v5153_v9 = vadd.f32 %v4953_v31, %v2241_v35 }
 0x261   : > { %2295 = vst.msk [vmem:[%s4963_s12 + $0xd0] sm:$0xff] %vm1861_vm4, %v5148_v58  ;;  %v2224_v11 = vpop.f32.mrf.mxu1  ;;  %v2352_v54 = vsel %vm1861_vm4, %v5148_v58, 0.0 }
 0x262   : > { %2290 = vst.msk [vmem:[%s4963_s12 + $0xa8] sm:$0xff] %vm1861_vm4, %v5153_v9  ;;  %v5162_v45 = vadd.f32 %v4953_v31, %v2224_v11  ;;  %v2342_v14 = vsel %vm1861_vm4, %v5153_v9, 0.0 }
 0x264   : > { %2283 = vst.msk [vmem:[%s4963_s12 + $0x70] sm:$0xff] %vm1861_vm4, %v5162_v45  ;;  %v2328_v55 = vsel %vm1861_vm4, %v5162_v45, 0.0 }
 0x265   : > { %v2329_v47 = vadd.f32 %v2328_v55, %v2327_v0 }
 0x266   : > { %v2256_v18 = vpop.f32.mrf.mxu3 }
 0x267   : > { %v5170_v6 = vadd.f32 %v4953_v31, %v2256_v18 }
 0x269   : > { %2296 = vst.msk [vmem:[%s4963_s12 + $0xd8] sm:$0xff] %vm1861_vm4, %v5170_v6  ;;  %v2226_v53 = vpop.f32.mrf.mxu1  ;;  %v2354_v43 = vsel %vm1861_vm4, %v5170_v6, 0.0 }
 0x26a   : > { %v5180_v36 = vadd.f32 %v4953_v31, %v2226_v53 }
 0x26c   : > { %2284 = vst.msk [vmem:[%s4963_s12 + $0x78] sm:$0xff] %vm1861_vm4, %v5180_v36  ;;  %v2330_v1 = vsel %vm1861_vm4, %v5180_v36, 0.0 }
 0x26d   : > { %v2331_v3 = vadd.f32 %v2330_v1, %v2329_v47 }
 0x26f   : > { %v2333_v13 = vadd.f32 %v2332_v7, %v2331_v3  ;;  %v3462_v3 = vmov 256.0  }
 0x270   : > { %3426 = vrcp.f32 %v3462_v3 }
 0x271   : > { %v2335_v23 = vadd.f32 %v2334_v26, %v2333_v13 }
 0x273   : > { %v2337_v37 = vadd.f32 %v2336_v33, %v2335_v23 }
 0x275   : > { %v2339_v40 = vadd.f32 %v2338_v16, %v2337_v37 }
 0x276   : > { %v3427_v37 = vpop.eup %3426 }
 0x277   : > { %v2244_v41 = vpop.f32.mrf.mxu2  ;;  %v2341_v59 = vadd.f32 %v2340_v44, %v2339_v40  ;;  %v2371_v44 = vmul.f32 256.0, %v3427_v37  ;;  %vm2375_vm13 = vweird.f32 %v3427_v37 }
 0x278   : > { %v5198_v5 = vadd.f32 %v4953_v31, %v2244_v41 }
 0x279   : > { %v2343_v29 = vadd.f32 %v2342_v14, %v2341_v59 }
 0x27a   : > { %2291 = vst.msk [vmem:[%s4963_s12 + $0xb0] sm:$0xff] %vm1861_vm4, %v5198_v5  ;;  %v2344_v32 = vsel %vm1861_vm4, %v5198_v5, 0.0 }
 0x27b   : > { %v2345_v4 = vadd.f32 %v2344_v32, %v2343_v29  ;;  %v2372_v29 = vsub.f32 1.0, %v2371_v44 }
 0x27e   : > { %v2259_v62 = vpop.f32.mrf.mxu3 }
 0x27f   : > { %v5208_v15 = vadd.f32 %v4953_v31, %v2259_v62  ;;  %v2246_v25 = vpop.f32.mrf.mxu2 }
 0x280   : > { %v5211_v27 = vadd.f32 %v4953_v31, %v2246_v25  ;;  %v2373_v25 = vmul.f32 %v3427_v37, %v2372_v29 }
 0x281   : > { %2297 = vst.msk [vmem:[%s4963_s12 + $0xe0] sm:$0xff] %vm1861_vm4, %v5208_v15  ;;  %v2356_v53 = vsel %vm1861_vm4, %v5208_v15, 0.0 }
 0x282   : > { %2292 = vst.msk [vmem:[%s4963_s12 + $0xb8] sm:$0xff] %vm1861_vm4, %v5211_v27  ;;  %v2346_v46 = vsel %vm1861_vm4, %v5211_v27, 0.0 }
 0x283   : > { %v2347_v39 = vadd.f32 %v2346_v46, %v2345_v4  ;;  %v2374_v46 = vadd.f32 %v3427_v37, %v2373_v25 }
 0x285   : > { %v2349_v35 = vadd.f32 %v2348_v20, %v2347_v39  ;;  %v2376_v39 = vsel %vm2375_vm13, %v3427_v37, %v2374_v46 }
 0x286   : > { %v2261_v48 = vpop.f32.mrf.mxu3 }
 0x287   : > { %v2351_v11 = vadd.f32 %v2350_v8, %v2349_v35  ;;  %v5226_v17 = vadd.f32 %v4953_v31, %v2261_v48 }
 0x289   : > { %2298 = vst.msk [vmem:[%s4963_s12 + $0xe8] sm:$0xff] %vm1861_vm4, %v5226_v17  ;;  %v2353_v18 = vadd.f32 %v2352_v54, %v2351_v11  ;;  %v2358_v7 = vsel %vm1861_vm4, %v5226_v17, 0.0 }
 0x28b   : > { %v2355_v55 = vadd.f32 %v2354_v43, %v2353_v18 }
 0x28d   : > { %v2357_v1 = vadd.f32 %v2356_v53, %v2355_v55 }
 0x28e   : > { %v2264_v0 = vpop.f32.mrf.mxu3 }
 0x28f   : > { %v5238_v47 = vadd.f32 %v4953_v31, %v2264_v0  ;;  %v2359_v13 = vadd.f32 %v2358_v7, %v2357_v1 }
 0x291   : > { %2299 = vst.msk [vmem:[%s4963_s12 + $0xf0] sm:$0xff] %vm1861_vm4, %v5238_v47  ;;  %v2360_v26 = vsel %vm1861_vm4, %v5238_v47, 0.0 }
 0x292   : > { %v2361_v16 = vadd.f32 %v2360_v26, %v2359_v13 }
 0x296   : > { %v2266_v23 = vpop.f32.mrf.mxu3 }
 0x297   : > { %v5248_v33 = vadd.f32 %v4953_v31, %v2266_v23 }
 0x299   : > { %2300 = vst.msk [vmem:[%s4963_s12 + $0xf8] sm:$0xff] %vm1861_vm4, %v5248_v33  ;;  %v2362_v40 = vsel %vm1861_vm4, %v5248_v33, 0.0 }
 0x29a   : > { %v2363_v41 = vadd.f32 %v2362_v40, %v2361_v16 }
 0x29c   : > { %v2364_v59 = vrot.slane %v2363_v41, 4 }
 0x29e   : > { %v2365_v14 = vadd.f32 %v2364_v59, %v2363_v41 }
 0x2a0   : > { %v2366_v32 = vrot.slane %v2365_v14, 2 }
 0x2a2   : > { %v2367_v62 = vadd.f32 %v2366_v32, %v2365_v14 }
 0x2a4   : > { %v2368_v4 = vrot.slane %v2367_v62, 1 }
 0x2a6   : > { %v5255_v31 = vadd.f32 %v2368_v4, %v2367_v62 }
 0x2a8   : > { %v5258_v20 = vmul.f32 %v2376_v39, %v5255_v31 }
 0x2aa   : > { %v2378_v35 = vsub.f32 %v4966_v63, %v5258_v20  ;;  %v2379_v8 = vsub.f32 %v4973_v12, %v5258_v20  ;;  %v2380_v48 = vsub.f32 %v4993_v10, %v5258_v20  ;;  %v2381_v11 = vsub.f32 %v5012_v56, %v5258_v20 }
 0x2ab   : > { %v2382_v43 = vsub.f32 %v5048_v30, %v5258_v20  ;;  %v2383_v0 = vsub.f32 %v5057_v24, %v5258_v20  ;;  %v2384_v10 = vsub.f32 %v5102_v19, %v5258_v20  ;;  %v2385_v30 = vsub.f32 %v5124_v21, %v5258_v20 }
 0x2ac   : > { %v2410_v54 = vmul.f32 %v2378_v35, %v2378_v35  ;;  %v2411_v18 = vmul.f32 %v2379_v8, %v2379_v8  ;;  %v2412_v55 = vmul.f32 %v2380_v48, %v2380_v48  ;;  %v2413_v53 = vmul.f32 %v2381_v11, %v2381_v11 }
 0x2ad   : > { %v2414_v3 = vmul.f32 %v2382_v43, %v2382_v43  ;;  %v2415_v13 = vmul.f32 %v2383_v0, %v2383_v0  ;;  %v2386_v23 = vsub.f32 %v5006_v38, %v5258_v20  ;;  %v2416_v37 = vmul.f32 %v2384_v10, %v2384_v10 }
 0x2ae   : > { %v2442_v63 = vsel %vm1861_vm4, %v2410_v54, 0.0  ;;  %v2443_v12 = vsel %vm1861_vm4, %v2411_v18, 0.0  ;;  %v2445_v56 = vsel %vm1861_vm4, %v2412_v55, 0.0  ;;  %v2447_v26 = vsel %vm1861_vm4, %v2413_v53, 0.0 }
 0x2af   : > { %v2444_v1 = vadd.f32 %v2443_v12, %v2442_v63  ;;  %v2449_v16 = vsel %vm1861_vm4, %v2414_v3, 0.0  ;;  %v2387_v19 = vsub.f32 %v5027_v50, %v5258_v20  ;;  %v2417_v41 = vmul.f32 %v2385_v30, %v2385_v30 }
 0x2b0   : > { %v2451_v44 = vsel %vm1861_vm4, %v2415_v13, 0.0  ;;  %v2388_v21 = vsub.f32 %v5054_v52, %v5258_v20  ;;  %v2418_v14 = vmul.f32 %v2386_v23, %v2386_v23  ;;  %v2453_v29 = vsel %vm1861_vm4, %v2416_v37, 0.0 }
 0x2b1   : > { %v2446_v7 = vadd.f32 %v2445_v56, %v2444_v1  ;;  %v2389_v38 = vsub.f32 %v5066_v49, %v5258_v20  ;;  %v2419_v62 = vmul.f32 %v2387_v19, %v2387_v19  ;;  %v2455_v25 = vsel %vm1861_vm4, %v2417_v41, 0.0 }
 0x2b2   : > { %v2390_v50 = vsub.f32 %v5096_v2, %v5258_v20  ;;  %v2420_v46 = vmul.f32 %v2388_v21, %v2388_v21  ;;  %v2457_v39 = vsel %vm1861_vm4, %v2418_v14, 0.0  ;;  %v2391_v52 = vsub.f32 %v5110_v51, %v5258_v20 }
 0x2b3   : > { %v2448_v24 = vadd.f32 %v2447_v26, %v2446_v7  ;;  %v2421_v8 = vmul.f32 %v2389_v38, %v2389_v38  ;;  %v2459_v48 = vsel %vm1861_vm4, %v2419_v62, 0.0  ;;  %v2392_v49 = vsub.f32 %v5162_v45, %v5258_v20 }
 0x2b4   : > { %v2422_v54 = vmul.f32 %v2390_v50, %v2390_v50  ;;  %v2461_v18 = vsel %vm1861_vm4, %v2420_v46, 0.0  ;;  %v2393_v2 = vsub.f32 %v5180_v36, %v5258_v20  ;;  %v2423_v55 = vmul.f32 %v2391_v52, %v2391_v52 }
 0x2b5   : > { %v2450_v40 = vadd.f32 %v2449_v16, %v2448_v24  ;;  %v2463_v0 = vsel %vm1861_vm4, %v2421_v8, 0.0  ;;  %v2394_v51 = vsub.f32 %v5035_v61, %v5258_v20  ;;  %v2424_v63 = vmul.f32 %v2392_v49, %v2392_v49 }
 0x2b6   : > { %v2465_v12 = vsel %vm1861_vm4, %v2422_v54, 0.0  ;;  %v2395_v45 = vsub.f32 %v5042_v22, %v5258_v20  ;;  %v2425_v10 = vmul.f32 %v2393_v2, %v2393_v2  ;;  %v2467_v3 = vsel %vm1861_vm4, %v2423_v55, 0.0 }
 0x2b7   : > { %v2452_v59 = vadd.f32 %v2451_v44, %v2450_v40  ;;  %v2396_v36 = vsub.f32 %v5072_v57, %v5258_v20  ;;  %v2426_v7 = vmul.f32 %v2394_v51, %v2394_v51  ;;  %v2469_v30 = vsel %vm1861_vm4, %v2424_v63, 0.0 }
 0x2b8   : > { %v2397_v61 = vsub.f32 %v5081_v60, %v5258_v20  ;;  %v2427_v26 = vmul.f32 %v2395_v45, %v2395_v45  ;;  %v2471_v24 = vsel %vm1861_vm4, %v2425_v10, 0.0  ;;  %v2398_v22 = vsub.f32 %v5140_v34, %v5258_v20 }
 0x2b9   : > { %v2454_v32 = vadd.f32 %v2453_v29, %v2452_v59  ;;  %v2428_v37 = vmul.f32 %v2396_v36, %v2396_v36  ;;  %v2473_v16 = vsel %vm1861_vm4, %v2426_v7, 0.0  ;;  %v2399_v57 = vsub.f32 %v5153_v9, %v5258_v20 }
 0x2ba   : > { %v2429_v19 = vmul.f32 %v2397_v61, %v2397_v61  ;;  %v2475_v41 = vsel %vm1861_vm4, %v2427_v26, 0.0  ;;  %v2400_v60 = vsub.f32 %v5198_v5, %v5258_v20  ;;  %v2430_v59 = vmul.f32 %v2398_v22, %v2398_v22 }
 0x2bb   : > { %v2456_v4 = vadd.f32 %v2455_v25, %v2454_v32  ;;  %v2477_v21 = vsel %vm1861_vm4, %v2428_v37, 0.0  ;;  %v2401_v34 = vsub.f32 %v5211_v27, %v5258_v20  ;;  %v2431_v29 = vmul.f32 %v2399_v57, %v2399_v57 }
 0x2bc   : > { %v2479_v32 = vsel %vm1861_vm4, %v2429_v19, 0.0  ;;  %v2402_v9 = vsub.f32 %v5078_v42, %v5258_v20  ;;  %v2432_v62 = vmul.f32 %v2400_v60, %v2400_v60  ;;  %v2481_v25 = vsel %vm1861_vm4, %v2430_v59, 0.0 }
 0x2bd   : > { %v2458_v35 = vadd.f32 %v2457_v39, %v2456_v4  ;;  %v2403_v5 = vsub.f32 %v5090_v28, %v5258_v20  ;;  %v2433_v50 = vmul.f32 %v2401_v34, %v2401_v34  ;;  %v2483_v46 = vsel %vm1861_vm4, %v2431_v29, 0.0 }
 0x2be   : > { %v2404_v27 = vsub.f32 %v5148_v58, %v5258_v20  ;;  %v2485_v52 = vsel %vm1861_vm4, %v2432_v62, 0.0  ;;  %v2405_v42 = vsub.f32 %v5170_v6, %v5258_v20  ;;  %v2406_v28 = vsub.f32 %v5208_v15, %v5258_v20 }
 0x2bf   : > { %v2460_v11 = vadd.f32 %v2459_v48, %v2458_v35  ;;  %v2434_v35 = vmul.f32 %v2402_v9, %v2402_v9  ;;  %v2435_v48 = vmul.f32 %v2403_v5, %v2403_v5  ;;  %v2407_v58 = vsub.f32 %v5226_v17, %v5258_v20 }
 0x2c0   : > { %v2436_v54 = vmul.f32 %v2404_v27, %v2404_v27  ;;  %v2437_v2 = vmul.f32 %v2405_v42, %v2405_v42  ;;  %v2408_v6 = vsub.f32 %v5238_v47, %v5258_v20  ;;  %v2409_v15 = vsub.f32 %v5248_v33, %v5258_v20 }
 0x2c1   : > { %v2462_v43 = vadd.f32 %v2461_v18, %v2460_v11  ;;  %v2487_v11 = vsel %vm1861_vm4, %v2433_v50, 0.0  ;;  %v2489_v18 = vsel %vm1861_vm4, %v2434_v35, 0.0  ;;  %v2491_v55 = vsel %vm1861_vm4, %v2435_v48, 0.0 }
 0x2c2   : > { %v2493_v51 = vsel %vm1861_vm4, %v2436_v54, 0.0  ;;  %v2440_v17 = vmul.f32 %v2408_v6, %v2408_v6 }
 0x2c3   : > { %v2464_v53 = vadd.f32 %v2463_v0, %v2462_v43 }
 0x2c4   : > { %v2501_v7 = vsel %vm1861_vm4, %v2440_v17, 0.0 }
 0x2c5   : > { %v2466_v1 = vadd.f32 %v2465_v12, %v2464_v53  ;;  %v2438_v53 = vmul.f32 %v2406_v28, %v2406_v28  ;;  %v2439_v12 = vmul.f32 %v2407_v58, %v2407_v58 }
 0x2c7   : > { %v2468_v56 = vadd.f32 %v2467_v3, %v2466_v1  ;;  %v2495_v1 = vsel %vm1861_vm4, %v2437_v2, 0.0  ;;  %v2497_v10 = vsel %vm1861_vm4, %v2438_v53, 0.0  ;;  %v2499_v36 = vsel %vm1861_vm4, %v2439_v12, 0.0 }
 0x2c9   : > { %v2470_v13 = vadd.f32 %v2469_v30, %v2468_v56  ;;  %v2441_v56 = vmul.f32 %v2409_v15, %v2409_v15 }
 0x2cb   : > { %v2472_v23 = vadd.f32 %v2471_v24, %v2470_v13  ;;  %v2503_v13 = vsel %vm1861_vm4, %v2441_v56, 0.0 }
 0x2cd   : > { %v2474_v40 = vadd.f32 %v2473_v16, %v2472_v23 }
 0x2cf   : > { %v2476_v44 = vadd.f32 %v2475_v41, %v2474_v40 }
 0x2d1   : > { %v2478_v14 = vadd.f32 %v2477_v21, %v2476_v44 }
 0x2d3   : > { %v2480_v38 = vadd.f32 %v2479_v32, %v2478_v14 }
 0x2d5   : > { %v2482_v4 = vadd.f32 %v2481_v25, %v2480_v38 }
 0x2d7   : > { %v2484_v39 = vadd.f32 %v2483_v46, %v2482_v4 }
 0x2d9   : > { %v2486_v8 = vadd.f32 %v2485_v52, %v2484_v39 }
 0x2db   : > { %v2488_v49 = vadd.f32 %v2487_v11, %v2486_v8 }
 0x2dd   : > { %v2490_v43 = vadd.f32 %v2489_v18, %v2488_v49 }
 0x2df   : > { %v2492_v0 = vadd.f32 %v2491_v55, %v2490_v43 }
 0x2e1   : > { %v2494_v63 = vadd.f32 %v2493_v51, %v2492_v0 }
 0x2e3   : > { %v2496_v45 = vadd.f32 %v2495_v1, %v2494_v63 }
 0x2e5   : > { %v2498_v3 = vadd.f32 %v2497_v10, %v2496_v45 }
 0x2e7   : > { %v2500_v47 = vadd.f32 %v2499_v36, %v2498_v3 }
 0x2e9   : > { %v2502_v30 = vadd.f32 %v2501_v7, %v2500_v47 }
 0x2eb   : > { %v2504_v61 = vadd.f32 %v2503_v13, %v2502_v30 }
 0x2ed   : > { %v2505_v33 = vrot.slane %v2504_v61, 4 }
 0x2ef   : > { %v2506_v20 = vadd.f32 %v2505_v33, %v2504_v61 }
 0x2f1   : > { %v2507_v26 = vrot.slane %v2506_v20, 2 }
 0x2f3   : > { %v2508_v24 = vadd.f32 %v2507_v26, %v2506_v20 }
 0x2f5   : > { %v2509_v23 = vrot.slane %v2508_v24, 1 }
 0x2f7   : > { %v2510_v22 = vadd.f32 %v2509_v23, %v2508_v24 }
 0x2f9   : > { %v2511_v37 = vsel %vm694_vm0, %v5255_v31, %v2510_v22 }
 0x2fa   : > { %2513 = vst.msk [vmem:[%s492_s15] sm:$0x3] %vm2512_vm14, %v2511_v37 }
 0x2fb PF: > { %s19_s29 = sadd.s32 1, %s3452_s29   ;;  %s5551_s27 = smov %s3448_s28 }
 0x2fc   : > { %p16_p5 = scmp.ge.s32.totalorder %s19_s29, 4   ;;  %s5552_s28 = smov %s5554_s30 }
 0x2fe   :  { %18 = sbr.rel (!%p16_p5) target bundleno = 2 (0x2), region = 96 }

</bundles_post_ra>
